<compile_context>
chip_gen: v7x
topology: tpu7x:2x2x1
jax: 0.10.0
libtpu: 0.0.40
codegen_flags: <defaults>
</compile_context>

<pallas_src>
import jax
import jax.numpy as jnp
from jax.experimental import pallas as pl
from jax.experimental.pallas import tpu as pltpu

_VMEM_LIMIT = 32 * 1024 * 1024   # safe on v5e/v6e (128 MiB) and v7x (64 MiB physical)
_BN_EPS = 1e-5


# ----------------------------- Pallas kernels ------------------------------

def _make_conv_kernel(k, w_img, hw, use_bias, with_stats, taps_cin):
    """Conv as k row-tap matmuls over a width-im2col'd, channels-major image.

    x_ref : (k*Cin, Hp*W)  bf16   (Hp = H + k - 1 for k>1, else H; W = image width)
    w_ref : (k, Cout, k*Cin) bf16
    b_ref : (Cout, 1) f32         (only the final conv keeps a bias)
    o_ref : (Cout, H*W) f32       (lane-dense: spatial positions in lanes)
    sum_ref/sq_ref : (Cout, 1) f32 per-image BN partial statistics
    """

    def kernel(x_ref, w_ref, *rest):
        i = 0
        b_ref = None
        if use_bias:
            b_ref = rest[i]
            i += 1
        o_ref = rest[i]
        i += 1
        if with_stats:
            sum_ref, sq_ref = rest[i], rest[i + 1]

        x = x_ref[...]                                   # (k*Cin, Hp*W) bf16
        acc = None
        for dy in range(k):
            # Row-tap window: flat columns [dy*W, dy*W + H*W) of the padded image.
            xs = x if k == 1 else x[:, dy * w_img: dy * w_img + hw]
            wd = w_ref[dy]                               # (Cout, k*Cin) bf16
            if taps_cin == 1:
                # Degenerate K=1 contraction -> plain VPU broadcast multiply.
                d = wd.astype(jnp.float32) * xs.astype(jnp.float32)
            else:
                d = jnp.dot(wd, xs, preferred_element_type=jnp.float32)
            acc = d if acc is None else acc + d          # (Cout, H*W) f32

        if use_bias:
            acc = acc + b_ref[...]                       # (Cout, 1) broadcast
        o_ref[...] = acc
        if with_stats:
            sum_ref[...] = jnp.sum(acc, axis=1, keepdims=True)
            sq_ref[...] = jnp.sum(acc * acc, axis=1, keepdims=True)

    return kernel


def _fused_bn_relu_add_kernel(m_ref, s_ref, ms_ref, mb_ref, ss_ref, sb_ref, o_ref):
    # out = ReLU(main * scale_m + shift_m) + (skip * scale_s + shift_s)
    main = jnp.maximum(m_ref[...] * ms_ref[...] + mb_ref[...], 0.0)
    o_ref[...] = main + s_ref[...] * ss_ref[...] + sb_ref[...]


# ---------------------------- Pallas wrappers -------------------------------

def conv2d_pallas(x, w_prep, bias=None, with_stats=False):
    """'same' conv (odd k) or 1x1 conv in channels-major layout.

    x       : (N, Cin, H, W) f32
    w_prep  : (k, Cout, k*Cin) bf16  (see prep_conv_weight)
    returns : tuple — (preact (N, Cout, H*W) f32 [, chan_sum, chan_sqsum])
    """
    N, cin, H, W = x.shape
    k, cout, taps_cin = w_prep.shape
    assert taps_cin == k * cin

    hw = H * W
    if k == 1:
        xr = x.reshape(N, cin, hw)
        hpw = hw
    else:
        p = k // 2
        xp = jnp.pad(x, ((0, 0), (0, 0), (p, p), (p, p)))
        # width-only im2col: channel index is dx*Cin + c (k-fold, Cin is small)
        xr = jnp.concatenate([xp[:, :, :, dx:dx + W] for dx in range(k)], axis=1)
        hpw = (H + 2 * p) * W
        xr = xr.reshape(N, taps_cin, hpw)
    xr = xr.astype(jnp.bfloat16)

    kernel = _make_conv_kernel(k, W, hw, bias is not None, with_stats, taps_cin)

    in_specs = [
        pl.BlockSpec((None, taps_cin, hpw), lambda n: (n, 0, 0)),   # per-image block
        pl.BlockSpec((k, cout, taps_cin), lambda n: (0, 0, 0)),     # weights resident
    ]
    args = [xr, w_prep]
    if bias is not None:
        in_specs.append(pl.BlockSpec((cout, 1), lambda n: (0, 0)))
        args.append(bias.reshape(cout, 1).astype(jnp.float32))

    out_shape = [jax.ShapeDtypeStruct((N, cout, hw), jnp.float32)]
    out_specs = [pl.BlockSpec((None, cout, hw), lambda n: (n, 0, 0))]
    if with_stats:
        out_shape += [jax.ShapeDtypeStruct((N, cout, 1), jnp.float32)] * 2
        out_specs += [pl.BlockSpec((None, cout, 1), lambda n: (n, 0, 0))] * 2

    return pl.pallas_call(
        kernel,
        grid=(N,),
        in_specs=in_specs,
        out_specs=tuple(out_specs),
        out_shape=tuple(out_shape),
        compiler_params=pltpu.CompilerParams(
            dimension_semantics=("parallel",),
            vmem_limit_bytes=_VMEM_LIMIT,
        ),
    )(*args)


def _pick_tm(m):
    for tm in (1024, 512, 256):
        if m % tm == 0 and m > tm:
            return tm
    return m


def fused_bn_relu_add(main, skip, ms, mb, ss, sb):
    """out = ReLU(main*ms + mb) + (skip*ss + sb), tiled over (batch, spatial)."""
    N, C, M = main.shape
    TM = _pick_tm(M)
    spec_act = pl.BlockSpec((None, C, TM), lambda n, i: (n, 0, i))
    spec_vec = pl.BlockSpec((C, 1), lambda n, i: (0, 0))

    args = (main, skip,
            ms.reshape(C, 1).astype(jnp.float32),
            mb.reshape(C, 1).astype(jnp.float32),
            ss.reshape(C, 1).astype(jnp.float32),
            sb.reshape(C, 1).astype(jnp.float32))

    return pl.pallas_call(
        _fused_bn_relu_add_kernel,
        grid=(N, M // TM),
        in_specs=[spec_act, spec_act, spec_vec, spec_vec, spec_vec, spec_vec],
        out_specs=spec_act,
        out_shape=jax.ShapeDtypeStruct((N, C, M), jnp.float32),
        compiler_params=pltpu.CompilerParams(
            dimension_semantics=("parallel", "parallel"),
            vmem_limit_bytes=_VMEM_LIMIT,
        ),
    )(*args)


# ------------------------------- JAX glue -----------------------------------

def _affine_from_moments(mean, var, gamma, beta, eps=_BN_EPS):
    scale = gamma * jax.lax.rsqrt(var + eps)
    return scale, beta - mean * scale


def conv_bn_branch(x, p):
    """Conv (BN immediately after) -> (flat preact, BN scale, BN shift)."""
    pre, ssum, ssq = conv2d_pallas(x, p["w"], with_stats=True)
    N, _, M = pre.shape
    cnt = float(N * M)
    tot = jnp.sum(ssum, axis=(0, 2))
    tot2 = jnp.sum(ssq, axis=(0, 2))
    mean = tot / cnt
    var = jnp.maximum(tot2 / cnt - mean * mean, 0.0)        # biased (training) variance
    scale, shift = _affine_from_moments(mean, var, p["gamma"], p["beta"])
    return pre, scale, shift


def down_conv_branch(x, p):
    """Conv3x3 -> MaxPool2; BN stats on the pooled tensor (matches nn.Sequential order)."""
    N, _, H, W = x.shape
    (pre,) = conv2d_pallas(x, p["w"], with_stats=False)     # (N, C, H*W)
    C = pre.shape[1]
    pooled = jnp.max(pre.reshape(N, C, H // 2, 2, W // 2, 2), axis=(3, 5))
    mean = jnp.mean(pooled, axis=(0, 2, 3))
    var = jnp.var(pooled, axis=(0, 2, 3))                   # biased, matches BN training
    scale, shift = _affine_from_moments(mean, var, p["gamma"], p["beta"])
    return pooled.reshape(N, C, -1), scale, shift


def upsample2(x):
    return jnp.repeat(jnp.repeat(x, 2, axis=2), 2, axis=3)


# -------------------------------- forward -----------------------------------

def forward(params, x):
    N, _, H, W = x.shape
    assert H % 4 == 0 and W % 4 == 0
    h2, w2, h4, w4 = H // 2, W // 2, H // 4, W // 4

    # first = ReLU(BN(MaxPool(Conv(x)))) + BN(Conv1x1_s2(x))
    m, ms, mb = down_conv_branch(x, params["first"])
    s, ss, sb = conv_bn_branch(x[:, :, ::2, ::2], params["skip_first"])
    first = fused_bn_relu_add(m, s, ms, mb, ss, sb).reshape(N, -1, h2, w2)

    m, ms, mb = down_conv_branch(first, params["second"])
    s, ss, sb = conv_bn_branch(first[:, :, ::2, ::2], params["skip_second"])
    second = fused_bn_relu_add(m, s, ms, mb, ss, sb).reshape(N, -1, h4, w4)

    # third = ReLU(BN(Conv(second))) + second   (identity affine on the residual)
    m, ms, mb = conv_bn_branch(second, params["third"])
    c2 = second.shape[1]
    third = fused_bn_relu_add(m, second.reshape(N, c2, -1), ms, mb,
                              jnp.ones((c2,), jnp.float32),
                              jnp.zeros((c2,), jnp.float32)).reshape(N, c2, h4, w4)

    # fourth: UpConv + decoder skip, computed at low res, upsampled once after the add
    # (nearest-upsample commutes with 1x1-conv, BN stats and ReLU).
    cat23 = jnp.concatenate([second, third], axis=1)
    m, ms, mb = conv_bn_branch(cat23, params["fourth"])
    s, ss, sb = conv_bn_branch(cat23, params["skip_fourth"])
    fourth = upsample2(fused_bn_relu_add(m, s, ms, mb, ss, sb).reshape(N, -1, h4, w4))

    cat14 = jnp.concatenate([first, fourth], axis=1)
    m, ms, mb = conv_bn_branch(cat14, params["fifth"])
    s, ss, sb = conv_bn_branch(cat14, params["skip_fifth"])
    fifth = upsample2(fused_bn_relu_add(m, s, ms, mb, ss, sb).reshape(N, -1, h2, w2))

    cat_out = jnp.concatenate([x, fifth], axis=1)
    (out,) = conv2d_pallas(cat_out, params["sixth"]["w"], bias=params["sixth"]["b"])
    return out.reshape(N, -1, H, W)


# ------------------------------ parameters -----------------------------------

def prep_conv_weight(w_hwio):
    """(k, k, Cin, Cout) -> (k, Cout, k*Cin) bf16, column index = dx*Cin + c."""
    k, _, cin, cout = w_hwio.shape
    return jnp.transpose(w_hwio, (0, 3, 1, 2)).reshape(k, cout, k * cin).astype(jnp.bfloat16)


def init_params(key, k, nf, nc, in_ch):
    keys = jax.random.split(key, 11)

    def conv_w(kk, kh, cin, cout):
        scale = 1.0 / float(jnp.sqrt(jnp.float32(kh * kh * cin)))
        w = jax.random.normal(kk, (kh, kh, cin, cout), jnp.float32) * scale
        return prep_conv_weight(w)

    def bn_p(c):
        return jnp.ones((c,), jnp.float32), jnp.zeros((c,), jnp.float32)

    def block(kk, kh, cin, cout):
        g, b = bn_p(cout)
        # conv bias omitted: it is exactly cancelled by the following BatchNorm.
        return dict(w=conv_w(kk, kh, cin, cout), gamma=g, beta=b)

    p = {
        "first": block(keys[0], k, in_ch, nf),
        "skip_first": block(keys[1], 1, in_ch, nf),
        "second": block(keys[2], k, nf, 2 * nf),
        "skip_second": block(keys[3], 1, nf, 2 * nf),
        "third": block(keys[4], k, 2 * nf, 2 * nf),
        "fourth": block(keys[5], k, 4 * nf, nf),
        "skip_fourth": block(keys[6], 1, 4 * nf, nf),
        "fifth": block(keys[7], k, 2 * nf, nc),
        "skip_fifth": block(keys[8], 1, 2 * nf, nc),
    }
    # sixth: plain conv (no BN) -> keeps its bias.
    p["sixth"] = dict(
        w=conv_w(keys[9], k, in_ch + nc, nc),
        b=jax.random.normal(keys[10], (nc,), jnp.float32) * 0.05,
    )
    return p


# --------------------------------- main --------------------------------------

if __name__ == "__main__":
    kernel_size, num_filters, num_colors, in_channels = 3, 8, 2, 1
    key = jax.random.PRNGKey(0)
    pkey, xkey = jax.random.split(key)

    params = init_params(pkey, kernel_size, num_filters, num_colors, in_channels)
    x = jax.random.normal(xkey, (2, in_channels, 16, 16), jnp.float32)

    out = jax.jit(forward)(params, x)
    out = jax.block_until_ready(out)
    assert out.shape == (2, num_colors, 16, 16), out.shape
    assert out.dtype == jnp.float32
    print("KERNEL_OK")
</pallas_src>

<mosaic_0001>
module attributes {stable_mosaic.version = 11 : i64} {
  func.func @kernel(%arg0: i32, %arg1: memref<1x3x288xbf16, #tpu.memory_space<vmem>>, %arg2: memref<3x8x3xbf16, #tpu.memory_space<vmem>>, %arg3: memref<1x8x256xf32, #tpu.memory_space<vmem>>) attributes {dimension_semantics = [#tpu.dimension_semantics<parallel>], iteration_bounds = array<i64: 2>, scalar_prefetch = 0 : i64, scratch_operands = 0 : i64, tpu.core_type = #tpu.core_type<tc>, window_params = [{transform_indices = @transform_0, window_bounds = array<i64: 1, 3, 288>}, {pipeline_mode = #tpu.pipeline_mode<synchronous>, transform_indices = @transform_1, window_bounds = array<i64: 3, 8, 3>}, {transform_indices = @transform_2, window_bounds = array<i64: 1, 8, 256>}]} {
    %c0 = arith.constant 0 : index
    %c0_0 = arith.constant 0 : index
    %c0_1 = arith.constant 0 : index
    %0 = vector.load %arg1[%c0, %c0_0, %c0_1] : memref<1x3x288xbf16, #tpu.memory_space<vmem>>, vector<1x3x288xbf16>
    %1 = vector.shape_cast %0 : vector<1x3x288xbf16> to vector<3x288xbf16>
    %2 = vector.extract_strided_slice %1 {offsets = [0, 0], sizes = [3, 256], strides = [1, 1]} : vector<3x288xbf16> to vector<3x256xbf16>
    %c0_2 = arith.constant 0 : index
    %c0_3 = arith.constant 0 : index
    %c0_4 = arith.constant 0 : index
    %3 = vector.load %arg2[%c0_2, %c0_3, %c0_4] : memref<3x8x3xbf16, #tpu.memory_space<vmem>>, vector<1x8x3xbf16>
    %4 = vector.shape_cast %3 : vector<1x8x3xbf16> to vector<8x3xbf16>
    %cst = arith.constant dense<0.000000e+00> : vector<8x256xf32>
    %5 = tpu.matmul %4, %2, %cst {dimension_numbers = #tpu.dot_dimension_numbers<[1], [0], [0], [1], [0, 0, 1, 1], [], []>} : vector<8x3xbf16>, vector<3x256xbf16>, vector<8x256xf32> -> vector<8x256xf32>
    %6 = vector.extract_strided_slice %1 {offsets = [0, 16], sizes = [3, 256], strides = [1, 1]} : vector<3x288xbf16> to vector<3x256xbf16>
    %c1 = arith.constant 1 : index
    %c0_5 = arith.constant 0 : index
    %c0_6 = arith.constant 0 : index
    %7 = vector.load %arg2[%c1, %c0_5, %c0_6] : memref<3x8x3xbf16, #tpu.memory_space<vmem>>, vector<1x8x3xbf16>
    %8 = vector.shape_cast %7 : vector<1x8x3xbf16> to vector<8x3xbf16>
    %cst_7 = arith.constant dense<0.000000e+00> : vector<8x256xf32>
    %9 = tpu.matmul %8, %6, %cst_7 {dimension_numbers = #tpu.dot_dimension_numbers<[1], [0], [0], [1], [0, 0, 1, 1], [], []>} : vector<8x3xbf16>, vector<3x256xbf16>, vector<8x256xf32> -> vector<8x256xf32>
    %10 = arith.addf %5, %9 : vector<8x256xf32>
    %11 = vector.extract_strided_slice %1 {offsets = [0, 32], sizes = [3, 256], strides = [1, 1]} : vector<3x288xbf16> to vector<3x256xbf16>
    %c2 = arith.constant 2 : index
    %c0_8 = arith.constant 0 : index
    %c0_9 = arith.constant 0 : index
    %12 = vector.load %arg2[%c2, %c0_8, %c0_9] : memref<3x8x3xbf16, #tpu.memory_space<vmem>>, vector<1x8x3xbf16>
    %13 = vector.shape_cast %12 : vector<1x8x3xbf16> to vector<8x3xbf16>
    %cst_10 = arith.constant dense<0.000000e+00> : vector<8x256xf32>
    %14 = tpu.matmul %13, %11, %cst_10 {dimension_numbers = #tpu.dot_dimension_numbers<[1], [0], [0], [1], [0, 0, 1, 1], [], []>} : vector<8x3xbf16>, vector<3x256xbf16>, vector<8x256xf32> -> vector<8x256xf32>
    %15 = arith.addf %10, %14 : vector<8x256xf32>
    %c0_11 = arith.constant 0 : index
    %c0_12 = arith.constant 0 : index
    %c0_13 = arith.constant 0 : index
    %16 = vector.load %arg3[%c0_11, %c0_12, %c0_13] : memref<1x8x256xf32, #tpu.memory_space<vmem>>, vector<1x8x256xf32>
    %17 = vector.shape_cast %16 : vector<1x8x256xf32> to vector<8x256xf32>
    %18 = vector.shape_cast %15 : vector<8x256xf32> to vector<1x8x256xf32>
    tpu.vector_store %arg3[%c0_11, %c0_12, %c0_13], %18 {strides = array<i32>} : memref<1x8x256xf32, #tpu.memory_space<vmem>>, vector<1x8x256xf32>,
    return
  }
  func.func @transform_0(%arg0: i32) -> (i32, i32, i32) {
    %c0_i32 = arith.constant 0 : i32
    %c0_i32_0 = arith.constant 0 : i32
    %c0_i32_1 = arith.constant 0 : i32
    return %arg0, %c0_i32, %c0_i32_0 : i32, i32, i32
  }
  func.func @transform_1(%arg0: i32) -> (i32, i32, i32) {
    %c0_i32 = arith.constant 0 : i32
    %c0_i32_0 = arith.constant 0 : i32
    %c0_i32_1 = arith.constant 0 : i32
    %c0_i32_2 = arith.constant 0 : i32
    return %c0_i32, %c0_i32_0, %c0_i32_1 : i32, i32, i32
  }
  func.func @transform_2(%arg0: i32) -> (i32, i32, i32) {
    %c0_i32 = arith.constant 0 : i32
    %c0_i32_0 = arith.constant 0 : i32
    %c0_i32_1 = arith.constant 0 : i32
    return %arg0, %c0_i32, %c0_i32_0 : i32, i32, i32
  }
}

module attributes {stable_mosaic.version = 11 : i64} {
  func.func @kernel(%arg0: i32, %arg1: memref<1x1x64xbf16, #tpu.memory_space<vmem>>, %arg2: memref<1x8x1xbf16, #tpu.memory_space<vmem>>, %arg3: memref<1x8x64xf32, #tpu.memory_space<vmem>>, %arg4: memref<1x8x1xf32, #tpu.memory_space<vmem>>, %arg5: memref<1x8x1xf32, #tpu.memory_space<vmem>>) attributes {dimension_semantics = [#tpu.dimension_semantics<parallel>], iteration_bounds = array<i64: 2>, scalar_prefetch = 0 : i64, scratch_operands = 0 : i64, tpu.core_type = #tpu.core_type<tc>, window_params = [{transform_indices = @transform_0, window_bounds = array<i64: 1, 1, 64>}, {pipeline_mode = #tpu.pipeline_mode<synchronous>, transform_indices = @transform_1, window_bounds = array<i64: 1, 8, 1>}, {transform_indices = @transform_2, window_bounds = array<i64: 1, 8, 64>}, {transform_indices = @transform_3, window_bounds = array<i64: 1, 8, 1>}, {transform_indices = @transform_4, window_bounds = array<i64: 1, 8, 1>}]} {
    %c0 = arith.constant 0 : index
    %c0_0 = arith.constant 0 : index
    %c0_1 = arith.constant 0 : index
    %0 = vector.load %arg1[%c0, %c0_0, %c0_1] : memref<1x1x64xbf16, #tpu.memory_space<vmem>>, vector<1x1x64xbf16>
    %1 = vector.shape_cast %0 : vector<1x1x64xbf16> to vector<1x64xbf16>
    %c0_2 = arith.constant 0 : index
    %c0_3 = arith.constant 0 : index
    %c0_4 = arith.constant 0 : index
    %2 = vector.load %arg2[%c0_2, %c0_3, %c0_4] : memref<1x8x1xbf16, #tpu.memory_space<vmem>>, vector<1x8x1xbf16>
    %3 = vector.shape_cast %2 : vector<1x8x1xbf16> to vector<8x1xbf16>
    %4 = arith.extf %3 : vector<8x1xbf16> to vector<8x1xf32>
    %5 = arith.extf %1 : vector<1x64xbf16> to vector<1x64xf32>
    %6 = vector.broadcast %4 : vector<8x1xf32> to vector<8x64xf32>
    %7 = vector.broadcast %5 : vector<1x64xf32> to vector<8x64xf32>
    %8 = arith.mulf %6, %7 : vector<8x64xf32>
    %c0_5 = arith.constant 0 : index
    %c0_6 = arith.constant 0 : index
    %c0_7 = arith.constant 0 : index
    %9 = vector.load %arg3[%c0_5, %c0_6, %c0_7] : memref<1x8x64xf32, #tpu.memory_space<vmem>>, vector<1x8x64xf32>
    %10 = vector.shape_cast %9 : vector<1x8x64xf32> to vector<8x64xf32>
    %11 = vector.shape_cast %8 : vector<8x64xf32> to vector<1x8x64xf32>
    tpu.vector_store %arg3[%c0_5, %c0_6, %c0_7], %11 {strides = array<i32>} : memref<1x8x64xf32, #tpu.memory_space<vmem>>, vector<1x8x64xf32>,
    %cst = arith.constant dense<0.000000e+00> : vector<8xf32>
    %12 = vector.multi_reduction <add>, %8, %cst [1] : vector<8x64xf32> to vector<8xf32>
    %13 = vector.shape_cast %12 : vector<8xf32> to vector<8x1xf32>
    %c0_8 = arith.constant 0 : index
    %c0_9 = arith.constant 0 : index
    %c0_10 = arith.constant 0 : index
    %14 = vector.load %arg4[%c0_8, %c0_9, %c0_10] : memref<1x8x1xf32, #tpu.memory_space<vmem>>, vector<1x8x1xf32>
    %15 = vector.shape_cast %14 : vector<1x8x1xf32> to vector<8x1xf32>
    %16 = vector.shape_cast %13 : vector<8x1xf32> to vector<1x8x1xf32>
    tpu.vector_store %arg4[%c0_8, %c0_9, %c0_10], %16 {strides = array<i32>} : memref<1x8x1xf32, #tpu.memory_space<vmem>>, vector<1x8x1xf32>,
    %17 = arith.mulf %8, %8 : vector<8x64xf32>
    %cst_11 = arith.constant dense<0.000000e+00> : vector<8xf32>
    %18 = vector.multi_reduction <add>, %17, %cst_11 [1] : vector<8x64xf32> to vector<8xf32>
    %19 = vector.shape_cast %18 : vector<8xf32> to vector<8x1xf32>
    %c0_12 = arith.constant 0 : index
    %c0_13 = arith.constant 0 : index
    %c0_14 = arith.constant 0 : index
    %20 = vector.load %arg5[%c0_12, %c0_13, %c0_14] : memref<1x8x1xf32, #tpu.memory_space<vmem>>, vector<1x8x1xf32>
    %21 = vector.shape_cast %20 : vector<1x8x1xf32> to vector<8x1xf32>
    %22 = vector.shape_cast %19 : vector<8x1xf32> to vector<1x8x1xf32>
    tpu.vector_store %arg5[%c0_12, %c0_13, %c0_14], %22 {strides = array<i32>} : memref<1x8x1xf32, #tpu.memory_space<vmem>>, vector<1x8x1xf32>,
    return
  }
  func.func @transform_0(%arg0: i32) -> (i32, i32, i32) {
    %c0_i32 = arith.constant 0 : i32
    %c0_i32_0 = arith.constant 0 : i32
    %c0_i32_1 = arith.constant 0 : i32
    return %arg0, %c0_i32, %c0_i32_0 : i32, i32, i32
  }
  func.func @transform_1(%arg0: i32) -> (i32, i32, i32) {
    %c0_i32 = arith.constant 0 : i32
    %c0_i32_0 = arith.constant 0 : i32
    %c0_i32_1 = arith.constant 0 : i32
    %c0_i32_2 = arith.constant 0 : i32
    return %c0_i32, %c0_i32_0, %c0_i32_1 : i32, i32, i32
  }
  func.func @transform_2(%arg0: i32) -> (i32, i32, i32) {
    %c0_i32 = arith.constant 0 : i32
    %c0_i32_0 = arith.constant 0 : i32
    %c0_i32_1 = arith.constant 0 : i32
    return %arg0, %c0_i32, %c0_i32_0 : i32, i32, i32
  }
  func.func @transform_3(%arg0: i32) -> (i32, i32, i32) {
    %c0_i32 = arith.constant 0 : i32
    %c0_i32_0 = arith.constant 0 : i32
    %c0_i32_1 = arith.constant 0 : i32
    return %arg0, %c0_i32, %c0_i32_0 : i32, i32, i32
  }
  func.func @transform_4(%arg0: i32) -> (i32, i32, i32) {
    %c0_i32 = arith.constant 0 : i32
    %c0_i32_0 = arith.constant 0 : i32
    %c0_i32_1 = arith.constant 0 : i32
    return %arg0, %c0_i32, %c0_i32_0 : i32, i32, i32
  }
}

module attributes {stable_mosaic.version = 11 : i64} {
  func.func @_fused_bn_relu_add_kernel(%arg0: i32, %arg1: i32, %arg2: memref<1x8x64xf32, #tpu.memory_space<vmem>>, %arg3: memref<1x8x64xf32, #tpu.memory_space<vmem>>, %arg4: memref<8x1xf32, #tpu.memory_space<vmem>>, %arg5: memref<8x1xf32, #tpu.memory_space<vmem>>, %arg6: memref<8x1xf32, #tpu.memory_space<vmem>>, %arg7: memref<8x1xf32, #tpu.memory_space<vmem>>, %arg8: memref<1x8x64xf32, #tpu.memory_space<vmem>>) attributes {dimension_semantics = [#tpu.dimension_semantics<parallel>, #tpu.dimension_semantics<parallel>], iteration_bounds = array<i64: 2, 1>, scalar_prefetch = 0 : i64, scratch_operands = 0 : i64, tpu.core_type = #tpu.core_type<tc>, window_params = [{transform_indices = @transform_0, window_bounds = array<i64: 1, 8, 64>}, {transform_indices = @transform_1, window_bounds = array<i64: 1, 8, 64>}, {pipeline_mode = #tpu.pipeline_mode<synchronous>, transform_indices = @transform_2, window_bounds = array<i64: 8, 1>}, {pipeline_mode = #tpu.pipeline_mode<synchronous>, transform_indices = @transform_3, window_bounds = array<i64: 8, 1>}, {pipeline_mode = #tpu.pipeline_mode<synchronous>, transform_indices = @transform_4, window_bounds = array<i64: 8, 1>}, {pipeline_mode = #tpu.pipeline_mode<synchronous>, transform_indices = @transform_5, window_bounds = array<i64: 8, 1>}, {transform_indices = @transform_6, window_bounds = array<i64: 1, 8, 64>}]} {
    %c0 = arith.constant 0 : index
    %c0_0 = arith.constant 0 : index
    %c0_1 = arith.constant 0 : index
    %0 = vector.load %arg2[%c0, %c0_0, %c0_1] : memref<1x8x64xf32, #tpu.memory_space<vmem>>, vector<1x8x64xf32>
    %1 = vector.shape_cast %0 : vector<1x8x64xf32> to vector<8x64xf32>
    %c0_2 = arith.constant 0 : index
    %c0_3 = arith.constant 0 : index
    %2 = vector.load %arg4[%c0_2, %c0_3] : memref<8x1xf32, #tpu.memory_space<vmem>>, vector<8x1xf32>
    %3 = vector.broadcast %2 : vector<8x1xf32> to vector<8x64xf32>
    %4 = arith.mulf %1, %3 : vector<8x64xf32>
    %c0_4 = arith.constant 0 : index
    %c0_5 = arith.constant 0 : index
    %5 = vector.load %arg5[%c0_4, %c0_5] : memref<8x1xf32, #tpu.memory_space<vmem>>, vector<8x1xf32>
    %6 = vector.broadcast %5 : vector<8x1xf32> to vector<8x64xf32>
    %7 = arith.addf %4, %6 : vector<8x64xf32>
    %cst = arith.constant 0.000000e+00 : f32
    %8 = vector.broadcast %cst : f32 to vector<8x64xf32>
    %9 = arith.maximumf %7, %8 : vector<8x64xf32>
    %c0_6 = arith.constant 0 : index
    %c0_7 = arith.constant 0 : index
    %c0_8 = arith.constant 0 : index
    %10 = vector.load %arg3[%c0_6, %c0_7, %c0_8] : memref<1x8x64xf32, #tpu.memory_space<vmem>>, vector<1x8x64xf32>
    %11 = vector.shape_cast %10 : vector<1x8x64xf32> to vector<8x64xf32>
    %c0_9 = arith.constant 0 : index
    %c0_10 = arith.constant 0 : index
    %12 = vector.load %arg6[%c0_9, %c0_10] : memref<8x1xf32, #tpu.memory_space<vmem>>, vector<8x1xf32>
    %13 = vector.broadcast %12 : vector<8x1xf32> to vector<8x64xf32>
    %14 = arith.mulf %11, %13 : vector<8x64xf32>
    %15 = arith.addf %9, %14 : vector<8x64xf32>
    %c0_11 = arith.constant 0 : index
    %c0_12 = arith.constant 0 : index
    %16 = vector.load %arg7[%c0_11, %c0_12] : memref<8x1xf32, #tpu.memory_space<vmem>>, vector<8x1xf32>
    %17 = vector.broadcast %16 : vector<8x1xf32> to vector<8x64xf32>
    %18 = arith.addf %15, %17 : vector<8x64xf32>
    %c0_13 = arith.constant 0 : index
    %c0_14 = arith.constant 0 : index
    %c0_15 = arith.constant 0 : index
    %19 = vector.load %arg8[%c0_13, %c0_14, %c0_15] : memref<1x8x64xf32, #tpu.memory_space<vmem>>, vector<1x8x64xf32>
    %20 = vector.shape_cast %19 : vector<1x8x64xf32> to vector<8x64xf32>
    %21 = vector.shape_cast %18 : vector<8x64xf32> to vector<1x8x64xf32>
    tpu.vector_store %arg8[%c0_13, %c0_14, %c0_15], %21 {strides = array<i32>} : memref<1x8x64xf32, #tpu.memory_space<vmem>>, vector<1x8x64xf32>,
    return
  }
  func.func @transform_0(%arg0: i32, %arg1: i32) -> (i32, i32, i32) {
    %c0_i32 = arith.constant 0 : i32
    %c0_i32_0 = arith.constant 0 : i32
    return %arg0, %c0_i32, %arg1 : i32, i32, i32
  }
  func.func @transform_1(%arg0: i32, %arg1: i32) -> (i32, i32, i32) {
    %c0_i32 = arith.constant 0 : i32
    %c0_i32_0 = arith.constant 0 : i32
    return %arg0, %c0_i32, %arg1 : i32, i32, i32
  }
  func.func @transform_2(%arg0: i32, %arg1: i32) -> (i32, i32) {
    %c0_i32 = arith.constant 0 : i32
    %c0_i32_0 = arith.constant 0 : i32
    %c0_i32_1 = arith.constant 0 : i32
    return %c0_i32, %c0_i32_0 : i32, i32
  }
  func.func @transform_3(%arg0: i32, %arg1: i32) -> (i32, i32) {
    %c0_i32 = arith.constant 0 : i32
    %c0_i32_0 = arith.constant 0 : i32
    %c0_i32_1 = arith.constant 0 : i32
    return %c0_i32, %c0_i32_0 : i32, i32
  }
  func.func @transform_4(%arg0: i32, %arg1: i32) -> (i32, i32) {
    %c0_i32 = arith.constant 0 : i32
    %c0_i32_0 = arith.constant 0 : i32
    %c0_i32_1 = arith.constant 0 : i32
    return %c0_i32, %c0_i32_0 : i32, i32
  }
  func.func @transform_5(%arg0: i32, %arg1: i32) -> (i32, i32) {
    %c0_i32 = arith.constant 0 : i32
    %c0_i32_0 = arith.constant 0 : i32
    %c0_i32_1 = arith.constant 0 : i32
    return %c0_i32, %c0_i32_0 : i32, i32
  }
  func.func @transform_6(%arg0: i32, %arg1: i32) -> (i32, i32, i32) {
    %c0_i32 = arith.constant 0 : i32
    %c0_i32_0 = arith.constant 0 : i32
    return %arg0, %c0_i32, %arg1 : i32, i32, i32
  }
}

module attributes {stable_mosaic.version = 11 : i64} {
  func.func @kernel(%arg0: i32, %arg1: memref<1x24x80xbf16, #tpu.memory_space<vmem>>, %arg2: memref<3x16x24xbf16, #tpu.memory_space<vmem>>, %arg3: memref<1x16x64xf32, #tpu.memory_space<vmem>>) attributes {dimension_semantics = [#tpu.dimension_semantics<parallel>], iteration_bounds = array<i64: 2>, scalar_prefetch = 0 : i64, scratch_operands = 0 : i64, tpu.core_type = #tpu.core_type<tc>, window_params = [{transform_indices = @transform_0, window_bounds = array<i64: 1, 24, 80>}, {pipeline_mode = #tpu.pipeline_mode<synchronous>, transform_indices = @transform_1, window_bounds = array<i64: 3, 16, 24>}, {transform_indices = @transform_2, window_bounds = array<i64: 1, 16, 64>}]} {
    %c0 = arith.constant 0 : index
    %c0_0 = arith.constant 0 : index
    %c0_1 = arith.constant 0 : index
    %0 = vector.load %arg1[%c0, %c0_0, %c0_1] : memref<1x24x80xbf16, #tpu.memory_space<vmem>>, vector<1x24x80xbf16>
    %1 = vector.shape_cast %0 : vector<1x24x80xbf16> to vector<24x80xbf16>
    %2 = vector.extract_strided_slice %1 {offsets = [0, 0], sizes = [24, 64], strides = [1, 1]} : vector<24x80xbf16> to vector<24x64xbf16>
    %c0_2 = arith.constant 0 : index
    %c0_3 = arith.constant 0 : index
    %c0_4 = arith.constant 0 : index
    %3 = vector.load %arg2[%c0_2, %c0_3, %c0_4] : memref<3x16x24xbf16, #tpu.memory_space<vmem>>, vector<1x16x24xbf16>
    %4 = vector.shape_cast %3 : vector<1x16x24xbf16> to vector<16x24xbf16>
    %cst = arith.constant dense<0.000000e+00> : vector<16x64xf32>
    %5 = tpu.matmul %4, %2, %cst {dimension_numbers = #tpu.dot_dimension_numbers<[1], [0], [0], [1], [0, 0, 1, 1], [], []>} : vector<16x24xbf16>, vector<24x64xbf16>, vector<16x64xf32> -> vector<16x64xf32>
    %6 = vector.extract_strided_slice %1 {offsets = [0, 8], sizes = [24, 64], strides = [1, 1]} : vector<24x80xbf16> to vector<24x64xbf16>
    %c1 = arith.constant 1 : index
    %c0_5 = arith.constant 0 : index
    %c0_6 = arith.constant 0 : index
    %7 = vector.load %arg2[%c1, %c0_5, %c0_6] : memref<3x16x24xbf16, #tpu.memory_space<vmem>>, vector<1x16x24xbf16>
    %8 = vector.shape_cast %7 : vector<1x16x24xbf16> to vector<16x24xbf16>
    %cst_7 = arith.constant dense<0.000000e+00> : vector<16x64xf32>
    %9 = tpu.matmul %8, %6, %cst_7 {dimension_numbers = #tpu.dot_dimension_numbers<[1], [0], [0], [1], [0, 0, 1, 1], [], []>} : vector<16x24xbf16>, vector<24x64xbf16>, vector<16x64xf32> -> vector<16x64xf32>
    %10 = arith.addf %5, %9 : vector<16x64xf32>
    %11 = vector.extract_strided_slice %1 {offsets = [0, 16], sizes = [24, 64], strides = [1, 1]} : vector<24x80xbf16> to vector<24x64xbf16>
    %c2 = arith.constant 2 : index
    %c0_8 = arith.constant 0 : index
    %c0_9 = arith.constant 0 : index
    %12 = vector.load %arg2[%c2, %c0_8, %c0_9] : memref<3x16x24xbf16, #tpu.memory_space<vmem>>, vector<1x16x24xbf16>
    %13 = vector.shape_cast %12 : vector<1x16x24xbf16> to vector<16x24xbf16>
    %cst_10 = arith.constant dense<0.000000e+00> : vector<16x64xf32>
    %14 = tpu.matmul %13, %11, %cst_10 {dimension_numbers = #tpu.dot_dimension_numbers<[1], [0], [0], [1], [0, 0, 1, 1], [], []>} : vector<16x24xbf16>, vector<24x64xbf16>, vector<16x64xf32> -> vector<16x64xf32>
    %15 = arith.addf %10, %14 : vector<16x64xf32>
    %c0_11 = arith.constant 0 : index
    %c0_12 = arith.constant 0 : index
    %c0_13 = arith.constant 0 : index
    %16 = vector.load %arg3[%c0_11, %c0_12, %c0_13] : memref<1x16x64xf32, #tpu.memory_space<vmem>>, vector<1x16x64xf32>
    %17 = vector.shape_cast %16 : vector<1x16x64xf32> to vector<16x64xf32>
    %18 = vector.shape_cast %15 : vector<16x64xf32> to vector<1x16x64xf32>
    tpu.vector_store %arg3[%c0_11, %c0_12, %c0_13], %18 {strides = array<i32>} : memref<1x16x64xf32, #tpu.memory_space<vmem>>, vector<1x16x64xf32>,
    return
  }
  func.func @transform_0(%arg0: i32) -> (i32, i32, i32) {
    %c0_i32 = arith.constant 0 : i32
    %c0_i32_0 = arith.constant 0 : i32
    %c0_i32_1 = arith.constant 0 : i32
    return %arg0, %c0_i32, %c0_i32_0 : i32, i32, i32
  }
  func.func @transform_1(%arg0: i32) -> (i32, i32, i32) {
    %c0_i32 = arith.constant 0 : i32
    %c0_i32_0 = arith.constant 0 : i32
    %c0_i32_1 = arith.constant 0 : i32
    %c0_i32_2 = arith.constant 0 : i32
    return %c0_i32, %c0_i32_0, %c0_i32_1 : i32, i32, i32
  }
  func.func @transform_2(%arg0: i32) -> (i32, i32, i32) {
    %c0_i32 = arith.constant 0 : i32
    %c0_i32_0 = arith.constant 0 : i32
    %c0_i32_1 = arith.constant 0 : i32
    return %arg0, %c0_i32, %c0_i32_0 : i32, i32, i32
  }
}

module attributes {stable_mosaic.version = 11 : i64} {
  func.func @_fused_bn_relu_add_kernel(%arg0: i32, %arg1: i32, %arg2: memref<1x16x16xf32, #tpu.memory_space<vmem>>, %arg3: memref<1x16x16xf32, #tpu.memory_space<vmem>>, %arg4: memref<16x1xf32, #tpu.memory_space<vmem>>, %arg5: memref<16x1xf32, #tpu.memory_space<vmem>>, %arg6: memref<16x1xf32, #tpu.memory_space<vmem>>, %arg7: memref<16x1xf32, #tpu.memory_space<vmem>>, %arg8: memref<1x16x16xf32, #tpu.memory_space<vmem>>) attributes {dimension_semantics = [#tpu.dimension_semantics<parallel>, #tpu.dimension_semantics<parallel>], iteration_bounds = array<i64: 2, 1>, scalar_prefetch = 0 : i64, scratch_operands = 0 : i64, tpu.core_type = #tpu.core_type<tc>, window_params = [{transform_indices = @transform_0, window_bounds = array<i64: 1, 16, 16>}, {transform_indices = @transform_1, window_bounds = array<i64: 1, 16, 16>}, {pipeline_mode = #tpu.pipeline_mode<synchronous>, transform_indices = @transform_2, window_bounds = array<i64: 16, 1>}, {pipeline_mode = #tpu.pipeline_mode<synchronous>, transform_indices = @transform_3, window_bounds = array<i64: 16, 1>}, {pipeline_mode = #tpu.pipeline_mode<synchronous>, transform_indices = @transform_4, window_bounds = array<i64: 16, 1>}, {pipeline_mode = #tpu.pipeline_mode<synchronous>, transform_indices = @transform_5, window_bounds = array<i64: 16, 1>}, {transform_indices = @transform_6, window_bounds = array<i64: 1, 16, 16>}]} {
    %c0 = arith.constant 0 : index
    %c0_0 = arith.constant 0 : index
    %c0_1 = arith.constant 0 : index
    %0 = vector.load %arg2[%c0, %c0_0, %c0_1] : memref<1x16x16xf32, #tpu.memory_space<vmem>>, vector<1x16x16xf32>
    %1 = vector.shape_cast %0 : vector<1x16x16xf32> to vector<16x16xf32>
    %c0_2 = arith.constant 0 : index
    %c0_3 = arith.constant 0 : index
    %2 = vector.load %arg4[%c0_2, %c0_3] : memref<16x1xf32, #tpu.memory_space<vmem>>, vector<16x1xf32>
    %3 = vector.broadcast %2 : vector<16x1xf32> to vector<16x16xf32>
    %4 = arith.mulf %1, %3 : vector<16x16xf32>
    %c0_4 = arith.constant 0 : index
    %c0_5 = arith.constant 0 : index
    %5 = vector.load %arg5[%c0_4, %c0_5] : memref<16x1xf32, #tpu.memory_space<vmem>>, vector<16x1xf32>
    %6 = vector.broadcast %5 : vector<16x1xf32> to vector<16x16xf32>
    %7 = arith.addf %4, %6 : vector<16x16xf32>
    %cst = arith.constant 0.000000e+00 : f32
    %8 = vector.broadcast %cst : f32 to vector<16x16xf32>
    %9 = arith.maximumf %7, %8 : vector<16x16xf32>
    %c0_6 = arith.constant 0 : index
    %c0_7 = arith.constant 0 : index
    %c0_8 = arith.constant 0 : index
    %10 = vector.load %arg3[%c0_6, %c0_7, %c0_8] : memref<1x16x16xf32, #tpu.memory_space<vmem>>, vector<1x16x16xf32>
    %11 = vector.shape_cast %10 : vector<1x16x16xf32> to vector<16x16xf32>
    %c0_9 = arith.constant 0 : index
    %c0_10 = arith.constant 0 : index
    %12 = vector.load %arg6[%c0_9, %c0_10] : memref<16x1xf32, #tpu.memory_space<vmem>>, vector<16x1xf32>
    %13 = vector.broadcast %12 : vector<16x1xf32> to vector<16x16xf32>
    %14 = arith.mulf %11, %13 : vector<16x16xf32>
    %15 = arith.addf %9, %14 : vector<16x16xf32>
    %c0_11 = arith.constant 0 : index
    %c0_12 = arith.constant 0 : index
    %16 = vector.load %arg7[%c0_11, %c0_12] : memref<16x1xf32, #tpu.memory_space<vmem>>, vector<16x1xf32>
    %17 = vector.broadcast %16 : vector<16x1xf32> to vector<16x16xf32>
    %18 = arith.addf %15, %17 : vector<16x16xf32>
    %c0_13 = arith.constant 0 : index
    %c0_14 = arith.constant 0 : index
    %c0_15 = arith.constant 0 : index
    %19 = vector.load %arg8[%c0_13, %c0_14, %c0_15] : memref<1x16x16xf32, #tpu.memory_space<vmem>>, vector<1x16x16xf32>
    %20 = vector.shape_cast %19 : vector<1x16x16xf32> to vector<16x16xf32>
    %21 = vector.shape_cast %18 : vector<16x16xf32> to vector<1x16x16xf32>
    tpu.vector_store %arg8[%c0_13, %c0_14, %c0_15], %21 {strides = array<i32>} : memref<1x16x16xf32, #tpu.memory_space<vmem>>, vector<1x16x16xf32>,
    return
  }
  func.func @transform_0(%arg0: i32, %arg1: i32) -> (i32, i32, i32) {
    %c0_i32 = arith.constant 0 : i32
    %c0_i32_0 = arith.constant 0 : i32
    return %arg0, %c0_i32, %arg1 : i32, i32, i32
  }
  func.func @transform_1(%arg0: i32, %arg1: i32) -> (i32, i32, i32) {
    %c0_i32 = arith.constant 0 : i32
    %c0_i32_0 = arith.constant 0 : i32
    return %arg0, %c0_i32, %arg1 : i32, i32, i32
  }
  func.func @transform_2(%arg0: i32, %arg1: i32) -> (i32, i32) {
    %c0_i32 = arith.constant 0 : i32
    %c0_i32_0 = arith.constant 0 : i32
    %c0_i32_1 = arith.constant 0 : i32
    return %c0_i32, %c0_i32_0 : i32, i32
  }
  func.func @transform_3(%arg0: i32, %arg1: i32) -> (i32, i32) {
    %c0_i32 = arith.constant 0 : i32
    %c0_i32_0 = arith.constant 0 : i32
    %c0_i32_1 = arith.constant 0 : i32
    return %c0_i32, %c0_i32_0 : i32, i32
  }
  func.func @transform_4(%arg0: i32, %arg1: i32) -> (i32, i32) {
    %c0_i32 = arith.constant 0 : i32
    %c0_i32_0 = arith.constant 0 : i32
    %c0_i32_1 = arith.constant 0 : i32
    return %c0_i32, %c0_i32_0 : i32, i32
  }
  func.func @transform_5(%arg0: i32, %arg1: i32) -> (i32, i32) {
    %c0_i32 = arith.constant 0 : i32
    %c0_i32_0 = arith.constant 0 : i32
    %c0_i32_1 = arith.constant 0 : i32
    return %c0_i32, %c0_i32_0 : i32, i32
  }
  func.func @transform_6(%arg0: i32, %arg1: i32) -> (i32, i32, i32) {
    %c0_i32 = arith.constant 0 : i32
    %c0_i32_0 = arith.constant 0 : i32
    return %arg0, %c0_i32, %arg1 : i32, i32, i32
  }
}

module attributes {stable_mosaic.version = 11 : i64} {
  func.func @kernel(%arg0: i32, %arg1: memref<1x8x16xbf16, #tpu.memory_space<vmem>>, %arg2: memref<1x16x8xbf16, #tpu.memory_space<vmem>>, %arg3: memref<1x16x16xf32, #tpu.memory_space<vmem>>, %arg4: memref<1x16x1xf32, #tpu.memory_space<vmem>>, %arg5: memref<1x16x1xf32, #tpu.memory_space<vmem>>) attributes {dimension_semantics = [#tpu.dimension_semantics<parallel>], iteration_bounds = array<i64: 2>, scalar_prefetch = 0 : i64, scratch_operands = 0 : i64, tpu.core_type = #tpu.core_type<tc>, window_params = [{transform_indices = @transform_0, window_bounds = array<i64: 1, 8, 16>}, {pipeline_mode = #tpu.pipeline_mode<synchronous>, transform_indices = @transform_1, window_bounds = array<i64: 1, 16, 8>}, {transform_indices = @transform_2, window_bounds = array<i64: 1, 16, 16>}, {transform_indices = @transform_3, window_bounds = array<i64: 1, 16, 1>}, {transform_indices = @transform_4, window_bounds = array<i64: 1, 16, 1>}]} {
    %c0 = arith.constant 0 : index
    %c0_0 = arith.constant 0 : index
    %c0_1 = arith.constant 0 : index
    %0 = vector.load %arg1[%c0, %c0_0, %c0_1] : memref<1x8x16xbf16, #tpu.memory_space<vmem>>, vector<1x8x16xbf16>
    %1 = vector.shape_cast %0 : vector<1x8x16xbf16> to vector<8x16xbf16>
    %c0_2 = arith.constant 0 : index
    %c0_3 = arith.constant 0 : index
    %c0_4 = arith.constant 0 : index
    %2 = vector.load %arg2[%c0_2, %c0_3, %c0_4] : memref<1x16x8xbf16, #tpu.memory_space<vmem>>, vector<1x16x8xbf16>
    %3 = vector.shape_cast %2 : vector<1x16x8xbf16> to vector<16x8xbf16>
    %cst = arith.constant dense<0.000000e+00> : vector<16x16xf32>
    %4 = tpu.matmul %3, %1, %cst {dimension_numbers = #tpu.dot_dimension_numbers<[1], [0], [0], [1], [0, 0, 1, 1], [], []>} : vector<16x8xbf16>, vector<8x16xbf16>, vector<16x16xf32> -> vector<16x16xf32>
    %c0_5 = arith.constant 0 : index
    %c0_6 = arith.constant 0 : index
    %c0_7 = arith.constant 0 : index
    %5 = vector.load %arg3[%c0_5, %c0_6, %c0_7] : memref<1x16x16xf32, #tpu.memory_space<vmem>>, vector<1x16x16xf32>
    %6 = vector.shape_cast %5 : vector<1x16x16xf32> to vector<16x16xf32>
    %7 = vector.shape_cast %4 : vector<16x16xf32> to vector<1x16x16xf32>
    tpu.vector_store %arg3[%c0_5, %c0_6, %c0_7], %7 {strides = array<i32>} : memref<1x16x16xf32, #tpu.memory_space<vmem>>, vector<1x16x16xf32>,
    %cst_8 = arith.constant dense<0.000000e+00> : vector<16xf32>
    %8 = vector.multi_reduction <add>, %4, %cst_8 [1] : vector<16x16xf32> to vector<16xf32>
    %9 = vector.shape_cast %8 : vector<16xf32> to vector<16x1xf32>
    %c0_9 = arith.constant 0 : index
    %c0_10 = arith.constant 0 : index
    %c0_11 = arith.constant 0 : index
    %10 = vector.load %arg4[%c0_9, %c0_10, %c0_11] : memref<1x16x1xf32, #tpu.memory_space<vmem>>, vector<1x16x1xf32>
    %11 = vector.shape_cast %10 : vector<1x16x1xf32> to vector<16x1xf32>
    %12 = vector.shape_cast %9 : vector<16x1xf32> to vector<1x16x1xf32>
    tpu.vector_store %arg4[%c0_9, %c0_10, %c0_11], %12 {strides = array<i32>} : memref<1x16x1xf32, #tpu.memory_space<vmem>>, vector<1x16x1xf32>,
    %13 = arith.mulf %4, %4 : vector<16x16xf32>
    %cst_12 = arith.constant dense<0.000000e+00> : vector<16xf32>
    %14 = vector.multi_reduction <add>, %13, %cst_12 [1] : vector<16x16xf32> to vector<16xf32>
    %15 = vector.shape_cast %14 : vector<16xf32> to vector<16x1xf32>
    %c0_13 = arith.constant 0 : index
    %c0_14 = arith.constant 0 : index
    %c0_15 = arith.constant 0 : index
    %16 = vector.load %arg5[%c0_13, %c0_14, %c0_15] : memref<1x16x1xf32, #tpu.memory_space<vmem>>, vector<1x16x1xf32>
    %17 = vector.shape_cast %16 : vector<1x16x1xf32> to vector<16x1xf32>
    %18 = vector.shape_cast %15 : vector<16x1xf32> to vector<1x16x1xf32>
    tpu.vector_store %arg5[%c0_13, %c0_14, %c0_15], %18 {strides = array<i32>} : memref<1x16x1xf32, #tpu.memory_space<vmem>>, vector<1x16x1xf32>,
    return
  }
  func.func @transform_0(%arg0: i32) -> (i32, i32, i32) {
    %c0_i32 = arith.constant 0 : i32
    %c0_i32_0 = arith.constant 0 : i32
    %c0_i32_1 = arith.constant 0 : i32
    return %arg0, %c0_i32, %c0_i32_0 : i32, i32, i32
  }
  func.func @transform_1(%arg0: i32) -> (i32, i32, i32) {
    %c0_i32 = arith.constant 0 : i32
    %c0_i32_0 = arith.constant 0 : i32
    %c0_i32_1 = arith.constant 0 : i32
    %c0_i32_2 = arith.constant 0 : i32
    return %c0_i32, %c0_i32_0, %c0_i32_1 : i32, i32, i32
  }
  func.func @transform_2(%arg0: i32) -> (i32, i32, i32) {
    %c0_i32 = arith.constant 0 : i32
    %c0_i32_0 = arith.constant 0 : i32
    %c0_i32_1 = arith.constant 0 : i32
    return %arg0, %c0_i32, %c0_i32_0 : i32, i32, i32
  }
  func.func @transform_3(%arg0: i32) -> (i32, i32, i32) {
    %c0_i32 = arith.constant 0 : i32
    %c0_i32_0 = arith.constant 0 : i32
    %c0_i32_1 = arith.constant 0 : i32
    return %arg0, %c0_i32, %c0_i32_0 : i32, i32, i32
  }
  func.func @transform_4(%arg0: i32) -> (i32, i32, i32) {
    %c0_i32 = arith.constant 0 : i32
    %c0_i32_0 = arith.constant 0 : i32
    %c0_i32_1 = arith.constant 0 : i32
    return %arg0, %c0_i32, %c0_i32_0 : i32, i32, i32
  }
}

module attributes {stable_mosaic.version = 11 : i64} {
  func.func @kernel(%arg0: i32, %arg1: memref<1x48x24xbf16, #tpu.memory_space<vmem>>, %arg2: memref<3x16x48xbf16, #tpu.memory_space<vmem>>, %arg3: memref<1x16x16xf32, #tpu.memory_space<vmem>>, %arg4: memref<1x16x1xf32, #tpu.memory_space<vmem>>, %arg5: memref<1x16x1xf32, #tpu.memory_space<vmem>>) attributes {dimension_semantics = [#tpu.dimension_semantics<parallel>], iteration_bounds = array<i64: 2>, scalar_prefetch = 0 : i64, scratch_operands = 0 : i64, tpu.core_type = #tpu.core_type<tc>, window_params = [{transform_indices = @transform_0, window_bounds = array<i64: 1, 48, 24>}, {pipeline_mode = #tpu.pipeline_mode<synchronous>, transform_indices = @transform_1, window_bounds = array<i64: 3, 16, 48>}, {transform_indices = @transform_2, window_bounds = array<i64: 1, 16, 16>}, {transform_indices = @transform_3, window_bounds = array<i64: 1, 16, 1>}, {transform_indices = @transform_4, window_bounds = array<i64: 1, 16, 1>}]} {
    %c0 = arith.constant 0 : index
    %c0_0 = arith.constant 0 : index
    %c0_1 = arith.constant 0 : index
    %0 = vector.load %arg1[%c0, %c0_0, %c0_1] : memref<1x48x24xbf16, #tpu.memory_space<vmem>>, vector<1x48x24xbf16>
    %1 = vector.shape_cast %0 : vector<1x48x24xbf16> to vector<48x24xbf16>
    %2 = vector.extract_strided_slice %1 {offsets = [0, 0], sizes = [48, 16], strides = [1, 1]} : vector<48x24xbf16> to vector<48x16xbf16>
    %c0_2 = arith.constant 0 : index
    %c0_3 = arith.constant 0 : index
    %c0_4 = arith.constant 0 : index
    %3 = vector.load %arg2[%c0_2, %c0_3, %c0_4] : memref<3x16x48xbf16, #tpu.memory_space<vmem>>, vector<1x16x48xbf16>
    %4 = vector.shape_cast %3 : vector<1x16x48xbf16> to vector<16x48xbf16>
    %cst = arith.constant dense<0.000000e+00> : vector<16x16xf32>
    %5 = tpu.matmul %4, %2, %cst {dimension_numbers = #tpu.dot_dimension_numbers<[1], [0], [0], [1], [0, 0, 1, 1], [], []>} : vector<16x48xbf16>, vector<48x16xbf16>, vector<16x16xf32> -> vector<16x16xf32>
    %6 = vector.extract_strided_slice %1 {offsets = [0, 4], sizes = [48, 16], strides = [1, 1]} : vector<48x24xbf16> to vector<48x16xbf16>
    %c1 = arith.constant 1 : index
    %c0_5 = arith.constant 0 : index
    %c0_6 = arith.constant 0 : index
    %7 = vector.load %arg2[%c1, %c0_5, %c0_6] : memref<3x16x48xbf16, #tpu.memory_space<vmem>>, vector<1x16x48xbf16>
    %8 = vector.shape_cast %7 : vector<1x16x48xbf16> to vector<16x48xbf16>
    %cst_7 = arith.constant dense<0.000000e+00> : vector<16x16xf32>
    %9 = tpu.matmul %8, %6, %cst_7 {dimension_numbers = #tpu.dot_dimension_numbers<[1], [0], [0], [1], [0, 0, 1, 1], [], []>} : vector<16x48xbf16>, vector<48x16xbf16>, vector<16x16xf32> -> vector<16x16xf32>
    %10 = arith.addf %5, %9 : vector<16x16xf32>
    %11 = vector.extract_strided_slice %1 {offsets = [0, 8], sizes = [48, 16], strides = [1, 1]} : vector<48x24xbf16> to vector<48x16xbf16>
    %c2 = arith.constant 2 : index
    %c0_8 = arith.constant 0 : index
    %c0_9 = arith.constant 0 : index
    %12 = vector.load %arg2[%c2, %c0_8, %c0_9] : memref<3x16x48xbf16, #tpu.memory_space<vmem>>, vector<1x16x48xbf16>
    %13 = vector.shape_cast %12 : vector<1x16x48xbf16> to vector<16x48xbf16>
    %cst_10 = arith.constant dense<0.000000e+00> : vector<16x16xf32>
    %14 = tpu.matmul %13, %11, %cst_10 {dimension_numbers = #tpu.dot_dimension_numbers<[1], [0], [0], [1], [0, 0, 1, 1], [], []>} : vector<16x48xbf16>, vector<48x16xbf16>, vector<16x16xf32> -> vector<16x16xf32>
    %15 = arith.addf %10, %14 : vector<16x16xf32>
    %c0_11 = arith.constant 0 : index
    %c0_12 = arith.constant 0 : index
    %c0_13 = arith.constant 0 : index
    %16 = vector.load %arg3[%c0_11, %c0_12, %c0_13] : memref<1x16x16xf32, #tpu.memory_space<vmem>>, vector<1x16x16xf32>
    %17 = vector.shape_cast %16 : vector<1x16x16xf32> to vector<16x16xf32>
    %18 = vector.shape_cast %15 : vector<16x16xf32> to vector<1x16x16xf32>
    tpu.vector_store %arg3[%c0_11, %c0_12, %c0_13], %18 {strides = array<i32>} : memref<1x16x16xf32, #tpu.memory_space<vmem>>, vector<1x16x16xf32>,
    %cst_14 = arith.constant dense<0.000000e+00> : vector<16xf32>
    %19 = vector.multi_reduction <add>, %15, %cst_14 [1] : vector<16x16xf32> to vector<16xf32>
    %20 = vector.shape_cast %19 : vector<16xf32> to vector<16x1xf32>
    %c0_15 = arith.constant 0 : index
    %c0_16 = arith.constant 0 : index
    %c0_17 = arith.constant 0 : index
    %21 = vector.load %arg4[%c0_15, %c0_16, %c0_17] : memref<1x16x1xf32, #tpu.memory_space<vmem>>, vector<1x16x1xf32>
    %22 = vector.shape_cast %21 : vector<1x16x1xf32> to vector<16x1xf32>
    %23 = vector.shape_cast %20 : vector<16x1xf32> to vector<1x16x1xf32>
    tpu.vector_store %arg4[%c0_15, %c0_16, %c0_17], %23 {strides = array<i32>} : memref<1x16x1xf32, #tpu.memory_space<vmem>>, vector<1x16x1xf32>,
    %24 = arith.mulf %15, %15 : vector<16x16xf32>
    %cst_18 = arith.constant dense<0.000000e+00> : vector<16xf32>
    %25 = vector.multi_reduction <add>, %24, %cst_18 [1] : vector<16x16xf32> to vector<16xf32>
    %26 = vector.shape_cast %25 : vector<16xf32> to vector<16x1xf32>
    %c0_19 = arith.constant 0 : index
    %c0_20 = arith.constant 0 : index
    %c0_21 = arith.constant 0 : index
    %27 = vector.load %arg5[%c0_19, %c0_20, %c0_21] : memref<1x16x1xf32, #tpu.memory_space<vmem>>, vector<1x16x1xf32>
    %28 = vector.shape_cast %27 : vector<1x16x1xf32> to vector<16x1xf32>
    %29 = vector.shape_cast %26 : vector<16x1xf32> to vector<1x16x1xf32>
    tpu.vector_store %arg5[%c0_19, %c0_20, %c0_21], %29 {strides = array<i32>} : memref<1x16x1xf32, #tpu.memory_space<vmem>>, vector<1x16x1xf32>,
    return
  }
  func.func @transform_0(%arg0: i32) -> (i32, i32, i32) {
    %c0_i32 = arith.constant 0 : i32
    %c0_i32_0 = arith.constant 0 : i32
    %c0_i32_1 = arith.constant 0 : i32
    return %arg0, %c0_i32, %c0_i32_0 : i32, i32, i32
  }
  func.func @transform_1(%arg0: i32) -> (i32, i32, i32) {
    %c0_i32 = arith.constant 0 : i32
    %c0_i32_0 = arith.constant 0 : i32
    %c0_i32_1 = arith.constant 0 : i32
    %c0_i32_2 = arith.constant 0 : i32
    return %c0_i32, %c0_i32_0, %c0_i32_1 : i32, i32, i32
  }
  func.func @transform_2(%arg0: i32) -> (i32, i32, i32) {
    %c0_i32 = arith.constant 0 : i32
    %c0_i32_0 = arith.constant 0 : i32
    %c0_i32_1 = arith.constant 0 : i32
    return %arg0, %c0_i32, %c0_i32_0 : i32, i32, i32
  }
  func.func @transform_3(%arg0: i32) -> (i32, i32, i32) {
    %c0_i32 = arith.constant 0 : i32
    %c0_i32_0 = arith.constant 0 : i32
    %c0_i32_1 = arith.constant 0 : i32
    return %arg0, %c0_i32, %c0_i32_0 : i32, i32, i32
  }
  func.func @transform_4(%arg0: i32) -> (i32, i32, i32) {
    %c0_i32 = arith.constant 0 : i32
    %c0_i32_0 = arith.constant 0 : i32
    %c0_i32_1 = arith.constant 0 : i32
    return %arg0, %c0_i32, %c0_i32_0 : i32, i32, i32
  }
}

module attributes {stable_mosaic.version = 11 : i64} {
  func.func @kernel(%arg0: i32, %arg1: memref<1x32x16xbf16, #tpu.memory_space<vmem>>, %arg2: memref<1x8x32xbf16, #tpu.memory_space<vmem>>, %arg3: memref<1x8x16xf32, #tpu.memory_space<vmem>>, %arg4: memref<1x8x1xf32, #tpu.memory_space<vmem>>, %arg5: memref<1x8x1xf32, #tpu.memory_space<vmem>>) attributes {dimension_semantics = [#tpu.dimension_semantics<parallel>], iteration_bounds = array<i64: 2>, scalar_prefetch = 0 : i64, scratch_operands = 0 : i64, tpu.core_type = #tpu.core_type<tc>, window_params = [{transform_indices = @transform_0, window_bounds = array<i64: 1, 32, 16>}, {pipeline_mode = #tpu.pipeline_mode<synchronous>, transform_indices = @transform_1, window_bounds = array<i64: 1, 8, 32>}, {transform_indices = @transform_2, window_bounds = array<i64: 1, 8, 16>}, {transform_indices = @transform_3, window_bounds = array<i64: 1, 8, 1>}, {transform_indices = @transform_4, window_bounds = array<i64: 1, 8, 1>}]} {
    %c0 = arith.constant 0 : index
    %c0_0 = arith.constant 0 : index
    %c0_1 = arith.constant 0 : index
    %0 = vector.load %arg1[%c0, %c0_0, %c0_1] : memref<1x32x16xbf16, #tpu.memory_space<vmem>>, vector<1x32x16xbf16>
    %1 = vector.shape_cast %0 : vector<1x32x16xbf16> to vector<32x16xbf16>
    %c0_2 = arith.constant 0 : index
    %c0_3 = arith.constant 0 : index
    %c0_4 = arith.constant 0 : index
    %2 = vector.load %arg2[%c0_2, %c0_3, %c0_4] : memref<1x8x32xbf16, #tpu.memory_space<vmem>>, vector<1x8x32xbf16>
    %3 = vector.shape_cast %2 : vector<1x8x32xbf16> to vector<8x32xbf16>
    %cst = arith.constant dense<0.000000e+00> : vector<8x16xf32>
    %4 = tpu.matmul %3, %1, %cst {dimension_numbers = #tpu.dot_dimension_numbers<[1], [0], [0], [1], [0, 0, 1, 1], [], []>} : vector<8x32xbf16>, vector<32x16xbf16>, vector<8x16xf32> -> vector<8x16xf32>
    %c0_5 = arith.constant 0 : index
    %c0_6 = arith.constant 0 : index
    %c0_7 = arith.constant 0 : index
    %5 = vector.load %arg3[%c0_5, %c0_6, %c0_7] : memref<1x8x16xf32, #tpu.memory_space<vmem>>, vector<1x8x16xf32>
    %6 = vector.shape_cast %5 : vector<1x8x16xf32> to vector<8x16xf32>
    %7 = vector.shape_cast %4 : vector<8x16xf32> to vector<1x8x16xf32>
    tpu.vector_store %arg3[%c0_5, %c0_6, %c0_7], %7 {strides = array<i32>} : memref<1x8x16xf32, #tpu.memory_space<vmem>>, vector<1x8x16xf32>,
    %cst_8 = arith.constant dense<0.000000e+00> : vector<8xf32>
    %8 = vector.multi_reduction <add>, %4, %cst_8 [1] : vector<8x16xf32> to vector<8xf32>
    %9 = vector.shape_cast %8 : vector<8xf32> to vector<8x1xf32>
    %c0_9 = arith.constant 0 : index
    %c0_10 = arith.constant 0 : index
    %c0_11 = arith.constant 0 : index
    %10 = vector.load %arg4[%c0_9, %c0_10, %c0_11] : memref<1x8x1xf32, #tpu.memory_space<vmem>>, vector<1x8x1xf32>
    %11 = vector.shape_cast %10 : vector<1x8x1xf32> to vector<8x1xf32>
    %12 = vector.shape_cast %9 : vector<8x1xf32> to vector<1x8x1xf32>
    tpu.vector_store %arg4[%c0_9, %c0_10, %c0_11], %12 {strides = array<i32>} : memref<1x8x1xf32, #tpu.memory_space<vmem>>, vector<1x8x1xf32>,
    %13 = arith.mulf %4, %4 : vector<8x16xf32>
    %cst_12 = arith.constant dense<0.000000e+00> : vector<8xf32>
    %14 = vector.multi_reduction <add>, %13, %cst_12 [1] : vector<8x16xf32> to vector<8xf32>
    %15 = vector.shape_cast %14 : vector<8xf32> to vector<8x1xf32>
    %c0_13 = arith.constant 0 : index
    %c0_14 = arith.constant 0 : index
    %c0_15 = arith.constant 0 : index
    %16 = vector.load %arg5[%c0_13, %c0_14, %c0_15] : memref<1x8x1xf32, #tpu.memory_space<vmem>>, vector<1x8x1xf32>
    %17 = vector.shape_cast %16 : vector<1x8x1xf32> to vector<8x1xf32>
    %18 = vector.shape_cast %15 : vector<8x1xf32> to vector<1x8x1xf32>
    tpu.vector_store %arg5[%c0_13, %c0_14, %c0_15], %18 {strides = array<i32>} : memref<1x8x1xf32, #tpu.memory_space<vmem>>, vector<1x8x1xf32>,
    return
  }
  func.func @transform_0(%arg0: i32) -> (i32, i32, i32) {
    %c0_i32 = arith.constant 0 : i32
    %c0_i32_0 = arith.constant 0 : i32
    %c0_i32_1 = arith.constant 0 : i32
    return %arg0, %c0_i32, %c0_i32_0 : i32, i32, i32
  }
  func.func @transform_1(%arg0: i32) -> (i32, i32, i32) {
    %c0_i32 = arith.constant 0 : i32
    %c0_i32_0 = arith.constant 0 : i32
    %c0_i32_1 = arith.constant 0 : i32
    %c0_i32_2 = arith.constant 0 : i32
    return %c0_i32, %c0_i32_0, %c0_i32_1 : i32, i32, i32
  }
  func.func @transform_2(%arg0: i32) -> (i32, i32, i32) {
    %c0_i32 = arith.constant 0 : i32
    %c0_i32_0 = arith.constant 0 : i32
    %c0_i32_1 = arith.constant 0 : i32
    return %arg0, %c0_i32, %c0_i32_0 : i32, i32, i32
  }
  func.func @transform_3(%arg0: i32) -> (i32, i32, i32) {
    %c0_i32 = arith.constant 0 : i32
    %c0_i32_0 = arith.constant 0 : i32
    %c0_i32_1 = arith.constant 0 : i32
    return %arg0, %c0_i32, %c0_i32_0 : i32, i32, i32
  }
  func.func @transform_4(%arg0: i32) -> (i32, i32, i32) {
    %c0_i32 = arith.constant 0 : i32
    %c0_i32_0 = arith.constant 0 : i32
    %c0_i32_1 = arith.constant 0 : i32
    return %arg0, %c0_i32, %c0_i32_0 : i32, i32, i32
  }
}

module attributes {stable_mosaic.version = 11 : i64} {
  func.func @_fused_bn_relu_add_kernel(%arg0: i32, %arg1: i32, %arg2: memref<1x8x16xf32, #tpu.memory_space<vmem>>, %arg3: memref<1x8x16xf32, #tpu.memory_space<vmem>>, %arg4: memref<8x1xf32, #tpu.memory_space<vmem>>, %arg5: memref<8x1xf32, #tpu.memory_space<vmem>>, %arg6: memref<8x1xf32, #tpu.memory_space<vmem>>, %arg7: memref<8x1xf32, #tpu.memory_space<vmem>>, %arg8: memref<1x8x16xf32, #tpu.memory_space<vmem>>) attributes {dimension_semantics = [#tpu.dimension_semantics<parallel>, #tpu.dimension_semantics<parallel>], iteration_bounds = array<i64: 2, 1>, scalar_prefetch = 0 : i64, scratch_operands = 0 : i64, tpu.core_type = #tpu.core_type<tc>, window_params = [{transform_indices = @transform_0, window_bounds = array<i64: 1, 8, 16>}, {transform_indices = @transform_1, window_bounds = array<i64: 1, 8, 16>}, {pipeline_mode = #tpu.pipeline_mode<synchronous>, transform_indices = @transform_2, window_bounds = array<i64: 8, 1>}, {pipeline_mode = #tpu.pipeline_mode<synchronous>, transform_indices = @transform_3, window_bounds = array<i64: 8, 1>}, {pipeline_mode = #tpu.pipeline_mode<synchronous>, transform_indices = @transform_4, window_bounds = array<i64: 8, 1>}, {pipeline_mode = #tpu.pipeline_mode<synchronous>, transform_indices = @transform_5, window_bounds = array<i64: 8, 1>}, {transform_indices = @transform_6, window_bounds = array<i64: 1, 8, 16>}]} {
    %c0 = arith.constant 0 : index
    %c0_0 = arith.constant 0 : index
    %c0_1 = arith.constant 0 : index
    %0 = vector.load %arg2[%c0, %c0_0, %c0_1] : memref<1x8x16xf32, #tpu.memory_space<vmem>>, vector<1x8x16xf32>
    %1 = vector.shape_cast %0 : vector<1x8x16xf32> to vector<8x16xf32>
    %c0_2 = arith.constant 0 : index
    %c0_3 = arith.constant 0 : index
    %2 = vector.load %arg4[%c0_2, %c0_3] : memref<8x1xf32, #tpu.memory_space<vmem>>, vector<8x1xf32>
    %3 = vector.broadcast %2 : vector<8x1xf32> to vector<8x16xf32>
    %4 = arith.mulf %1, %3 : vector<8x16xf32>
    %c0_4 = arith.constant 0 : index
    %c0_5 = arith.constant 0 : index
    %5 = vector.load %arg5[%c0_4, %c0_5] : memref<8x1xf32, #tpu.memory_space<vmem>>, vector<8x1xf32>
    %6 = vector.broadcast %5 : vector<8x1xf32> to vector<8x16xf32>
    %7 = arith.addf %4, %6 : vector<8x16xf32>
    %cst = arith.constant 0.000000e+00 : f32
    %8 = vector.broadcast %cst : f32 to vector<8x16xf32>
    %9 = arith.maximumf %7, %8 : vector<8x16xf32>
    %c0_6 = arith.constant 0 : index
    %c0_7 = arith.constant 0 : index
    %c0_8 = arith.constant 0 : index
    %10 = vector.load %arg3[%c0_6, %c0_7, %c0_8] : memref<1x8x16xf32, #tpu.memory_space<vmem>>, vector<1x8x16xf32>
    %11 = vector.shape_cast %10 : vector<1x8x16xf32> to vector<8x16xf32>
    %c0_9 = arith.constant 0 : index
    %c0_10 = arith.constant 0 : index
    %12 = vector.load %arg6[%c0_9, %c0_10] : memref<8x1xf32, #tpu.memory_space<vmem>>, vector<8x1xf32>
    %13 = vector.broadcast %12 : vector<8x1xf32> to vector<8x16xf32>
    %14 = arith.mulf %11, %13 : vector<8x16xf32>
    %15 = arith.addf %9, %14 : vector<8x16xf32>
    %c0_11 = arith.constant 0 : index
    %c0_12 = arith.constant 0 : index
    %16 = vector.load %arg7[%c0_11, %c0_12] : memref<8x1xf32, #tpu.memory_space<vmem>>, vector<8x1xf32>
    %17 = vector.broadcast %16 : vector<8x1xf32> to vector<8x16xf32>
    %18 = arith.addf %15, %17 : vector<8x16xf32>
    %c0_13 = arith.constant 0 : index
    %c0_14 = arith.constant 0 : index
    %c0_15 = arith.constant 0 : index
    %19 = vector.load %arg8[%c0_13, %c0_14, %c0_15] : memref<1x8x16xf32, #tpu.memory_space<vmem>>, vector<1x8x16xf32>
    %20 = vector.shape_cast %19 : vector<1x8x16xf32> to vector<8x16xf32>
    %21 = vector.shape_cast %18 : vector<8x16xf32> to vector<1x8x16xf32>
    tpu.vector_store %arg8[%c0_13, %c0_14, %c0_15], %21 {strides = array<i32>} : memref<1x8x16xf32, #tpu.memory_space<vmem>>, vector<1x8x16xf32>,
    return
  }
  func.func @transform_0(%arg0: i32, %arg1: i32) -> (i32, i32, i32) {
    %c0_i32 = arith.constant 0 : i32
    %c0_i32_0 = arith.constant 0 : i32
    return %arg0, %c0_i32, %arg1 : i32, i32, i32
  }
  func.func @transform_1(%arg0: i32, %arg1: i32) -> (i32, i32, i32) {
    %c0_i32 = arith.constant 0 : i32
    %c0_i32_0 = arith.constant 0 : i32
    return %arg0, %c0_i32, %arg1 : i32, i32, i32
  }
  func.func @transform_2(%arg0: i32, %arg1: i32) -> (i32, i32) {
    %c0_i32 = arith.constant 0 : i32
    %c0_i32_0 = arith.constant 0 : i32
    %c0_i32_1 = arith.constant 0 : i32
    return %c0_i32, %c0_i32_0 : i32, i32
  }
  func.func @transform_3(%arg0: i32, %arg1: i32) -> (i32, i32) {
    %c0_i32 = arith.constant 0 : i32
    %c0_i32_0 = arith.constant 0 : i32
    %c0_i32_1 = arith.constant 0 : i32
    return %c0_i32, %c0_i32_0 : i32, i32
  }
  func.func @transform_4(%arg0: i32, %arg1: i32) -> (i32, i32) {
    %c0_i32 = arith.constant 0 : i32
    %c0_i32_0 = arith.constant 0 : i32
    %c0_i32_1 = arith.constant 0 : i32
    return %c0_i32, %c0_i32_0 : i32, i32
  }
  func.func @transform_5(%arg0: i32, %arg1: i32) -> (i32, i32) {
    %c0_i32 = arith.constant 0 : i32
    %c0_i32_0 = arith.constant 0 : i32
    %c0_i32_1 = arith.constant 0 : i32
    return %c0_i32, %c0_i32_0 : i32, i32
  }
  func.func @transform_6(%arg0: i32, %arg1: i32) -> (i32, i32, i32) {
    %c0_i32 = arith.constant 0 : i32
    %c0_i32_0 = arith.constant 0 : i32
    return %arg0, %c0_i32, %arg1 : i32, i32, i32
  }
}

module attributes {stable_mosaic.version = 11 : i64} {
  func.func @kernel(%arg0: i32, %arg1: memref<1x96x24xbf16, #tpu.memory_space<vmem>>, %arg2: memref<3x8x96xbf16, #tpu.memory_space<vmem>>, %arg3: memref<1x8x16xf32, #tpu.memory_space<vmem>>, %arg4: memref<1x8x1xf32, #tpu.memory_space<vmem>>, %arg5: memref<1x8x1xf32, #tpu.memory_space<vmem>>) attributes {dimension_semantics = [#tpu.dimension_semantics<parallel>], iteration_bounds = array<i64: 2>, scalar_prefetch = 0 : i64, scratch_operands = 0 : i64, tpu.core_type = #tpu.core_type<tc>, window_params = [{transform_indices = @transform_0, window_bounds = array<i64: 1, 96, 24>}, {pipeline_mode = #tpu.pipeline_mode<synchronous>, transform_indices = @transform_1, window_bounds = array<i64: 3, 8, 96>}, {transform_indices = @transform_2, window_bounds = array<i64: 1, 8, 16>}, {transform_indices = @transform_3, window_bounds = array<i64: 1, 8, 1>}, {transform_indices = @transform_4, window_bounds = array<i64: 1, 8, 1>}]} {
    %c0 = arith.constant 0 : index
    %c0_0 = arith.constant 0 : index
    %c0_1 = arith.constant 0 : index
    %0 = vector.load %arg1[%c0, %c0_0, %c0_1] : memref<1x96x24xbf16, #tpu.memory_space<vmem>>, vector<1x96x24xbf16>
    %1 = vector.shape_cast %0 : vector<1x96x24xbf16> to vector<96x24xbf16>
    %2 = vector.extract_strided_slice %1 {offsets = [0, 0], sizes = [96, 16], strides = [1, 1]} : vector<96x24xbf16> to vector<96x16xbf16>
    %c0_2 = arith.constant 0 : index
    %c0_3 = arith.constant 0 : index
    %c0_4 = arith.constant 0 : index
    %3 = vector.load %arg2[%c0_2, %c0_3, %c0_4] : memref<3x8x96xbf16, #tpu.memory_space<vmem>>, vector<1x8x96xbf16>
    %4 = vector.shape_cast %3 : vector<1x8x96xbf16> to vector<8x96xbf16>
    %cst = arith.constant dense<0.000000e+00> : vector<8x16xf32>
    %5 = tpu.matmul %4, %2, %cst {dimension_numbers = #tpu.dot_dimension_numbers<[1], [0], [0], [1], [0, 0, 1, 1], [], []>} : vector<8x96xbf16>, vector<96x16xbf16>, vector<8x16xf32> -> vector<8x16xf32>
    %6 = vector.extract_strided_slice %1 {offsets = [0, 4], sizes = [96, 16], strides = [1, 1]} : vector<96x24xbf16> to vector<96x16xbf16>
    %c1 = arith.constant 1 : index
    %c0_5 = arith.constant 0 : index
    %c0_6 = arith.constant 0 : index
    %7 = vector.load %arg2[%c1, %c0_5, %c0_6] : memref<3x8x96xbf16, #tpu.memory_space<vmem>>, vector<1x8x96xbf16>
    %8 = vector.shape_cast %7 : vector<1x8x96xbf16> to vector<8x96xbf16>
    %cst_7 = arith.constant dense<0.000000e+00> : vector<8x16xf32>
    %9 = tpu.matmul %8, %6, %cst_7 {dimension_numbers = #tpu.dot_dimension_numbers<[1], [0], [0], [1], [0, 0, 1, 1], [], []>} : vector<8x96xbf16>, vector<96x16xbf16>, vector<8x16xf32> -> vector<8x16xf32>
    %10 = arith.addf %5, %9 : vector<8x16xf32>
    %11 = vector.extract_strided_slice %1 {offsets = [0, 8], sizes = [96, 16], strides = [1, 1]} : vector<96x24xbf16> to vector<96x16xbf16>
    %c2 = arith.constant 2 : index
    %c0_8 = arith.constant 0 : index
    %c0_9 = arith.constant 0 : index
    %12 = vector.load %arg2[%c2, %c0_8, %c0_9] : memref<3x8x96xbf16, #tpu.memory_space<vmem>>, vector<1x8x96xbf16>
    %13 = vector.shape_cast %12 : vector<1x8x96xbf16> to vector<8x96xbf16>
    %cst_10 = arith.constant dense<0.000000e+00> : vector<8x16xf32>
    %14 = tpu.matmul %13, %11, %cst_10 {dimension_numbers = #tpu.dot_dimension_numbers<[1], [0], [0], [1], [0, 0, 1, 1], [], []>} : vector<8x96xbf16>, vector<96x16xbf16>, vector<8x16xf32> -> vector<8x16xf32>
    %15 = arith.addf %10, %14 : vector<8x16xf32>
    %c0_11 = arith.constant 0 : index
    %c0_12 = arith.constant 0 : index
    %c0_13 = arith.constant 0 : index
    %16 = vector.load %arg3[%c0_11, %c0_12, %c0_13] : memref<1x8x16xf32, #tpu.memory_space<vmem>>, vector<1x8x16xf32>
    %17 = vector.shape_cast %16 : vector<1x8x16xf32> to vector<8x16xf32>
    %18 = vector.shape_cast %15 : vector<8x16xf32> to vector<1x8x16xf32>
    tpu.vector_store %arg3[%c0_11, %c0_12, %c0_13], %18 {strides = array<i32>} : memref<1x8x16xf32, #tpu.memory_space<vmem>>, vector<1x8x16xf32>,
    %cst_14 = arith.constant dense<0.000000e+00> : vector<8xf32>
    %19 = vector.multi_reduction <add>, %15, %cst_14 [1] : vector<8x16xf32> to vector<8xf32>
    %20 = vector.shape_cast %19 : vector<8xf32> to vector<8x1xf32>
    %c0_15 = arith.constant 0 : index
    %c0_16 = arith.constant 0 : index
    %c0_17 = arith.constant 0 : index
    %21 = vector.load %arg4[%c0_15, %c0_16, %c0_17] : memref<1x8x1xf32, #tpu.memory_space<vmem>>, vector<1x8x1xf32>
    %22 = vector.shape_cast %21 : vector<1x8x1xf32> to vector<8x1xf32>
    %23 = vector.shape_cast %20 : vector<8x1xf32> to vector<1x8x1xf32>
    tpu.vector_store %arg4[%c0_15, %c0_16, %c0_17], %23 {strides = array<i32>} : memref<1x8x1xf32, #tpu.memory_space<vmem>>, vector<1x8x1xf32>,
    %24 = arith.mulf %15, %15 : vector<8x16xf32>
    %cst_18 = arith.constant dense<0.000000e+00> : vector<8xf32>
    %25 = vector.multi_reduction <add>, %24, %cst_18 [1] : vector<8x16xf32> to vector<8xf32>
    %26 = vector.shape_cast %25 : vector<8xf32> to vector<8x1xf32>
    %c0_19 = arith.constant 0 : index
    %c0_20 = arith.constant 0 : index
    %c0_21 = arith.constant 0 : index
    %27 = vector.load %arg5[%c0_19, %c0_20, %c0_21] : memref<1x8x1xf32, #tpu.memory_space<vmem>>, vector<1x8x1xf32>
    %28 = vector.shape_cast %27 : vector<1x8x1xf32> to vector<8x1xf32>
    %29 = vector.shape_cast %26 : vector<8x1xf32> to vector<1x8x1xf32>
    tpu.vector_store %arg5[%c0_19, %c0_20, %c0_21], %29 {strides = array<i32>} : memref<1x8x1xf32, #tpu.memory_space<vmem>>, vector<1x8x1xf32>,
    return
  }
  func.func @transform_0(%arg0: i32) -> (i32, i32, i32) {
    %c0_i32 = arith.constant 0 : i32
    %c0_i32_0 = arith.constant 0 : i32
    %c0_i32_1 = arith.constant 0 : i32
    return %arg0, %c0_i32, %c0_i32_0 : i32, i32, i32
  }
  func.func @transform_1(%arg0: i32) -> (i32, i32, i32) {
    %c0_i32 = arith.constant 0 : i32
    %c0_i32_0 = arith.constant 0 : i32
    %c0_i32_1 = arith.constant 0 : i32
    %c0_i32_2 = arith.constant 0 : i32
    return %c0_i32, %c0_i32_0, %c0_i32_1 : i32, i32, i32
  }
  func.func @transform_2(%arg0: i32) -> (i32, i32, i32) {
    %c0_i32 = arith.constant 0 : i32
    %c0_i32_0 = arith.constant 0 : i32
    %c0_i32_1 = arith.constant 0 : i32
    return %arg0, %c0_i32, %c0_i32_0 : i32, i32, i32
  }
  func.func @transform_3(%arg0: i32) -> (i32, i32, i32) {
    %c0_i32 = arith.constant 0 : i32
    %c0_i32_0 = arith.constant 0 : i32
    %c0_i32_1 = arith.constant 0 : i32
    return %arg0, %c0_i32, %c0_i32_0 : i32, i32, i32
  }
  func.func @transform_4(%arg0: i32) -> (i32, i32, i32) {
    %c0_i32 = arith.constant 0 : i32
    %c0_i32_0 = arith.constant 0 : i32
    %c0_i32_1 = arith.constant 0 : i32
    return %arg0, %c0_i32, %c0_i32_0 : i32, i32, i32
  }
}

module attributes {stable_mosaic.version = 11 : i64} {
  func.func @kernel(%arg0: i32, %arg1: memref<1x16x64xbf16, #tpu.memory_space<vmem>>, %arg2: memref<1x2x16xbf16, #tpu.memory_space<vmem>>, %arg3: memref<1x2x64xf32, #tpu.memory_space<vmem>>, %arg4: memref<1x2x1xf32, #tpu.memory_space<vmem>>, %arg5: memref<1x2x1xf32, #tpu.memory_space<vmem>>) attributes {dimension_semantics = [#tpu.dimension_semantics<parallel>], iteration_bounds = array<i64: 2>, scalar_prefetch = 0 : i64, scratch_operands = 0 : i64, tpu.core_type = #tpu.core_type<tc>, window_params = [{transform_indices = @transform_0, window_bounds = array<i64: 1, 16, 64>}, {pipeline_mode = #tpu.pipeline_mode<synchronous>, transform_indices = @transform_1, window_bounds = array<i64: 1, 2, 16>}, {transform_indices = @transform_2, window_bounds = array<i64: 1, 2, 64>}, {transform_indices = @transform_3, window_bounds = array<i64: 1, 2, 1>}, {transform_indices = @transform_4, window_bounds = array<i64: 1, 2, 1>}]} {
    %c0 = arith.constant 0 : index
    %c0_0 = arith.constant 0 : index
    %c0_1 = arith.constant 0 : index
    %0 = vector.load %arg1[%c0, %c0_0, %c0_1] : memref<1x16x64xbf16, #tpu.memory_space<vmem>>, vector<1x16x64xbf16>
    %1 = vector.shape_cast %0 : vector<1x16x64xbf16> to vector<16x64xbf16>
    %c0_2 = arith.constant 0 : index
    %c0_3 = arith.constant 0 : index
    %c0_4 = arith.constant 0 : index
    %2 = vector.load %arg2[%c0_2, %c0_3, %c0_4] : memref<1x2x16xbf16, #tpu.memory_space<vmem>>, vector<1x2x16xbf16>
    %3 = vector.shape_cast %2 : vector<1x2x16xbf16> to vector<2x16xbf16>
    %cst = arith.constant dense<0.000000e+00> : vector<2x64xf32>
    %4 = tpu.matmul %3, %1, %cst {dimension_numbers = #tpu.dot_dimension_numbers<[1], [0], [0], [1], [0, 0, 1, 1], [], []>} : vector<2x16xbf16>, vector<16x64xbf16>, vector<2x64xf32> -> vector<2x64xf32>
    %c0_5 = arith.constant 0 : index
    %c0_6 = arith.constant 0 : index
    %c0_7 = arith.constant 0 : index
    %5 = vector.load %arg3[%c0_5, %c0_6, %c0_7] : memref<1x2x64xf32, #tpu.memory_space<vmem>>, vector<1x2x64xf32>
    %6 = vector.shape_cast %5 : vector<1x2x64xf32> to vector<2x64xf32>
    %7 = vector.shape_cast %4 : vector<2x64xf32> to vector<1x2x64xf32>
    tpu.vector_store %arg3[%c0_5, %c0_6, %c0_7], %7 {strides = array<i32>} : memref<1x2x64xf32, #tpu.memory_space<vmem>>, vector<1x2x64xf32>,
    %cst_8 = arith.constant dense<0.000000e+00> : vector<2xf32>
    %8 = vector.multi_reduction <add>, %4, %cst_8 [1] : vector<2x64xf32> to vector<2xf32>
    %9 = vector.shape_cast %8 : vector<2xf32> to vector<2x1xf32>
    %c0_9 = arith.constant 0 : index
    %c0_10 = arith.constant 0 : index
    %c0_11 = arith.constant 0 : index
    %10 = vector.load %arg4[%c0_9, %c0_10, %c0_11] : memref<1x2x1xf32, #tpu.memory_space<vmem>>, vector<1x2x1xf32>
    %11 = vector.shape_cast %10 : vector<1x2x1xf32> to vector<2x1xf32>
    %12 = vector.shape_cast %9 : vector<2x1xf32> to vector<1x2x1xf32>
    tpu.vector_store %arg4[%c0_9, %c0_10, %c0_11], %12 {strides = array<i32>} : memref<1x2x1xf32, #tpu.memory_space<vmem>>, vector<1x2x1xf32>,
    %13 = arith.mulf %4, %4 : vector<2x64xf32>
    %cst_12 = arith.constant dense<0.000000e+00> : vector<2xf32>
    %14 = vector.multi_reduction <add>, %13, %cst_12 [1] : vector<2x64xf32> to vector<2xf32>
    %15 = vector.shape_cast %14 : vector<2xf32> to vector<2x1xf32>
    %c0_13 = arith.constant 0 : index
    %c0_14 = arith.constant 0 : index
    %c0_15 = arith.constant 0 : index
    %16 = vector.load %arg5[%c0_13, %c0_14, %c0_15] : memref<1x2x1xf32, #tpu.memory_space<vmem>>, vector<1x2x1xf32>
    %17 = vector.shape_cast %16 : vector<1x2x1xf32> to vector<2x1xf32>
    %18 = vector.shape_cast %15 : vector<2x1xf32> to vector<1x2x1xf32>
    tpu.vector_store %arg5[%c0_13, %c0_14, %c0_15], %18 {strides = array<i32>} : memref<1x2x1xf32, #tpu.memory_space<vmem>>, vector<1x2x1xf32>,
    return
  }
  func.func @transform_0(%arg0: i32) -> (i32, i32, i32) {
    %c0_i32 = arith.constant 0 : i32
    %c0_i32_0 = arith.constant 0 : i32
    %c0_i32_1 = arith.constant 0 : i32
    return %arg0, %c0_i32, %c0_i32_0 : i32, i32, i32
  }
  func.func @transform_1(%arg0: i32) -> (i32, i32, i32) {
    %c0_i32 = arith.constant 0 : i32
    %c0_i32_0 = arith.constant 0 : i32
    %c0_i32_1 = arith.constant 0 : i32
    %c0_i32_2 = arith.constant 0 : i32
    return %c0_i32, %c0_i32_0, %c0_i32_1 : i32, i32, i32
  }
  func.func @transform_2(%arg0: i32) -> (i32, i32, i32) {
    %c0_i32 = arith.constant 0 : i32
    %c0_i32_0 = arith.constant 0 : i32
    %c0_i32_1 = arith.constant 0 : i32
    return %arg0, %c0_i32, %c0_i32_0 : i32, i32, i32
  }
  func.func @transform_3(%arg0: i32) -> (i32, i32, i32) {
    %c0_i32 = arith.constant 0 : i32
    %c0_i32_0 = arith.constant 0 : i32
    %c0_i32_1 = arith.constant 0 : i32
    return %arg0, %c0_i32, %c0_i32_0 : i32, i32, i32
  }
  func.func @transform_4(%arg0: i32) -> (i32, i32, i32) {
    %c0_i32 = arith.constant 0 : i32
    %c0_i32_0 = arith.constant 0 : i32
    %c0_i32_1 = arith.constant 0 : i32
    return %arg0, %c0_i32, %c0_i32_0 : i32, i32, i32
  }
}

module attributes {stable_mosaic.version = 11 : i64} {
  func.func @kernel(%arg0: i32, %arg1: memref<1x48x80xbf16, #tpu.memory_space<vmem>>, %arg2: memref<3x2x48xbf16, #tpu.memory_space<vmem>>, %arg3: memref<1x2x64xf32, #tpu.memory_space<vmem>>, %arg4: memref<1x2x1xf32, #tpu.memory_space<vmem>>, %arg5: memref<1x2x1xf32, #tpu.memory_space<vmem>>) attributes {dimension_semantics = [#tpu.dimension_semantics<parallel>], iteration_bounds = array<i64: 2>, scalar_prefetch = 0 : i64, scratch_operands = 0 : i64, tpu.core_type = #tpu.core_type<tc>, window_params = [{transform_indices = @transform_0, window_bounds = array<i64: 1, 48, 80>}, {pipeline_mode = #tpu.pipeline_mode<synchronous>, transform_indices = @transform_1, window_bounds = array<i64: 3, 2, 48>}, {transform_indices = @transform_2, window_bounds = array<i64: 1, 2, 64>}, {transform_indices = @transform_3, window_bounds = array<i64: 1, 2, 1>}, {transform_indices = @transform_4, window_bounds = array<i64: 1, 2, 1>}]} {
    %c0 = arith.constant 0 : index
    %c0_0 = arith.constant 0 : index
    %c0_1 = arith.constant 0 : index
    %0 = vector.load %arg1[%c0, %c0_0, %c0_1] : memref<1x48x80xbf16, #tpu.memory_space<vmem>>, vector<1x48x80xbf16>
    %1 = vector.shape_cast %0 : vector<1x48x80xbf16> to vector<48x80xbf16>
    %2 = vector.extract_strided_slice %1 {offsets = [0, 0], sizes = [48, 64], strides = [1, 1]} : vector<48x80xbf16> to vector<48x64xbf16>
    %c0_2 = arith.constant 0 : index
    %c0_3 = arith.constant 0 : index
    %c0_4 = arith.constant 0 : index
    %3 = vector.load %arg2[%c0_2, %c0_3, %c0_4] : memref<3x2x48xbf16, #tpu.memory_space<vmem>>, vector<1x2x48xbf16>
    %4 = vector.shape_cast %3 : vector<1x2x48xbf16> to vector<2x48xbf16>
    %cst = arith.constant dense<0.000000e+00> : vector<2x64xf32>
    %5 = tpu.matmul %4, %2, %cst {dimension_numbers = #tpu.dot_dimension_numbers<[1], [0], [0], [1], [0, 0, 1, 1], [], []>} : vector<2x48xbf16>, vector<48x64xbf16>, vector<2x64xf32> -> vector<2x64xf32>
    %6 = vector.extract_strided_slice %1 {offsets = [0, 8], sizes = [48, 64], strides = [1, 1]} : vector<48x80xbf16> to vector<48x64xbf16>
    %c1 = arith.constant 1 : index
    %c0_5 = arith.constant 0 : index
    %c0_6 = arith.constant 0 : index
    %7 = vector.load %arg2[%c1, %c0_5, %c0_6] : memref<3x2x48xbf16, #tpu.memory_space<vmem>>, vector<1x2x48xbf16>
    %8 = vector.shape_cast %7 : vector<1x2x48xbf16> to vector<2x48xbf16>
    %cst_7 = arith.constant dense<0.000000e+00> : vector<2x64xf32>
    %9 = tpu.matmul %8, %6, %cst_7 {dimension_numbers = #tpu.dot_dimension_numbers<[1], [0], [0], [1], [0, 0, 1, 1], [], []>} : vector<2x48xbf16>, vector<48x64xbf16>, vector<2x64xf32> -> vector<2x64xf32>
    %10 = arith.addf %5, %9 : vector<2x64xf32>
    %11 = vector.extract_strided_slice %1 {offsets = [0, 16], sizes = [48, 64], strides = [1, 1]} : vector<48x80xbf16> to vector<48x64xbf16>
    %c2 = arith.constant 2 : index
    %c0_8 = arith.constant 0 : index
    %c0_9 = arith.constant 0 : index
    %12 = vector.load %arg2[%c2, %c0_8, %c0_9] : memref<3x2x48xbf16, #tpu.memory_space<vmem>>, vector<1x2x48xbf16>
    %13 = vector.shape_cast %12 : vector<1x2x48xbf16> to vector<2x48xbf16>
    %cst_10 = arith.constant dense<0.000000e+00> : vector<2x64xf32>
    %14 = tpu.matmul %13, %11, %cst_10 {dimension_numbers = #tpu.dot_dimension_numbers<[1], [0], [0], [1], [0, 0, 1, 1], [], []>} : vector<2x48xbf16>, vector<48x64xbf16>, vector<2x64xf32> -> vector<2x64xf32>
    %15 = arith.addf %10, %14 : vector<2x64xf32>
    %c0_11 = arith.constant 0 : index
    %c0_12 = arith.constant 0 : index
    %c0_13 = arith.constant 0 : index
    %16 = vector.load %arg3[%c0_11, %c0_12, %c0_13] : memref<1x2x64xf32, #tpu.memory_space<vmem>>, vector<1x2x64xf32>
    %17 = vector.shape_cast %16 : vector<1x2x64xf32> to vector<2x64xf32>
    %18 = vector.shape_cast %15 : vector<2x64xf32> to vector<1x2x64xf32>
    tpu.vector_store %arg3[%c0_11, %c0_12, %c0_13], %18 {strides = array<i32>} : memref<1x2x64xf32, #tpu.memory_space<vmem>>, vector<1x2x64xf32>,
    %cst_14 = arith.constant dense<0.000000e+00> : vector<2xf32>
    %19 = vector.multi_reduction <add>, %15, %cst_14 [1] : vector<2x64xf32> to vector<2xf32>
    %20 = vector.shape_cast %19 : vector<2xf32> to vector<2x1xf32>
    %c0_15 = arith.constant 0 : index
    %c0_16 = arith.constant 0 : index
    %c0_17 = arith.constant 0 : index
    %21 = vector.load %arg4[%c0_15, %c0_16, %c0_17] : memref<1x2x1xf32, #tpu.memory_space<vmem>>, vector<1x2x1xf32>
    %22 = vector.shape_cast %21 : vector<1x2x1xf32> to vector<2x1xf32>
    %23 = vector.shape_cast %20 : vector<2x1xf32> to vector<1x2x1xf32>
    tpu.vector_store %arg4[%c0_15, %c0_16, %c0_17], %23 {strides = array<i32>} : memref<1x2x1xf32, #tpu.memory_space<vmem>>, vector<1x2x1xf32>,
    %24 = arith.mulf %15, %15 : vector<2x64xf32>
    %cst_18 = arith.constant dense<0.000000e+00> : vector<2xf32>
    %25 = vector.multi_reduction <add>, %24, %cst_18 [1] : vector<2x64xf32> to vector<2xf32>
    %26 = vector.shape_cast %25 : vector<2xf32> to vector<2x1xf32>
    %c0_19 = arith.constant 0 : index
    %c0_20 = arith.constant 0 : index
    %c0_21 = arith.constant 0 : index
    %27 = vector.load %arg5[%c0_19, %c0_20, %c0_21] : memref<1x2x1xf32, #tpu.memory_space<vmem>>, vector<1x2x1xf32>
    %28 = vector.shape_cast %27 : vector<1x2x1xf32> to vector<2x1xf32>
    %29 = vector.shape_cast %26 : vector<2x1xf32> to vector<1x2x1xf32>
    tpu.vector_store %arg5[%c0_19, %c0_20, %c0_21], %29 {strides = array<i32>} : memref<1x2x1xf32, #tpu.memory_space<vmem>>, vector<1x2x1xf32>,
    return
  }
  func.func @transform_0(%arg0: i32) -> (i32, i32, i32) {
    %c0_i32 = arith.constant 0 : i32
    %c0_i32_0 = arith.constant 0 : i32
    %c0_i32_1 = arith.constant 0 : i32
    return %arg0, %c0_i32, %c0_i32_0 : i32, i32, i32
  }
  func.func @transform_1(%arg0: i32) -> (i32, i32, i32) {
    %c0_i32 = arith.constant 0 : i32
    %c0_i32_0 = arith.constant 0 : i32
    %c0_i32_1 = arith.constant 0 : i32
    %c0_i32_2 = arith.constant 0 : i32
    return %c0_i32, %c0_i32_0, %c0_i32_1 : i32, i32, i32
  }
  func.func @transform_2(%arg0: i32) -> (i32, i32, i32) {
    %c0_i32 = arith.constant 0 : i32
    %c0_i32_0 = arith.constant 0 : i32
    %c0_i32_1 = arith.constant 0 : i32
    return %arg0, %c0_i32, %c0_i32_0 : i32, i32, i32
  }
  func.func @transform_3(%arg0: i32) -> (i32, i32, i32) {
    %c0_i32 = arith.constant 0 : i32
    %c0_i32_0 = arith.constant 0 : i32
    %c0_i32_1 = arith.constant 0 : i32
    return %arg0, %c0_i32, %c0_i32_0 : i32, i32, i32
  }
  func.func @transform_4(%arg0: i32) -> (i32, i32, i32) {
    %c0_i32 = arith.constant 0 : i32
    %c0_i32_0 = arith.constant 0 : i32
    %c0_i32_1 = arith.constant 0 : i32
    return %arg0, %c0_i32, %c0_i32_0 : i32, i32, i32
  }
}

module attributes {stable_mosaic.version = 11 : i64} {
  func.func @_fused_bn_relu_add_kernel(%arg0: i32, %arg1: i32, %arg2: memref<1x2x64xf32, #tpu.memory_space<vmem>>, %arg3: memref<1x2x64xf32, #tpu.memory_space<vmem>>, %arg4: memref<2x1xf32, #tpu.memory_space<vmem>>, %arg5: memref<2x1xf32, #tpu.memory_space<vmem>>, %arg6: memref<2x1xf32, #tpu.memory_space<vmem>>, %arg7: memref<2x1xf32, #tpu.memory_space<vmem>>, %arg8: memref<1x2x64xf32, #tpu.memory_space<vmem>>) attributes {dimension_semantics = [#tpu.dimension_semantics<parallel>, #tpu.dimension_semantics<parallel>], iteration_bounds = array<i64: 2, 1>, scalar_prefetch = 0 : i64, scratch_operands = 0 : i64, tpu.core_type = #tpu.core_type<tc>, window_params = [{transform_indices = @transform_0, window_bounds = array<i64: 1, 2, 64>}, {transform_indices = @transform_1, window_bounds = array<i64: 1, 2, 64>}, {pipeline_mode = #tpu.pipeline_mode<synchronous>, transform_indices = @transform_2, window_bounds = array<i64: 2, 1>}, {pipeline_mode = #tpu.pipeline_mode<synchronous>, transform_indices = @transform_3, window_bounds = array<i64: 2, 1>}, {pipeline_mode = #tpu.pipeline_mode<synchronous>, transform_indices = @transform_4, window_bounds = array<i64: 2, 1>}, {pipeline_mode = #tpu.pipeline_mode<synchronous>, transform_indices = @transform_5, window_bounds = array<i64: 2, 1>}, {transform_indices = @transform_6, window_bounds = array<i64: 1, 2, 64>}]} {
    %c0 = arith.constant 0 : index
    %c0_0 = arith.constant 0 : index
    %c0_1 = arith.constant 0 : index
    %0 = vector.load %arg2[%c0, %c0_0, %c0_1] : memref<1x2x64xf32, #tpu.memory_space<vmem>>, vector<1x2x64xf32>
    %1 = vector.shape_cast %0 : vector<1x2x64xf32> to vector<2x64xf32>
    %c0_2 = arith.constant 0 : index
    %c0_3 = arith.constant 0 : index
    %2 = vector.load %arg4[%c0_2, %c0_3] : memref<2x1xf32, #tpu.memory_space<vmem>>, vector<2x1xf32>
    %3 = vector.broadcast %2 : vector<2x1xf32> to vector<2x64xf32>
    %4 = arith.mulf %1, %3 : vector<2x64xf32>
    %c0_4 = arith.constant 0 : index
    %c0_5 = arith.constant 0 : index
    %5 = vector.load %arg5[%c0_4, %c0_5] : memref<2x1xf32, #tpu.memory_space<vmem>>, vector<2x1xf32>
    %6 = vector.broadcast %5 : vector<2x1xf32> to vector<2x64xf32>
    %7 = arith.addf %4, %6 : vector<2x64xf32>
    %cst = arith.constant 0.000000e+00 : f32
    %8 = vector.broadcast %cst : f32 to vector<2x64xf32>
    %9 = arith.maximumf %7, %8 : vector<2x64xf32>
    %c0_6 = arith.constant 0 : index
    %c0_7 = arith.constant 0 : index
    %c0_8 = arith.constant 0 : index
    %10 = vector.load %arg3[%c0_6, %c0_7, %c0_8] : memref<1x2x64xf32, #tpu.memory_space<vmem>>, vector<1x2x64xf32>
    %11 = vector.shape_cast %10 : vector<1x2x64xf32> to vector<2x64xf32>
    %c0_9 = arith.constant 0 : index
    %c0_10 = arith.constant 0 : index
    %12 = vector.load %arg6[%c0_9, %c0_10] : memref<2x1xf32, #tpu.memory_space<vmem>>, vector<2x1xf32>
    %13 = vector.broadcast %12 : vector<2x1xf32> to vector<2x64xf32>
    %14 = arith.mulf %11, %13 : vector<2x64xf32>
    %15 = arith.addf %9, %14 : vector<2x64xf32>
    %c0_11 = arith.constant 0 : index
    %c0_12 = arith.constant 0 : index
    %16 = vector.load %arg7[%c0_11, %c0_12] : memref<2x1xf32, #tpu.memory_space<vmem>>, vector<2x1xf32>
    %17 = vector.broadcast %16 : vector<2x1xf32> to vector<2x64xf32>
    %18 = arith.addf %15, %17 : vector<2x64xf32>
    %c0_13 = arith.constant 0 : index
    %c0_14 = arith.constant 0 : index
    %c0_15 = arith.constant 0 : index
    %19 = vector.load %arg8[%c0_13, %c0_14, %c0_15] : memref<1x2x64xf32, #tpu.memory_space<vmem>>, vector<1x2x64xf32>
    %20 = vector.shape_cast %19 : vector<1x2x64xf32> to vector<2x64xf32>
    %21 = vector.shape_cast %18 : vector<2x64xf32> to vector<1x2x64xf32>
    tpu.vector_store %arg8[%c0_13, %c0_14, %c0_15], %21 {strides = array<i32>} : memref<1x2x64xf32, #tpu.memory_space<vmem>>, vector<1x2x64xf32>,
    return
  }
  func.func @transform_0(%arg0: i32, %arg1: i32) -> (i32, i32, i32) {
    %c0_i32 = arith.constant 0 : i32
    %c0_i32_0 = arith.constant 0 : i32
    return %arg0, %c0_i32, %arg1 : i32, i32, i32
  }
  func.func @transform_1(%arg0: i32, %arg1: i32) -> (i32, i32, i32) {
    %c0_i32 = arith.constant 0 : i32
    %c0_i32_0 = arith.constant 0 : i32
    return %arg0, %c0_i32, %arg1 : i32, i32, i32
  }
  func.func @transform_2(%arg0: i32, %arg1: i32) -> (i32, i32) {
    %c0_i32 = arith.constant 0 : i32
    %c0_i32_0 = arith.constant 0 : i32
    %c0_i32_1 = arith.constant 0 : i32
    return %c0_i32, %c0_i32_0 : i32, i32
  }
  func.func @transform_3(%arg0: i32, %arg1: i32) -> (i32, i32) {
    %c0_i32 = arith.constant 0 : i32
    %c0_i32_0 = arith.constant 0 : i32
    %c0_i32_1 = arith.constant 0 : i32
    return %c0_i32, %c0_i32_0 : i32, i32
  }
  func.func @transform_4(%arg0: i32, %arg1: i32) -> (i32, i32) {
    %c0_i32 = arith.constant 0 : i32
    %c0_i32_0 = arith.constant 0 : i32
    %c0_i32_1 = arith.constant 0 : i32
    return %c0_i32, %c0_i32_0 : i32, i32
  }
  func.func @transform_5(%arg0: i32, %arg1: i32) -> (i32, i32) {
    %c0_i32 = arith.constant 0 : i32
    %c0_i32_0 = arith.constant 0 : i32
    %c0_i32_1 = arith.constant 0 : i32
    return %c0_i32, %c0_i32_0 : i32, i32
  }
  func.func @transform_6(%arg0: i32, %arg1: i32) -> (i32, i32, i32) {
    %c0_i32 = arith.constant 0 : i32
    %c0_i32_0 = arith.constant 0 : i32
    return %arg0, %c0_i32, %arg1 : i32, i32, i32
  }
}

module attributes {stable_mosaic.version = 11 : i64} {
  func.func @kernel(%arg0: i32, %arg1: memref<1x9x288xbf16, #tpu.memory_space<vmem>>, %arg2: memref<3x2x9xbf16, #tpu.memory_space<vmem>>, %arg3: memref<2x1xf32, #tpu.memory_space<vmem>>, %arg4: memref<1x2x256xf32, #tpu.memory_space<vmem>>) attributes {dimension_semantics = [#tpu.dimension_semantics<parallel>], iteration_bounds = array<i64: 2>, scalar_prefetch = 0 : i64, scratch_operands = 0 : i64, tpu.core_type = #tpu.core_type<tc>, window_params = [{transform_indices = @transform_0, window_bounds = array<i64: 1, 9, 288>}, {pipeline_mode = #tpu.pipeline_mode<synchronous>, transform_indices = @transform_1, window_bounds = array<i64: 3, 2, 9>}, {pipeline_mode = #tpu.pipeline_mode<synchronous>, transform_indices = @transform_2, window_bounds = array<i64: 2, 1>}, {transform_indices = @transform_3, window_bounds = array<i64: 1, 2, 256>}]} {
    %c0 = arith.constant 0 : index
    %c0_0 = arith.constant 0 : index
    %c0_1 = arith.constant 0 : index
    %0 = vector.load %arg1[%c0, %c0_0, %c0_1] : memref<1x9x288xbf16, #tpu.memory_space<vmem>>, vector<1x9x288xbf16>
    %1 = vector.shape_cast %0 : vector<1x9x288xbf16> to vector<9x288xbf16>
    %2 = vector.extract_strided_slice %1 {offsets = [0, 0], sizes = [9, 256], strides = [1, 1]} : vector<9x288xbf16> to vector<9x256xbf16>
    %c0_2 = arith.constant 0 : index
    %c0_3 = arith.constant 0 : index
    %c0_4 = arith.constant 0 : index
    %3 = vector.load %arg2[%c0_2, %c0_3, %c0_4] : memref<3x2x9xbf16, #tpu.memory_space<vmem>>, vector<1x2x9xbf16>
    %4 = vector.shape_cast %3 : vector<1x2x9xbf16> to vector<2x9xbf16>
    %cst = arith.constant dense<0.000000e+00> : vector<2x256xf32>
    %5 = tpu.matmul %4, %2, %cst {dimension_numbers = #tpu.dot_dimension_numbers<[1], [0], [0], [1], [0, 0, 1, 1], [], []>} : vector<2x9xbf16>, vector<9x256xbf16>, vector<2x256xf32> -> vector<2x256xf32>
    %6 = vector.extract_strided_slice %1 {offsets = [0, 16], sizes = [9, 256], strides = [1, 1]} : vector<9x288xbf16> to vector<9x256xbf16>
    %c1 = arith.constant 1 : index
    %c0_5 = arith.constant 0 : index
    %c0_6 = arith.constant 0 : index
    %7 = vector.load %arg2[%c1, %c0_5, %c0_6] : memref<3x2x9xbf16, #tpu.memory_space<vmem>>, vector<1x2x9xbf16>
    %8 = vector.shape_cast %7 : vector<1x2x9xbf16> to vector<2x9xbf16>
    %cst_7 = arith.constant dense<0.000000e+00> : vector<2x256xf32>
    %9 = tpu.matmul %8, %6, %cst_7 {dimension_numbers = #tpu.dot_dimension_numbers<[1], [0], [0], [1], [0, 0, 1, 1], [], []>} : vector<2x9xbf16>, vector<9x256xbf16>, vector<2x256xf32> -> vector<2x256xf32>
    %10 = arith.addf %5, %9 : vector<2x256xf32>
    %11 = vector.extract_strided_slice %1 {offsets = [0, 32], sizes = [9, 256], strides = [1, 1]} : vector<9x288xbf16> to vector<9x256xbf16>
    %c2 = arith.constant 2 : index
    %c0_8 = arith.constant 0 : index
    %c0_9 = arith.constant 0 : index
    %12 = vector.load %arg2[%c2, %c0_8, %c0_9] : memref<3x2x9xbf16, #tpu.memory_space<vmem>>, vector<1x2x9xbf16>
    %13 = vector.shape_cast %12 : vector<1x2x9xbf16> to vector<2x9xbf16>
    %cst_10 = arith.constant dense<0.000000e+00> : vector<2x256xf32>
    %14 = tpu.matmul %13, %11, %cst_10 {dimension_numbers = #tpu.dot_dimension_numbers<[1], [0], [0], [1], [0, 0, 1, 1], [], []>} : vector<2x9xbf16>, vector<9x256xbf16>, vector<2x256xf32> -> vector<2x256xf32>
    %15 = arith.addf %10, %14 : vector<2x256xf32>
    %c0_11 = arith.constant 0 : index
    %c0_12 = arith.constant 0 : index
    %16 = vector.load %arg3[%c0_11, %c0_12] : memref<2x1xf32, #tpu.memory_space<vmem>>, vector<2x1xf32>
    %17 = vector.broadcast %16 : vector<2x1xf32> to vector<2x256xf32>
    %18 = arith.addf %15, %17 : vector<2x256xf32>
    %c0_13 = arith.constant 0 : index
    %c0_14 = arith.constant 0 : index
    %c0_15 = arith.constant 0 : index
    %19 = vector.load %arg4[%c0_13, %c0_14, %c0_15] : memref<1x2x256xf32, #tpu.memory_space<vmem>>, vector<1x2x256xf32>
    %20 = vector.shape_cast %19 : vector<1x2x256xf32> to vector<2x256xf32>
    %21 = vector.shape_cast %18 : vector<2x256xf32> to vector<1x2x256xf32>
    tpu.vector_store %arg4[%c0_13, %c0_14, %c0_15], %21 {strides = array<i32>} : memref<1x2x256xf32, #tpu.memory_space<vmem>>, vector<1x2x256xf32>,
    return
  }
  func.func @transform_0(%arg0: i32) -> (i32, i32, i32) {
    %c0_i32 = arith.constant 0 : i32
    %c0_i32_0 = arith.constant 0 : i32
    %c0_i32_1 = arith.constant 0 : i32
    return %arg0, %c0_i32, %c0_i32_0 : i32, i32, i32
  }
  func.func @transform_1(%arg0: i32) -> (i32, i32, i32) {
    %c0_i32 = arith.constant 0 : i32
    %c0_i32_0 = arith.constant 0 : i32
    %c0_i32_1 = arith.constant 0 : i32
    %c0_i32_2 = arith.constant 0 : i32
    return %c0_i32, %c0_i32_0, %c0_i32_1 : i32, i32, i32
  }
  func.func @transform_2(%arg0: i32) -> (i32, i32) {
    %c0_i32 = arith.constant 0 : i32
    %c0_i32_0 = arith.constant 0 : i32
    %c0_i32_1 = arith.constant 0 : i32
    return %c0_i32, %c0_i32_0 : i32, i32
  }
  func.func @transform_3(%arg0: i32) -> (i32, i32, i32) {
    %c0_i32 = arith.constant 0 : i32
    %c0_i32_0 = arith.constant 0 : i32
    %c0_i32_1 = arith.constant 0 : i32
    return %arg0, %c0_i32, %c0_i32_0 : i32, i32, i32
  }
}

</mosaic_0001>

<bundles_post_ra>
// kernel: forward.15
= control target key start
LH: loop header
LB: loop body
LE: loop exit
PB: predicated region body
PF: predicated region fallthrough
CT: control target
= control target key end

     0   :  { %s465_s9 = smov 0   ;;  %s498_s0 = inlined_call_operand.vmem [shape: bf16[2,3,288], index: 0, kind: input, shape index: {}]   ;;  %s499_s1 = inlined_call_operand.vmem [shape: bf16[3,8,3], index: 1, kind: input, shape index: {}]   ;;  %s500_s2 = inlined_call_operand.vmem [shape: f32[2,8,256], index: 2, kind: output, shape index: {}]  }
   0x1 LB: > { %s400_s10 = sadd.s32 4294967295, %s443_s9   ;;  %p404_p0 = scmp.ge.s32.totalorder %s443_s9, 1  ;;  %s443_s9 = sphi %s465_s9, %s12_s9  }
   0x2   : > { %p112_p1 = scmp.lt.s32.totalorder %s443_s9, 3 }
   0x4   : > { %p113_p2 = pnand %p404_p0, %p112_p1 }
   0x5   : > { %p134_p3 = scmp.lt.s32.totalorder (!%p113_p2), %s400_s10, 1  ;;  %v154_v0 = vlaneseq (!%p113_p2)  ;;  %v445_v1 = vmov (!%p113_p2), 1983009808   ;;  %vm179_vm0 = vcmask (!%p113_p2), 1040384   ;;  %v446_v4 = vmov (!%p113_p2), 0   ;;  %s448_s15 = smov (!%p113_p2), 96  }
   0x6   : > { %116 = sbr.rel (%p113_p2) target bundleno = 367 (0x16f), region = 28  ;;  %v152_v2 = vunpack.c.l.s4 (!%p113_p2), %v445_v1  ;;  %271 = vmatprep.mubr.bf16.mxu0 (!%p113_p2), %v446_v4  ;;  %221 = vmatprep.mubr.bf16.mxu1 (!%p113_p2), %v446_v4  ;;  %vm180_vm1 = vcmask (!%p113_p2), 1041408   ;;  %v447_v7 = vmov (!%p113_p2), 65535   ;;  %s449_s16 = smov (!%p113_p2), 112   ;;  %v146_v17 = vld [vmem:[%s499_s1] sm:$0xf] (!%p113_p2) }
   0x7   : > { %v155_v3 = vshrl.u32 (!%p113_p2), %v154_v0, 7  ;;  %v181_v8 = vsel (!%p113_p2), %vm179_vm0, 4294967295, %v447_v7  ;;  %vm175_vm2 = vcmask (!%p113_p2), 23552   ;;  %vm288_vm3 = vcmask (!%p113_p2), 785408   ;;  %v408_v32 = vld [vmem:[%s499_s1 + $0x4] sm:$0xf] (!%p113_p2) }
   0x8   : > { %v153_v5 = vunpack.c.0.s8 (!%p113_p2), %v152_v2  ;;  %v182_v12 = vsel (!%p113_p2), %vm180_vm1, %v181_v8, 0  ;;  %vm172_vm4 = vcmask (!%p113_p2), 916480   ;;  %v411_v33 = vld [vmem:[%s499_s1 + $0x8] sm:$0xf] (!%p113_p2) }
   0xa   : > { %v156_v6 = vsub.s32 (!%p113_p2), %v153_v5, %v155_v3 }
   0xd   : > { %s502_s10 = smov (!%p134_p3, %s400_s10), 1 }
   0xe   : > { %s422_s11 = smul.u32 6, %s502_s10  ;;  %s415_s23 = sshll.u32 %s502_s10, 4 }
   0xf   : > { %s143_s26 = scalar_lea.vmem %s500_s2, %s415_s23 }
  0x10   : > { %s138_s14 = scalar_lea.vmem %s498_s0, %s422_s11 }
  0x11   : > { %v145_v9 = vld [vmem:[%s138_s14] sm:$0x3f] }
  0x12   : > { %v157_v10 = vrot.slane %v145_v9, %v156_v6  ;;  %v150_v11 = vcombine.high %v145_v9, %v145_v9 }
  0x14   : > { %v165_v13 = vcombine.high %v157_v10, %v157_v10  ;;  %v234_v14 = vand.u32 %v182_v12, %v157_v10  ;;  %v164_v15 = vrot.slane %v150_v11, %v156_v6 }
  0x16   : > { %284 = vrot.lane.b32.xlu1 %v165_v13, %s448_s15  ;;  %168 = vrot.lane.b32.xlu0 %v165_v13, %s449_s16  ;;  %v237_v16 = vand.u32 %v182_v12, %v165_v13 }
  0x18   : > { %239 = vmatprep.subr.bf16.mxu0 %v237_v16 }
  0x19   : > { %240 = vmatpush1.bf16.msra.mxu0 %v234_v14 }
  0x1a   : > { %286 = vrot.lane.b32.xlu1 %v164_v15, %s448_s15  ;;  %170 = vrot.lane.b32.xlu0 %v164_v15, %s449_s16 }
  0x1c   : > { %410 = vmatmul.mubr.msk.bf16.vlgmr.msra.gmra.mrb[0].mxu0 %vm175_vm2, %v146_v17 }
  0x1d   : > { %332 = vmatprep.mubr.bf16.mxu0 %v446_v4 }
  0x1e   : > { %282 = vrot.lane.b32.xlu1 %v157_v10, %s448_s15  ;;  %166 = vrot.lane.b32.xlu0 %v157_v10, %s449_s16 }
  0x88   : > { %v285_v18 = vpop.permute.xlu1 %284  ;;  %v169_v19 = vpop.permute.xlu0 %168 }
  0x8c   : > { %v287_v20 = vpop.permute.xlu1 %286  ;;  %v171_v21 = vpop.permute.xlu0 %170 }
  0x8d   : > { %v290_v22 = vsel %vm288_vm3, %v285_v18, %v287_v20  ;;  %v174_v23 = vsel %vm172_vm4, %v169_v19, %v171_v21 }
  0x8e   : > { %v298_v24 = vand.u32 %v290_v22, %v182_v12  ;;  %v187_v25 = vand.u32 %v182_v12, %v174_v23 }
  0x90   : > { %300 = vmatprep.subr.bf16.mxu0 %v298_v24  ;;  %v283_v26 = vpop.permute.xlu1 %282  ;;  %v167_v27 = vpop.permute.xlu0 %166  ;;  %189 = vmatprep.subr.bf16.mxu1 %v187_v25 }
  0x91   : > { %v289_v28 = vsel %vm288_vm3, %v283_v26, %v285_v18  ;;  %v173_v29 = vsel %vm172_vm4, %v167_v27, %v169_v19 }
  0x92   : > { %v295_v30 = vand.u32 %v289_v28, %v182_v12  ;;  %v184_v31 = vand.u32 %v182_v12, %v173_v29 }
  0x94   : > { %190 = vmatpush1.bf16.msra.mxu1 %v184_v31  ;;  %301 = vmatpush1.bf16.msra.mxu0 %v295_v30 }
  0x97   : > { %409 = vmatmul.mubr.msk.bf16.vlgmr.msra.gmra.mrb[0].mxu1 %vm175_vm2, %v408_v32  ;;  %412 = vmatmul.mubr.msk.bf16.vlgmr.msra.gmra.mrb[0].mxu0 %vm175_vm2, %v411_v33 }
 0x16a   : > { %v223_v34 = vpop.f32.mrb[0].mxu1  ;;  %v334_v35 = vpop.f32.mrb[0].mxu0 }
 0x16b   : > { %v416_v36 = vadd.f32 %v334_v35, %v223_v34  ;;  %v225_v37 = vpop.f32.mrb[1].mxu1  ;;  %v336_v38 = vpop.f32.mrb[1].mxu0 }
 0x16c   : > { %v417_v39 = vadd.f32 %v336_v38, %v225_v37  ;;  %v338_v40 = vpop.f32.mrb[2].mxu0  ;;  %v227_v41 = vpop.f32.mrb[2].mxu1 }
 0x16d   : > { %343 = vst [vmem:[%s143_s26] sm:$0xff] %v416_v36  ;;  %v339_v42 = vpop.f32.mrb[3].mxu0  ;;  %v228_v43 = vpop.f32.mrb[3].mxu1 }
 0x16e   : > { %344 = vst [vmem:[%s143_s26 + $0x8] sm:$0xff] %v417_v39 }
 0x16f PF: > { %s12_s9 = sadd.s32 1, %s443_s9  }
 0x170   : > { %p9_p4 = scmp.ge.s32.totalorder %s12_s9, 4  }
 0x172   :  { %11 = sbr.rel (!%p9_p4) target bundleno = 1 (0x1), region = 60 }

// kernel: forward.16
= control target key start
LH: loop header
LB: loop body
LE: loop exit
PB: predicated region body
PF: predicated region fallthrough
CT: control target
= control target key end

     0   :  { %s403_s15 = smov 0   ;;  %s429_s0 = inlined_call_operand.vmem [shape: bf16[2,1,64], index: 0, kind: input, shape index: {}]   ;;  %s430_s1 = inlined_call_operand.vmem [shape: bf16[1,8,1], index: 1, kind: input, shape index: {}]   ;;  %s431_s2 = inlined_call_operand.vmem [shape: f32[2,8,64], index: 2, kind: output, shape index: {0}]   ;;  %s432_s3 = inlined_call_operand.vmem [shape: f32[2,8,1], index: 3, kind: output, shape index: {1}]   ;;  %s433_s4 = inlined_call_operand.vmem [shape: f32[2,8,1], index: 4, kind: output, shape index: {2}]  }
   0x1 LB: > { %s349_s16 = sadd.s32 4294967295, %s375_s15   ;;  %p353_p0 = scmp.ge.s32.totalorder %s375_s15, 1  ;;  %s375_s15 = sphi %s403_s15, %s15_s15  }
   0x2   : > { %p165_p1 = scmp.lt.s32.totalorder %s375_s15, 3 }
   0x4   : > { %p166_p2 = pnand %p353_p0, %p165_p1 }
   0x5   : > { %v212_v0 = vld [vmem:[%s430_s1] sm:$0xf] (!%p166_p2)  ;;  %v377_v1 = vmov (!%p166_p2), 0   ;;  %p196_p3 = scmp.lt.s32.totalorder (!%p166_p2), %s349_s16, 1  ;;  %v220_v3 = vlaneseq (!%p166_p2)  ;;  %vm225_vm0 = vcmask (!%p166_p2), 523264   ;;  %vm230_vm1 = vcmask (!%p166_p2), 7168  }
   0x6   : > { %169 = sbr.rel (%p166_p2) target bundleno = 284 (0x11c), region = 28  ;;  %368 = vset.pattern.permute.xlu0 (!%p166_p2), %v377_v1  ;;  %v213_v2 = vunpack.c.l.bf16 (!%p166_p2), %v212_v0 }
   0x7   : > { %v221_v4 = vshrl.u32 (!%p166_p2), %v220_v3, 7 }
   0x8   : > { %217 = vperm.xlu0 (!%p166_p2), %368, %v213_v2  }
   0x9   : > { %v222_v6 = vsub.s32 (!%p166_p2), 0, %v221_v4 }
   0xd   : > { %s435_s16 = smov (!%p196_p3, %s349_s16), 1 }
   0xe   : > { %s198_s21 = scalar_lea.vmem %s429_s0, %s435_s16  ;;  %s354_s22 = sshll.u32 %s435_s16, 3 }
   0xf   : > { %v211_v5 = vld [vmem:[%s198_s21] sm:$0x1]  ;;  %s202_s25 = scalar_lea.vmem %s431_s2, %s354_s22  ;;  %s206_s28 = scalar_lea.vmem %s432_s3, %s354_s22 }
  0x10   : > { %v214_v7 = vunpack.c.l.bf16 %v211_v5  ;;  %s210_s5 = scalar_lea.vmem %s433_s4, %s354_s22 }
  0x12   : > { %v223_v8 = vrot.slane %v214_v7, %v222_v6 }
  0x87   : > { %v218_v9 = vpop.permute.xlu0 %217 }
  0x88   : > { %v224_v10 = vmul.f32 %v223_v8, %v218_v9 }
  0x8a   : > { %v227_v11 = vsel %vm225_vm0, %v224_v10, 0.0  ;;  %226 = vst.msk [vmem:[%s202_s25] sm:$0xff] %vm225_vm0, %v224_v10  ;;  %v232_v12 = vmul.f32 %v224_v10, %v224_v10 }
  0x8b   : > { %228 = vadd.xlane.f32.xlu0 %v227_v11 }
  0x8c   : > { %v233_v13 = vsel %vm225_vm0, %v232_v12, 0.0 }
  0x8d   : > { %234 = vadd.xlane.f32.xlu1 %v233_v13 }
 0x118   : > { %v229_v14 = vpop.xlane.xlu0 %228 }
 0x119   : > { %231 = vst.msk [vmem:[%s206_s28] sm:$0xff] %vm230_vm1, %v229_v14 }
 0x11a   : > { %v235_v15 = vpop.xlane.xlu1 %234 }
 0x11b   : > { %236 = vst.msk [vmem:[%s210_s5] sm:$0xff] %vm230_vm1, %v235_v15 }
 0x11c PF: > { %s15_s15 = sadd.s32 1, %s375_s15  }
 0x11d   : > { %p12_p4 = scmp.ge.s32.totalorder %s15_s15, 4  }
 0x11f   :  { %14 = sbr.rel (!%p12_p4) target bundleno = 1 (0x1), region = 82 }

// kernel: forward.17
= control target key start
LH: loop header
LB: loop body
LE: loop exit
PB: predicated region body
PF: predicated region fallthrough
CT: control target
= control target key end

     0   :  { %s526_s21 = smov 0   ;;  %s528_s22 = smov 0   ;;  %s574_s0 = inlined_call_operand.vmem [shape: f32[2,8,64], index: 0, kind: input, shape index: {}]   ;;  %s575_s1 = inlined_call_operand.vmem [shape: f32[2,8,64], index: 1, kind: input, shape index: {}]   ;;  %s576_s2 = inlined_call_operand.vmem [shape: f32[8,1], index: 2, kind: input, shape index: {}]   ;;  %s577_s3 = inlined_call_operand.vmem [shape: f32[8,1], index: 3, kind: input, shape index: {}]   ;;  %s578_s4 = inlined_call_operand.vmem [shape: f32[8,1], index: 4, kind: input, shape index: {}]   ;;  %s579_s5 = inlined_call_operand.vmem [shape: f32[8,1], index: 5, kind: input, shape index: {}]   ;;  %s580_s6 = inlined_call_operand.vmem [shape: f32[2,8,64], index: 6, kind: output, shape index: {}]  }
   0x1   :  { %s530_s23 = smov 0  }
   0x2 LB: > { %s28_s24 = sadd.s32 1, %s484_s22  ;;  %p433_p0 = scmp.ge.s32.totalorder %s488_s23, 1  ;;  %s488_s23 = sphi %s530_s23, %s16_s23   ;;  %s484_s22 = sphi %s528_s22, %s582_s22   ;;  %s480_s21 = sphi %s526_s21, %s581_s21  }
   0x3   : > { %p30_p1 = scmp.ge.s32.totalorder %s28_s24, 2  ;;  %p244_p2 = scmp.lt.s32.totalorder %s488_s23, 3 }
   0x5   : > { %s584_s24 = smov (%p30_p1, %s28_s24), 0  ;;  %p245_p3 = pnand %p433_p0, %p244_p2 }
   0x6   : > { %v307_v0 = vld [vmem:[%s576_s2] sm:$0xff] (!%p245_p3)  ;;  %v490_v2 = vmov (!%p245_p3), 0   ;;  %p285_p4 = scmp.lt.s32.totalorder (!%p245_p3), %s480_s21, 1  ;;  %vm338_vm0 = vcmask (!%p245_p3), 523264  }
   0x7   : > { %248 = sbr.rel (%p245_p3) target bundleno = 149 (0x95), region = 44  ;;  %v323_v1 = vld [vmem:[%s578_s4] sm:$0xff] (!%p245_p3)  ;;  %464 = vset.pattern.permute.xlu0 (!%p245_p3), %v490_v2  ;;  %465 = vset.pattern.permute.xlu1 (!%p245_p3), %v490_v2 }
   0x8   : > { %310 = vperm.xlu0 (!%p245_p3), %464, %v307_v0   ;;  %326 = vperm.xlu1 (!%p245_p3), %465, %v323_v1   ;;  %v314_v3 = vld [vmem:[%s577_s3] sm:$0xff] (!%p245_p3) }
   0x9   : > { %v331_v4 = vld [vmem:[%s579_s5] sm:$0xff] (!%p245_p3) }
   0xc   : > { %317 = vperm.xlu0 (!%p245_p3), %464, %v314_v3   ;;  %334 = vperm.xlu1 (!%p245_p3), %465, %v331_v4  }
   0xe   : > { %s586_s21 = smov (!%p285_p4, %s480_s21), 1 }
   0xf   : > { %s434_s9 = sshll.u32 %s586_s21, 3 }
  0x10   : > { %s291_s12 = scalar_lea.vmem %s574_s0, %s434_s9  ;;  %s298_s15 = scalar_lea.vmem %s575_s1, %s434_s9 }
  0x11   : > { %v306_v6 = vld [vmem:[%s291_s12] sm:$0xff]  ;;  %s305_s18 = scalar_lea.vmem %s580_s6, %s434_s9 }
  0x12   : > { %v322_v7 = vld [vmem:[%s298_s15] sm:$0xff] }
  0x87   : > { %v311_v5 = vpop.permute.xlu0 %310  ;;  %v327_v9 = vpop.permute.xlu1 %326 }
  0x88   : > { %v313_v8 = vmul.f32 %v311_v5, %v306_v6  ;;  %v329_v11 = vmul.f32 %v327_v9, %v322_v7 }
  0x8b   : > { %v318_v10 = vpop.permute.xlu0 %317  ;;  %v335_v15 = vpop.permute.xlu1 %334 }
  0x8c   : > { %v320_v12 = vadd.f32 %v318_v10, %v313_v8 }
  0x8e   : > { %v321_v13 = vmax.f32 %v320_v12, 0.0 }
  0x90   : > { %v330_v14 = vadd.f32 %v329_v11, %v321_v13 }
  0x92   : > { %v337_v16 = vadd.f32 %v335_v15, %v330_v14 }
  0x94   : > { %339 = vst.msk [vmem:[%s305_s18] sm:$0xff] %vm338_vm0, %v337_v16 }
  0x95 PF: > { %s16_s23 = sadd.s32 1, %s488_s23   ;;  %s581_s21 = smov %s484_s22 }
  0x96   : > { %p13_p5 = scmp.ge.s32.totalorder %s16_s23, 4   ;;  %s582_s22 = smov %s584_s24 }
  0x98   :  { %15 = sbr.rel (!%p13_p5) target bundleno = 2 (0x2), region = 77 }

// kernel: forward.18
= control target key start
LH: loop header
LB: loop body
LE: loop exit
PB: predicated region body
PF: predicated region fallthrough
CT: control target
= control target key end

     0   :  { %s500_s9 = smov 0   ;;  %s539_s0 = inlined_call_operand.vmem [shape: bf16[2,24,80], index: 0, kind: input, shape index: {}]   ;;  %s540_s1 = inlined_call_operand.vmem [shape: bf16[3,16,24], index: 1, kind: input, shape index: {}]   ;;  %s541_s2 = inlined_call_operand.vmem [shape: f32[2,16,64], index: 2, kind: output, shape index: {}]  }
   0x1 LB: > { %s393_s10 = sadd.s32 4294967295, %s479_s9   ;;  %p397_p0 = scmp.ge.s32.totalorder %s479_s9, 1  ;;  %s479_s9 = sphi %s500_s9, %s12_s9  }
   0x2   : > { %p112_p1 = scmp.lt.s32.totalorder %s479_s9, 3 }
   0x4   : > { %p113_p2 = pnand %p397_p0, %p112_p1 }
   0x5   : > { %p134_p3 = scmp.lt.s32.totalorder (!%p113_p2), %s393_s10, 1  ;;  %v481_v0 = vmov (!%p113_p2), 0.0   ;;  %vm482_vm0 = vmmov (!%p113_p2), 0   ;;  %vm175_vm1 = vcmask (!%p113_p2), 1043456   ;;  %s483_s15 = smov (!%p113_p2), 120   ;;  %v470_v4 = vld [vmem:[%s540_s1] sm:$0xff] (!%p113_p2)  }
   0x6   : > { %116 = sbr.rel (%p113_p2) target bundleno = 361 (0x169), region = 28  ;;  %433 = vmatprep.subr.bf16.mxu0 (!%p113_p2), %v481_v0  ;;  %437 = vmatprep.mubr.msk.bf16.mxu0 (!%p113_p2), %vm482_vm0, %v481_v0  ;;  %s484_s18 = smov (!%p113_p2), 112   ;;  %vm171_vm2 = vcmask (!%p113_p2), 195584   ;;  %v471_v9 = vld [vmem:[%s540_s1 + $0x8] sm:$0xff] (!%p113_p2)   ;;  %v472_v12 = vld [vmem:[%s540_s1 + $0x10] sm:$0xff] (!%p113_p2)   ;;  %vm335_vm3 = vcmask (!%p113_p2), 523264  }
   0x7   : > { %425 = vmatprep.subr.bf16.mxu1 (!%p113_p2), %v481_v0  ;;  %429 = vmatprep.mubr.msk.bf16.mxu1 (!%p113_p2), %vm482_vm0, %v481_v0 }
   0xd   : > { %s543_s10 = smov (!%p134_p3, %s393_s10), 1 }
   0xe   : > { %s455_s11 = smul.u32 12, %s543_s10  ;;  %s415_s23 = sshll.u32 %s543_s10, 4 }
   0xf   : > { %s143_s26 = scalar_lea.vmem %s541_s2, %s415_s23 }
  0x10   : > { %s138_s14 = scalar_lea.vmem %s539_s0, %s455_s11 }
  0x11   : > { %v468_v1 = vld [vmem:[%s138_s14] sm:$0xff]   ;;  %v469_v2 = vld [vmem:[%s138_s14 + $0x8] ss:$0 sps:$4 sm:$0xff]  }
  0x12   : > { %166 = vrot.lane.b32.xlu0 %v468_v1, %s483_s15  ;;  %434 = vmatpush3.bf16.msra.mxu0 %v468_v1  ;;  %v230_v3 = vsel %vm175_vm1, %v469_v2, 0 }
  0x13   : > { %168 = vrot.lane.b32.xlu1 %v469_v2, %s483_s15  ;;  %435 = vmatprep.subr.bf16.mxu0 %v481_v0 }
  0x16   : > { %281 = vrot.lane.b32.xlu0 %v468_v1, %s484_s18  ;;  %436 = vmatpush3.bf16.msra.mxu0 %v230_v3 }
  0x17   : > { %283 = vrot.lane.b32.xlu1 %v469_v2, %s484_s18  ;;  %441 = vmatprep.subr.bf16.mxu0 %v481_v0 }
  0x19   : > { %438 = vmatmul.mubr.msk.bf16.vlgmr.msra.gmra.mrb[0].mxu0 %vm171_vm2, %v470_v4 }
  0x1a   : > { %445 = vmatprep.mubr.msk.bf16.mxu0 %vm482_vm0, %v481_v0 }
  0x84   : > { %v167_v5 = vpop.permute.xlu0 %166 }
  0x85   : > { %426 = vmatpush3.bf16.msra.mxu1 %v167_v5  ;;  %v169_v6 = vpop.permute.xlu1 %168 }
  0x86   : > { %v177_v7 = vsel %vm175_vm1, %v169_v6, 0  ;;  %427 = vmatprep.subr.bf16.mxu1 %v481_v0 }
  0x88   : > { %v282_v8 = vpop.permute.xlu0 %281 }
  0x89   : > { %442 = vmatpush3.bf16.msra.mxu0 %v282_v8  ;;  %v284_v10 = vpop.permute.xlu1 %283  ;;  %428 = vmatpush3.bf16.msra.mxu1 %v177_v7 }
  0x8a   : > { %v290_v11 = vsel %vm175_vm1, %v284_v10, 0  ;;  %443 = vmatprep.subr.bf16.mxu0 %v481_v0 }
  0x8c   : > { %430 = vmatmul.mubr.msk.bf16.vlgmr.msra.gmra.mrb[0].mxu1 %vm171_vm2, %v471_v9 }
  0x8d   : > { %444 = vmatpush3.bf16.msra.mxu0 %v290_v11 }
  0x90   : > { %446 = vmatmul.mubr.msk.bf16.vlgmr.msra.gmra.mrb[0].mxu0 %vm171_vm2, %v472_v12 }
 0x15f   : > { %v213_v13 = vpop.f32.mrb[0].mxu1 }
 0x160   : > { %v431_v14 = vpop.f32.mrb[1].mxu1 }
 0x161   : > { %v216_v15 = vpop.f32.mrb[2].mxu1 }
 0x162   : > { %v432_v16 = vpop.f32.mrb[3].mxu1 }
 0x163   : > { %v326_v17 = vpop.f32.mrb[0].mxu0 }
 0x164   : > { %v449_v18 = vadd.f32 %v326_v17, %v213_v13  ;;  %v447_v19 = vpop.f32.mrb[1].mxu0 }
 0x165   : > { %v329_v20 = vpop.f32.mrb[2].mxu0 }
 0x166   : > { %336 = vst.msk [vmem:[%s143_s26] sm:$0xff] %vm335_vm3, %v449_v18  ;;  %v450_v21 = vadd.f32 %v329_v20, %v216_v15  ;;  %v448_v22 = vpop.f32.mrb[3].mxu0 }
 0x168   : > { %337 = vst.msk [vmem:[%s143_s26 + $0x8] sm:$0xff] %vm335_vm3, %v450_v21 }
 0x169 PF: > { %s12_s9 = sadd.s32 1, %s479_s9  }
 0x16a   : > { %p9_p4 = scmp.ge.s32.totalorder %s12_s9, 4  }
 0x16c   :  { %11 = sbr.rel (!%p9_p4) target bundleno = 1 (0x1), region = 60 }

// kernel: forward.20
= control target key start
LH: loop header
LB: loop body
LE: loop exit
PB: predicated region body
PF: predicated region fallthrough
CT: control target
= control target key end

     0   :  { %s585_s21 = smov 0   ;;  %s587_s22 = smov 0   ;;  %s649_s0 = inlined_call_operand.vmem [shape: f32[2,16,16], index: 0, kind: input, shape index: {}]   ;;  %s650_s1 = inlined_call_operand.vmem [shape: f32[2,16,16], index: 1, kind: input, shape index: {}]   ;;  %s651_s2 = inlined_call_operand.vmem [shape: f32[16,1], index: 2, kind: input, shape index: {}]   ;;  %s652_s3 = inlined_call_operand.vmem [shape: f32[16,1], index: 3, kind: input, shape index: {}]   ;;  %s653_s4 = inlined_call_operand.vmem [shape: f32[16,1], index: 4, kind: input, shape index: {}]   ;;  %s654_s5 = inlined_call_operand.vmem [shape: f32[16,1], index: 5, kind: input, shape index: {}]   ;;  %s655_s6 = inlined_call_operand.vmem [shape: f32[2,16,16], index: 6, kind: output, shape index: {}]  }
   0x1   :  { %s589_s23 = smov 0  }
   0x2 LB: > { %s28_s24 = sadd.s32 1, %s543_s22  ;;  %p486_p0 = scmp.ge.s32.totalorder %s547_s23, 1  ;;  %s547_s23 = sphi %s589_s23, %s16_s23   ;;  %s543_s22 = sphi %s587_s22, %s657_s22   ;;  %s539_s21 = sphi %s585_s21, %s656_s21  }
   0x3   : > { %p30_p1 = scmp.ge.s32.totalorder %s28_s24, 2  ;;  %p246_p2 = scmp.lt.s32.totalorder %s547_s23, 3 }
   0x5   : > { %s659_s24 = smov (%p30_p1, %s28_s24), 0  ;;  %p247_p3 = pnand %p486_p0, %p246_p2 }
   0x6   : > { %v330_v0 = vld [vmem:[%s652_s3] sm:$0xff] (!%p247_p3)  ;;  %v549_v2 = vmov (!%p247_p3), 0   ;;  %v331_v3 = vld [vmem:[%s652_s3 + $0x8] sm:$0xff] (!%p247_p3)  ;;  %p290_p4 = scmp.lt.s32.totalorder (!%p247_p3), %s539_s21, 1  ;;  %vm378_vm0 = vcmask (!%p247_p3), 130048  }
   0x7   : > { %250 = sbr.rel (%p247_p3) target bundleno = 151 (0x97), region = 44  ;;  %v316_v1 = vld [vmem:[%s651_s2] sm:$0xff] (!%p247_p3)  ;;  %524 = vset.pattern.permute.xlu1 (!%p247_p3), %v549_v2  ;;  %523 = vset.pattern.permute.xlu0 (!%p247_p3), %v549_v2  ;;  %v317_v4 = vld [vmem:[%s651_s2 + $0x8] sm:$0xff] (!%p247_p3) }
   0x8   : > { %334 = vperm.xlu1 (!%p247_p3), %524, %v330_v0   ;;  %320 = vperm.xlu0 (!%p247_p3), %523, %v316_v1   ;;  %v349_v5 = vld [vmem:[%s653_s4 + $0x8] sm:$0xff] (!%p247_p3)  ;;  %v348_v6 = vld [vmem:[%s653_s4] sm:$0xff] (!%p247_p3) }
   0x9   : > { %v365_v7 = vld [vmem:[%s654_s5 + $0x8] sm:$0xff] (!%p247_p3)  ;;  %v364_v8 = vld [vmem:[%s654_s5] sm:$0xff] (!%p247_p3) }
   0xc   : > { %339 = vperm.xlu1 (!%p247_p3), %524, %v331_v3   ;;  %325 = vperm.xlu0 (!%p247_p3), %523, %v317_v4  }
   0xe   : > { %s661_s21 = smov (!%p290_p4, %s539_s21), 1 }
   0xf   : > { %s495_s17 = sshll.u32 %s661_s21, 4 }
  0x10   : > { %357 = vperm.xlu1 %524, %v349_v5   ;;  %352 = vperm.xlu0 %523, %v348_v6   ;;  %s297_s20 = scalar_lea.vmem %s649_s0, %s495_s17  ;;  %s305_s27 = scalar_lea.vmem %s650_s1, %s495_s17 }
  0x11   : > { %v314_v9 = vld [vmem:[%s297_s20] sm:$0xff]  ;;  %v315_v13 = vld [vmem:[%s297_s20 + $0x8] sm:$0xff]  ;;  %s313_s29 = scalar_lea.vmem %s655_s6, %s495_s17 }
  0x12   : > { %v347_v18 = vld [vmem:[%s305_s27 + $0x8] sm:$0xff]  ;;  %v346_v19 = vld [vmem:[%s305_s27] sm:$0xff] }
  0x14   : > { %373 = vperm.xlu1 %524, %v365_v7   ;;  %368 = vperm.xlu0 %523, %v364_v8  }
  0x87   : > { %v335_v10 = vpop.permute.xlu1 %334  ;;  %v321_v11 = vpop.permute.xlu0 %320 }
  0x88   : > { %v328_v12 = vmul.f32 %v321_v11, %v314_v9 }
  0x8a   : > { %v342_v16 = vadd.f32 %v335_v10, %v328_v12 }
  0x8b   : > { %v340_v14 = vpop.permute.xlu1 %339  ;;  %v326_v15 = vpop.permute.xlu0 %325 }
  0x8c   : > { %v329_v17 = vmul.f32 %v326_v15, %v315_v13  ;;  %v344_v23 = vmax.f32 %v342_v16, 0.0 }
  0x8e   : > { %v343_v20 = vadd.f32 %v340_v14, %v329_v17 }
  0x8f   : > { %v358_v21 = vpop.permute.xlu1 %357  ;;  %v353_v22 = vpop.permute.xlu0 %352 }
  0x90   : > { %v345_v24 = vmax.f32 %v343_v20, 0.0  ;;  %v361_v25 = vmul.f32 %v358_v21, %v347_v18  ;;  %v360_v26 = vmul.f32 %v353_v22, %v346_v19 }
  0x92   : > { %v363_v27 = vadd.f32 %v361_v25, %v345_v24  ;;  %v362_v28 = vadd.f32 %v360_v26, %v344_v23 }
  0x93   : > { %v374_v29 = vpop.permute.xlu1 %373  ;;  %v369_v30 = vpop.permute.xlu0 %368 }
  0x94   : > { %v377_v31 = vadd.f32 %v374_v29, %v363_v27  ;;  %v376_v32 = vadd.f32 %v369_v30, %v362_v28 }
  0x96   : > { %380 = vst.msk [vmem:[%s313_s29 + $0x8] sm:$0xff] %vm378_vm0, %v377_v31  ;;  %379 = vst.msk [vmem:[%s313_s29] sm:$0xff] %vm378_vm0, %v376_v32 }
  0x97 PF: > { %s16_s23 = sadd.s32 1, %s547_s23   ;;  %s656_s21 = smov %s543_s22 }
  0x98   : > { %p13_p5 = scmp.ge.s32.totalorder %s16_s23, 4   ;;  %s657_s22 = smov %s659_s24 }
  0x9a   :  { %15 = sbr.rel (!%p13_p5) target bundleno = 2 (0x2), region = 77 }

// kernel: forward.19
= control target key start
LH: loop header
LB: loop body
LE: loop exit
PB: predicated region body
PF: predicated region fallthrough
CT: control target
= control target key end

     0   :  { %s494_s15 = smov 0   ;;  %s520_s0 = inlined_call_operand.vmem [shape: bf16[2,8,16], index: 0, kind: input, shape index: {}]   ;;  %s521_s1 = inlined_call_operand.vmem [shape: bf16[1,16,8], index: 1, kind: input, shape index: {}]   ;;  %s522_s2 = inlined_call_operand.vmem [shape: f32[2,16,16], index: 2, kind: output, shape index: {0}]   ;;  %s523_s3 = inlined_call_operand.vmem [shape: f32[2,16,1], index: 3, kind: output, shape index: {1}]   ;;  %s524_s4 = inlined_call_operand.vmem [shape: f32[2,16,1], index: 4, kind: output, shape index: {2}]  }
   0x1 LB: > { %s421_s16 = sadd.s32 4294967295, %s465_s15   ;;  %p425_p0 = scmp.ge.s32.totalorder %s465_s15, 1  ;;  %s465_s15 = sphi %s494_s15, %s15_s15  }
   0x2   : > { %p166_p1 = scmp.lt.s32.totalorder %s465_s15, 3 }
   0x4   : > { %p167_p2 = pnand %p425_p0, %p166_p1 }
   0x5   : > { %p201_p3 = scmp.lt.s32.totalorder (!%p167_p2), %s421_s16, 1  ;;  %v467_v0 = vmov (!%p167_p2), 0.0   ;;  %vm468_vm0 = vmmov (!%p167_p2), 0   ;;  %vm233_vm1 = vcmask (!%p167_p2), 1043456   ;;  %v458_v3 = vld [vmem:[%s521_s1] sm:$0xff] (!%p167_p2)   ;;  %vm229_vm2 = vcmask (!%p167_p2), 64512  }
   0x6   : > { %170 = sbr.rel (%p167_p2) target bundleno = 383 (0x17f), region = 28  ;;  %442 = vmatprep.subr.bf16.mxu0 (!%p167_p2), %v467_v0  ;;  %444 = vmatprep.mubr.msk.bf16.mxu0 (!%p167_p2), %vm468_vm0, %v467_v0  ;;  %vm278_vm3 = vcmask (!%p167_p2), 130048   ;;  %vm287_vm4 = vcmask (!%p167_p2), 7168  }
   0xd   : > { %s526_s16 = smov (!%p201_p3, %s421_s16), 1 }
   0xe   : > { %s426_s17 = sshll.u32 %s526_s16, 2  ;;  %s437_s23 = sshll.u32 %s526_s16, 4 }
   0xf   : > { %s204_s20 = scalar_lea.vmem %s520_s0, %s426_s17  ;;  %s209_s26 = scalar_lea.vmem %s522_s2, %s437_s23 }
  0x10   : > { %v221_v1 = vld [vmem:[%s204_s20] sm:$0xf]  ;;  %s214_s29 = scalar_lea.vmem %s523_s3, %s437_s23  ;;  %s219_s6 = scalar_lea.vmem %s524_s4, %s437_s23 }
  0x11   : > { %v235_v2 = vsel %vm233_vm1, %v221_v1, 0 }
  0x12   : > { %443 = vmatpush3.bf16.msra.mxu0 %v235_v2 }
  0x15   : > { %445 = vmatmul.mubr.msk.bf16.vlgmr.msra.gmra.mrb[0].mxu0 %vm229_vm2, %v458_v3 }
  0xe8   : > { %v271_v4 = vpop.f32.mrb[0].mxu0 }
  0xe9   : > { %279 = vst.msk [vmem:[%s209_s26] sm:$0xff] %vm278_vm3, %v271_v4  ;;  %v446_v5 = vpop.f32.mrb[1].mxu0  ;;  %v281_v6 = vsel %vm278_vm3, %v271_v4, 0.0  ;;  %v290_v7 = vmul.f32 %v271_v4, %v271_v4 }
  0xea   : > { %282 = vadd.xlane.f32.xlu0 %v281_v6  ;;  %v274_v8 = vpop.f32.mrb[2].mxu0 }
  0xeb   : > { %280 = vst.msk [vmem:[%s209_s26 + $0x8] sm:$0xff] %vm278_vm3, %v274_v8  ;;  %v447_v9 = vpop.f32.mrb[3].mxu0  ;;  %v292_v10 = vsel %vm278_vm3, %v290_v7, 0.0  ;;  %v291_v11 = vmul.f32 %v274_v8, %v274_v8  ;;  %v284_v12 = vsel %vm278_vm3, %v274_v8, 0.0 }
  0xec   : > { %293 = vadd.xlane.f32.xlu1 %v292_v10 }
  0xed   : > { %v295_v13 = vsel %vm278_vm3, %v291_v11, 0.0 }
  0xee   : > { %285 = vadd.xlane.f32.xlu0 %v284_v12 }
  0xf0   : > { %296 = vadd.xlane.f32.xlu1 %v295_v13 }
 0x177   : > { %v283_v14 = vpop.xlane.xlu0 %282 }
 0x178   : > { %288 = vst.msk [vmem:[%s214_s29] sm:$0xff] %vm287_vm4, %v283_v14 }
 0x179   : > { %v294_v15 = vpop.xlane.xlu1 %293 }
 0x17a   : > { %298 = vst.msk [vmem:[%s219_s6] sm:$0xff] %vm287_vm4, %v294_v15 }
 0x17b   : > { %v286_v16 = vpop.xlane.xlu0 %285 }
 0x17c   : > { %289 = vst.msk [vmem:[%s214_s29 + $0x8] sm:$0xff] %vm287_vm4, %v286_v16 }
 0x17d   : > { %v297_v17 = vpop.xlane.xlu1 %296 }
 0x17e   : > { %299 = vst.msk [vmem:[%s219_s6 + $0x8] sm:$0xff] %vm287_vm4, %v297_v17 }
 0x17f PF: > { %s15_s15 = sadd.s32 1, %s465_s15  }
 0x180   : > { %p12_p4 = scmp.ge.s32.totalorder %s15_s15, 4  }
 0x182   :  { %14 = sbr.rel (!%p12_p4) target bundleno = 1 (0x1), region = 82 }

// kernel: forward.21
= control target key start
LH: loop header
LB: loop body
LE: loop exit
PB: predicated region body
PF: predicated region fallthrough
CT: control target
= control target key end

     0   :  { %s701_s15 = smov 0   ;;  %s749_s0 = inlined_call_operand.vmem [shape: bf16[2,48,24], index: 0, kind: input, shape index: {}]   ;;  %s750_s1 = inlined_call_operand.vmem [shape: bf16[3,16,48], index: 1, kind: input, shape index: {}]   ;;  %s751_s2 = inlined_call_operand.vmem [shape: f32[2,16,16], index: 2, kind: output, shape index: {0}]   ;;  %s752_s3 = inlined_call_operand.vmem [shape: f32[2,16,1], index: 3, kind: output, shape index: {1}]   ;;  %s753_s4 = inlined_call_operand.vmem [shape: f32[2,16,1], index: 4, kind: output, shape index: {2}]  }
   0x1 LB: > { %s567_s16 = sadd.s32 4294967295, %s670_s15   ;;  %p571_p0 = scmp.ge.s32.totalorder %s670_s15, 1  ;;  %s670_s15 = sphi %s701_s15, %s15_s15  }
   0x2   : > { %p167_p1 = scmp.lt.s32.totalorder %s670_s15, 3 }
   0x4   : > { %p168_p2 = pnand %p571_p0, %p167_p1 }
   0x5   : > { %p203_p3 = scmp.lt.s32.totalorder (!%p168_p2), %s567_s16, 1  ;;  %v672_v0 = vmov (!%p168_p2), 0.0   ;;  %vm673_vm0 = vmmov (!%p168_p2), 0   ;;  %s674_s21 = smov (!%p168_p2), 124   ;;  %v661_v4 = vld [vmem:[%s750_s1] sm:$0xff] (!%p168_p2)   ;;  %vm264_vm1 = vcmask (!%p168_p2), 392192  }
   0x6   : > { %171 = sbr.rel (%p168_p2) target bundleno = 514 (0x202), region = 28  ;;  %619 = vmatprep.subr.bf16.mxu0 (!%p168_p2), %v672_v0  ;;  %609 = vmatprep.subr.bf16.mxu1 (!%p168_p2), %v672_v0  ;;  %s675_s22 = smov (!%p168_p2), 120   ;;  %v662_v10 = vld [vmem:[%s750_s1 + $0x8] sm:$0xff] (!%p168_p2)   ;;  %v663_v12 = vld [vmem:[%s750_s1 + $0x10] sm:$0xff] (!%p168_p2)   ;;  %vm424_vm2 = vcmask (!%p168_p2), 130048   ;;  %vm433_vm3 = vcmask (!%p168_p2), 7168  }
   0x7   : > { %625 = vmatprep.mubr.msk.bf16.mxu0 (!%p168_p2), %vm673_vm0, %v672_v0  ;;  %615 = vmatprep.mubr.msk.bf16.mxu1 (!%p168_p2), %vm673_vm0, %v672_v0 }
   0xd   : > { %s755_s16 = smov (!%p203_p3, %s567_s16), 1 }
   0xe   : > { %s645_s17 = smul.u32 24, %s755_s16  ;;  %s594_s29 = sshll.u32 %s755_s16, 4 }
   0xf   : > { %s212_s6 = scalar_lea.vmem %s751_s2, %s594_s29  ;;  %s217_s9 = scalar_lea.vmem %s752_s3, %s594_s29 }
  0x10   : > { %s207_s20 = scalar_lea.vmem %s749_s0, %s645_s17  ;;  %s222_s12 = scalar_lea.vmem %s753_s4, %s594_s29 }
  0x11   : > { %v658_v1 = vld [vmem:[%s207_s20] sm:$0xff]   ;;  %v659_v2 = vld [vmem:[%s207_s20 + $0x8] sm:$0xff]   ;;  %v660_v3 = vld [vmem:[%s207_s20 + $0x10] sm:$0xff]  }
  0x12   : > { %255 = vrot.lane.b32.xlu0 %v658_v1, %s674_s21  ;;  %620 = vmatpush3.bf16.msra.mxu0 %v658_v1 }
  0x13   : > { %257 = vrot.lane.b32.xlu1 %v659_v2, %s674_s21  ;;  %621 = vmatprep.subr.bf16.mxu0 %v672_v0 }
  0x16   : > { %369 = vrot.lane.b32.xlu0 %v658_v1, %s675_s22  ;;  %622 = vmatpush3.bf16.msra.mxu0 %v659_v2 }
  0x17   : > { %371 = vrot.lane.b32.xlu1 %v659_v2, %s675_s22  ;;  %623 = vmatprep.subr.bf16.mxu0 %v672_v0 }
  0x1a   : > { %259 = vrot.lane.b32.xlu0 %v660_v3, %s674_s21  ;;  %624 = vmatpush3.bf16.msra.mxu0 %v660_v3 }
  0x1b   : > { %373 = vrot.lane.b32.xlu1 %v660_v3, %s675_s22  ;;  %629 = vmatprep.subr.bf16.mxu0 %v672_v0 }
  0x1d   : > { %626 = vmatmul.mubr.msk.bf16.vlgmr.msra.gmra.mrb[0].mxu0 %vm264_vm1, %v661_v4 }
  0x1e   : > { %635 = vmatprep.mubr.msk.bf16.mxu0 %vm673_vm0, %v672_v0 }
  0x84   : > { %v256_v5 = vpop.permute.xlu0 %255 }
  0x85   : > { %610 = vmatpush3.bf16.msra.mxu1 %v256_v5  ;;  %v258_v6 = vpop.permute.xlu1 %257 }
  0x86   : > { %611 = vmatprep.subr.bf16.mxu1 %v672_v0 }
  0x88   : > { %v370_v7 = vpop.permute.xlu0 %369 }
  0x89   : > { %612 = vmatpush3.bf16.msra.mxu1 %v258_v6  ;;  %630 = vmatpush3.bf16.msra.mxu0 %v370_v7  ;;  %v372_v8 = vpop.permute.xlu1 %371 }
  0x8a   : > { %631 = vmatprep.subr.bf16.mxu0 %v672_v0  ;;  %613 = vmatprep.subr.bf16.mxu1 %v672_v0 }
  0x8c   : > { %v260_v9 = vpop.permute.xlu0 %259 }
  0x8d   : > { %632 = vmatpush3.bf16.msra.mxu0 %v372_v8  ;;  %614 = vmatpush3.bf16.msra.mxu1 %v260_v9  ;;  %v374_v11 = vpop.permute.xlu1 %373 }
  0x8e   : > { %633 = vmatprep.subr.bf16.mxu0 %v672_v0 }
  0x90   : > { %616 = vmatmul.mubr.msk.bf16.vlgmr.msra.gmra.mrb[0].mxu1 %vm264_vm1, %v662_v10 }
  0x91   : > { %634 = vmatpush3.bf16.msra.mxu0 %v374_v11 }
  0x94   : > { %636 = vmatmul.mubr.msk.bf16.vlgmr.msra.gmra.mrb[0].mxu0 %vm264_vm1, %v663_v12 }
 0x163   : > { %v302_v13 = vpop.f32.mrb[0].mxu1 }
 0x164   : > { %v617_v14 = vpop.f32.mrb[1].mxu1 }
 0x165   : > { %v305_v15 = vpop.f32.mrb[2].mxu1 }
 0x166   : > { %v618_v16 = vpop.f32.mrb[3].mxu1 }
 0x167   : > { %v415_v17 = vpop.f32.mrb[0].mxu0 }
 0x168   : > { %v639_v18 = vadd.f32 %v415_v17, %v302_v13  ;;  %v637_v19 = vpop.f32.mrb[1].mxu0 }
 0x169   : > { %v418_v20 = vpop.f32.mrb[2].mxu0 }
 0x16a   : > { %425 = vst.msk [vmem:[%s212_s6] sm:$0xff] %vm424_vm2, %v639_v18  ;;  %v640_v21 = vadd.f32 %v418_v20, %v305_v15  ;;  %v638_v22 = vpop.f32.mrb[3].mxu0  ;;  %v427_v23 = vsel %vm424_vm2, %v639_v18, 0.0  ;;  %v436_v24 = vmul.f32 %v639_v18, %v639_v18 }
 0x16b   : > { %428 = vadd.xlane.f32.xlu0 %v427_v23 }
 0x16c   : > { %426 = vst.msk [vmem:[%s212_s6 + $0x8] sm:$0xff] %vm424_vm2, %v640_v21  ;;  %v430_v25 = vsel %vm424_vm2, %v640_v21, 0.0  ;;  %v438_v26 = vsel %vm424_vm2, %v436_v24, 0.0  ;;  %v437_v27 = vmul.f32 %v640_v21, %v640_v21 }
 0x16d   : > { %431 = vadd.xlane.f32.xlu1 %v430_v25 }
 0x16e   : > { %v441_v28 = vsel %vm424_vm2, %v437_v27, 0.0 }
 0x16f   : > { %439 = vadd.xlane.f32.xlu0 %v438_v26 }
 0x173   : > { %442 = vadd.xlane.f32.xlu0 %v441_v28 }
 0x1f8   : > { %v429_v29 = vpop.xlane.xlu0 %428 }
 0x1f9   : > { %434 = vst.msk [vmem:[%s217_s9] sm:$0xff] %vm433_vm3, %v429_v29 }
 0x1fa   : > { %v432_v30 = vpop.xlane.xlu1 %431 }
 0x1fb   : > { %435 = vst.msk [vmem:[%s217_s9 + $0x8] sm:$0xff] %vm433_vm3, %v432_v30 }
 0x1fc   : > { %v440_v31 = vpop.xlane.xlu0 %439 }
 0x1fd   : > { %444 = vst.msk [vmem:[%s222_s12] sm:$0xff] %vm433_vm3, %v440_v31 }
 0x200   : > { %v443_v32 = vpop.xlane.xlu0 %442 }
 0x201   : > { %445 = vst.msk [vmem:[%s222_s12 + $0x8] sm:$0xff] %vm433_vm3, %v443_v32 }
 0x202 PF: > { %s15_s15 = sadd.s32 1, %s670_s15  }
 0x203   : > { %p12_p4 = scmp.ge.s32.totalorder %s15_s15, 4  }
 0x205   :  { %14 = sbr.rel (!%p12_p4) target bundleno = 1 (0x1), region = 84 }

// kernel: forward.24
= control target key start
LH: loop header
LB: loop body
LE: loop exit
PB: predicated region body
PF: predicated region fallthrough
CT: control target
= control target key end

     0   :  { %s480_s15 = smov 0   ;;  %s506_s0 = inlined_call_operand.vmem [shape: bf16[2,32,16], index: 0, kind: input, shape index: {}]   ;;  %s507_s1 = inlined_call_operand.vmem [shape: bf16[1,8,32], index: 1, kind: input, shape index: {}]   ;;  %s508_s2 = inlined_call_operand.vmem [shape: f32[2,8,16], index: 2, kind: output, shape index: {0}]   ;;  %s509_s3 = inlined_call_operand.vmem [shape: f32[2,8,1], index: 3, kind: output, shape index: {1}]   ;;  %s510_s4 = inlined_call_operand.vmem [shape: f32[2,8,1], index: 4, kind: output, shape index: {2}]  }
   0x1 LB: > { %s406_s16 = sadd.s32 4294967295, %s451_s15   ;;  %p410_p0 = scmp.ge.s32.totalorder %s451_s15, 1  ;;  %s451_s15 = sphi %s480_s15, %s15_s15  }
   0x2   : > { %p167_p1 = scmp.lt.s32.totalorder %s451_s15, 3 }
   0x4   : > { %p168_p2 = pnand %p410_p0, %p167_p1 }
   0x5   : > { %p200_p3 = scmp.lt.s32.totalorder (!%p168_p2), %s406_s16, 1  ;;  %v453_v0 = vmov (!%p168_p2), 0.0   ;;  %vm454_vm0 = vmmov (!%p168_p2), 0   ;;  %v222_v3 = vld [vmem:[%s507_s1] sm:$0xf] (!%p168_p2)  ;;  %vm235_vm1 = vcmask (!%p168_p2), 261120  }
   0x6   : > { %171 = sbr.rel (%p168_p2) target bundleno = 384 (0x180), region = 28  ;;  %425 = vmatprep.subr.bf16.mxu0 (!%p168_p2), %v453_v0  ;;  %429 = vmatprep.mubr.msk.bf16.mxu0 (!%p168_p2), %vm454_vm0, %v453_v0  ;;  %vm279_vm2 = vcmask (!%p168_p2), 130048   ;;  %vm284_vm3 = vcmask (!%p168_p2), 7168  }
   0xd   : > { %s512_s16 = smov (!%p200_p3, %s406_s16), 1 }
   0xe   : > { %s421_s17 = sshll.u32 %s512_s16, 4  ;;  %s413_s23 = sshll.u32 %s512_s16, 3 }
   0xf   : > { %s204_s20 = scalar_lea.vmem %s506_s0, %s421_s17  ;;  %s208_s26 = scalar_lea.vmem %s508_s2, %s413_s23 }
  0x10   : > { %v443_v1 = vld [vmem:[%s204_s20] sm:$0xff]   ;;  %v444_v2 = vld [vmem:[%s204_s20 + $0x8] sm:$0xff]   ;;  %s212_s29 = scalar_lea.vmem %s509_s3, %s413_s23  ;;  %s216_s6 = scalar_lea.vmem %s510_s4, %s413_s23 }
  0x11   : > { %426 = vmatpush3.bf16.msra.mxu0 %v443_v1 }
  0x12   : > { %427 = vmatprep.subr.bf16.mxu0 %v453_v0 }
  0x15   : > { %428 = vmatpush3.bf16.msra.mxu0 %v444_v2 }
  0x18   : > { %430 = vmatmul.mubr.msk.bf16.vlgmr.msra.gmra.mrb[0].mxu0 %vm235_vm1, %v222_v3 }
  0xeb   : > { %v273_v4 = vpop.f32.mrb[0].mxu0 }
  0xec   : > { %v431_v5 = vpop.f32.mrb[1].mxu0  ;;  %v281_v6 = vsel %vm279_vm2, %v273_v4, 0.0  ;;  %280 = vst.msk [vmem:[%s208_s26] sm:$0xff] %vm279_vm2, %v273_v4  ;;  %v286_v7 = vmul.f32 %v273_v4, %v273_v4 }
  0xed   : > { %282 = vadd.xlane.f32.xlu0 %v281_v6  ;;  %v276_v8 = vpop.f32.mrb[2].mxu0 }
  0xee   : > { %v432_v9 = vpop.f32.mrb[3].mxu0  ;;  %v287_v10 = vsel %vm279_vm2, %v286_v7, 0.0 }
  0xf1   : > { %288 = vadd.xlane.f32.xlu0 %v287_v10 }
 0x17a   : > { %v283_v11 = vpop.xlane.xlu0 %282 }
 0x17b   : > { %285 = vst.msk [vmem:[%s212_s29] sm:$0xff] %vm284_vm3, %v283_v11 }
 0x17e   : > { %v289_v12 = vpop.xlane.xlu0 %288 }
 0x17f   : > { %290 = vst.msk [vmem:[%s216_s6] sm:$0xff] %vm284_vm3, %v289_v12 }
 0x180 PF: > { %s15_s15 = sadd.s32 1, %s451_s15  }
 0x181   : > { %p12_p4 = scmp.ge.s32.totalorder %s15_s15, 4  }
 0x183   :  { %14 = sbr.rel (!%p12_p4) target bundleno = 1 (0x1), region = 82 }

// kernel: forward.25
= control target key start
LH: loop header
LB: loop body
LE: loop exit
PB: predicated region body
PF: predicated region fallthrough
CT: control target
= control target key end

     0   :  { %s526_s21 = smov 0   ;;  %s528_s22 = smov 0   ;;  %s574_s0 = inlined_call_operand.vmem [shape: f32[2,8,16], index: 0, kind: input, shape index: {}]   ;;  %s575_s1 = inlined_call_operand.vmem [shape: f32[2,8,16], index: 1, kind: input, shape index: {}]   ;;  %s576_s2 = inlined_call_operand.vmem [shape: f32[8,1], index: 2, kind: input, shape index: {}]   ;;  %s577_s3 = inlined_call_operand.vmem [shape: f32[8,1], index: 3, kind: input, shape index: {}]   ;;  %s578_s4 = inlined_call_operand.vmem [shape: f32[8,1], index: 4, kind: input, shape index: {}]   ;;  %s579_s5 = inlined_call_operand.vmem [shape: f32[8,1], index: 5, kind: input, shape index: {}]   ;;  %s580_s6 = inlined_call_operand.vmem [shape: f32[2,8,16], index: 6, kind: output, shape index: {}]  }
   0x1   :  { %s530_s23 = smov 0  }
   0x2 LB: > { %s28_s24 = sadd.s32 1, %s484_s22  ;;  %p433_p0 = scmp.ge.s32.totalorder %s488_s23, 1  ;;  %s488_s23 = sphi %s530_s23, %s16_s23   ;;  %s484_s22 = sphi %s528_s22, %s582_s22   ;;  %s480_s21 = sphi %s526_s21, %s581_s21  }
   0x3   : > { %p30_p1 = scmp.ge.s32.totalorder %s28_s24, 2  ;;  %p244_p2 = scmp.lt.s32.totalorder %s488_s23, 3 }
   0x5   : > { %s584_s24 = smov (%p30_p1, %s28_s24), 0  ;;  %p245_p3 = pnand %p433_p0, %p244_p2 }
   0x6   : > { %v307_v0 = vld [vmem:[%s576_s2] sm:$0xff] (!%p245_p3)  ;;  %v490_v2 = vmov (!%p245_p3), 0   ;;  %p285_p4 = scmp.lt.s32.totalorder (!%p245_p3), %s480_s21, 1  ;;  %vm338_vm0 = vcmask (!%p245_p3), 130048  }
   0x7   : > { %248 = sbr.rel (%p245_p3) target bundleno = 149 (0x95), region = 44  ;;  %v323_v1 = vld [vmem:[%s578_s4] sm:$0xff] (!%p245_p3)  ;;  %464 = vset.pattern.permute.xlu0 (!%p245_p3), %v490_v2  ;;  %465 = vset.pattern.permute.xlu1 (!%p245_p3), %v490_v2 }
   0x8   : > { %310 = vperm.xlu0 (!%p245_p3), %464, %v307_v0   ;;  %326 = vperm.xlu1 (!%p245_p3), %465, %v323_v1   ;;  %v314_v3 = vld [vmem:[%s577_s3] sm:$0xff] (!%p245_p3) }
   0x9   : > { %v331_v4 = vld [vmem:[%s579_s5] sm:$0xff] (!%p245_p3) }
   0xc   : > { %317 = vperm.xlu0 (!%p245_p3), %464, %v314_v3   ;;  %334 = vperm.xlu1 (!%p245_p3), %465, %v331_v4  }
   0xe   : > { %s586_s21 = smov (!%p285_p4, %s480_s21), 1 }
   0xf   : > { %s434_s9 = sshll.u32 %s586_s21, 3 }
  0x10   : > { %s291_s12 = scalar_lea.vmem %s574_s0, %s434_s9  ;;  %s298_s15 = scalar_lea.vmem %s575_s1, %s434_s9 }
  0x11   : > { %v306_v6 = vld [vmem:[%s291_s12] sm:$0xff]  ;;  %s305_s18 = scalar_lea.vmem %s580_s6, %s434_s9 }
  0x12   : > { %v322_v7 = vld [vmem:[%s298_s15] sm:$0xff] }
  0x87   : > { %v311_v5 = vpop.permute.xlu0 %310  ;;  %v327_v9 = vpop.permute.xlu1 %326 }
  0x88   : > { %v313_v8 = vmul.f32 %v311_v5, %v306_v6  ;;  %v329_v11 = vmul.f32 %v327_v9, %v322_v7 }
  0x8b   : > { %v318_v10 = vpop.permute.xlu0 %317  ;;  %v335_v15 = vpop.permute.xlu1 %334 }
  0x8c   : > { %v320_v12 = vadd.f32 %v318_v10, %v313_v8 }
  0x8e   : > { %v321_v13 = vmax.f32 %v320_v12, 0.0 }
  0x90   : > { %v330_v14 = vadd.f32 %v329_v11, %v321_v13 }
  0x92   : > { %v337_v16 = vadd.f32 %v335_v15, %v330_v14 }
  0x94   : > { %339 = vst.msk [vmem:[%s305_s18] sm:$0xff] %vm338_vm0, %v337_v16 }
  0x95 PF: > { %s16_s23 = sadd.s32 1, %s488_s23   ;;  %s581_s21 = smov %s484_s22 }
  0x96   : > { %p13_p5 = scmp.ge.s32.totalorder %s16_s23, 4   ;;  %s582_s22 = smov %s584_s24 }
  0x98   :  { %15 = sbr.rel (!%p13_p5) target bundleno = 2 (0x2), region = 77 }

// kernel: forward.23
= control target key start
LH: loop header
LB: loop body
LE: loop exit
PB: predicated region body
PF: predicated region fallthrough
CT: control target
= control target key end

     0   :  { %s717_s15 = smov 0   ;;  %s780_s0 = inlined_call_operand.vmem [shape: bf16[2,96,24], index: 0, kind: input, shape index: {}]   ;;  %s781_s1 = inlined_call_operand.vmem [shape: bf16[3,8,96], index: 1, kind: input, shape index: {}]   ;;  %s782_s2 = inlined_call_operand.vmem [shape: f32[2,8,16], index: 2, kind: output, shape index: {0}]   ;;  %s783_s3 = inlined_call_operand.vmem [shape: f32[2,8,1], index: 3, kind: output, shape index: {1}]   ;;  %s784_s4 = inlined_call_operand.vmem [shape: f32[2,8,1], index: 4, kind: output, shape index: {2}]  }
   0x1 LB: > { %s565_s16 = sadd.s32 4294967295, %s686_s15   ;;  %p569_p0 = scmp.ge.s32.totalorder %s686_s15, 1  ;;  %s686_s15 = sphi %s717_s15, %s15_s15  }
   0x2   : > { %p167_p1 = scmp.lt.s32.totalorder %s686_s15, 3 }
   0x4   : > { %p168_p2 = pnand %p569_p0, %p167_p1 }
   0x5   : > { %p200_p3 = scmp.lt.s32.totalorder (!%p168_p2), %s565_s16, 1  ;;  %v688_v0 = vmov (!%p168_p2), 0.0   ;;  %vm689_vm0 = vmmov (!%p168_p2), 0   ;;  %s690_s21 = smov (!%p168_p2), 124   ;;  %v230_v7 = vld [vmem:[%s781_s1] sm:$0xf] (!%p168_p2) }
   0x6   : > { %171 = sbr.rel (%p168_p2) target bundleno = 520 (0x208), region = 28  ;;  %624 = vmatprep.subr.bf16.mxu0 (!%p168_p2), %v688_v0  ;;  %608 = vmatprep.subr.bf16.mxu1 (!%p168_p2), %v688_v0  ;;  %s691_s22 = smov (!%p168_p2), 120   ;;  %vm281_vm1 = vcmask (!%p168_p2), 785408   ;;  %v574_v19 = vld [vmem:[%s781_s1 + $0x4] sm:$0xf] (!%p168_p2)  ;;  %vm438_vm2 = vcmask (!%p168_p2), 130048  }
   0x7   : > { %636 = vmatprep.mubr.msk.bf16.mxu0 (!%p168_p2), %vm689_vm0, %v688_v0  ;;  %620 = vmatprep.mubr.msk.bf16.mxu1 (!%p168_p2), %vm689_vm0, %v688_v0  ;;  %v583_v21 = vld [vmem:[%s781_s1 + $0x8] sm:$0xf] (!%p168_p2)  ;;  %vm443_vm3 = vcmask (!%p168_p2), 7168  }
   0xd   : > { %s786_s16 = smov (!%p200_p3, %s565_s16), 1 }
   0xe   : > { %s661_s17 = smul.u32 48, %s786_s16  ;;  %s571_s29 = sshll.u32 %s786_s16, 3 }
   0xf   : > { %s208_s6 = scalar_lea.vmem %s782_s2, %s571_s29  ;;  %s212_s9 = scalar_lea.vmem %s783_s3, %s571_s29 }
  0x10   : > { %s204_s20 = scalar_lea.vmem %s780_s0, %s661_s17  ;;  %s216_s12 = scalar_lea.vmem %s784_s4, %s571_s29 }
  0x11   : > { %v674_v1 = vld [vmem:[%s204_s20] sm:$0xff]   ;;  %v675_v2 = vld [vmem:[%s204_s20 + $0x8] sm:$0xff]   ;;  %v676_v3 = vld [vmem:[%s204_s20 + $0x10] sm:$0xff]  }
  0x12   : > { %263 = vrot.lane.b32.xlu0 %v674_v1, %s690_s21  ;;  %625 = vmatpush3.bf16.msra.mxu0 %v674_v1  ;;  %v677_v4 = vld [vmem:[%s204_s20 + $0x18] sm:$0xff]   ;;  %v678_v5 = vld [vmem:[%s204_s20 + $0x20] sm:$0xff]   ;;  %v679_v6 = vld [vmem:[%s204_s20 + $0x28] sm:$0xff]  }
  0x13   : > { %265 = vrot.lane.b32.xlu1 %v675_v2, %s690_s21  ;;  %626 = vmatprep.subr.bf16.mxu0 %v688_v0 }
  0x16   : > { %376 = vrot.lane.b32.xlu0 %v674_v1, %s691_s22  ;;  %627 = vmatpush3.bf16.msra.mxu0 %v675_v2 }
  0x17   : > { %378 = vrot.lane.b32.xlu1 %v675_v2, %s691_s22  ;;  %628 = vmatprep.subr.bf16.mxu0 %v688_v0 }
  0x1a   : > { %267 = vrot.lane.b32.xlu0 %v676_v3, %s690_s21  ;;  %629 = vmatpush3.bf16.msra.mxu0 %v676_v3 }
  0x1b   : > { %380 = vrot.lane.b32.xlu1 %v676_v3, %s691_s22  ;;  %630 = vmatprep.subr.bf16.mxu0 %v688_v0 }
  0x1e   : > { %269 = vrot.lane.b32.xlu0 %v677_v4, %s690_s21  ;;  %631 = vmatpush3.bf16.msra.mxu0 %v677_v4 }
  0x1f   : > { %382 = vrot.lane.b32.xlu1 %v677_v4, %s691_s22  ;;  %632 = vmatprep.subr.bf16.mxu0 %v688_v0 }
  0x22   : > { %271 = vrot.lane.b32.xlu0 %v678_v5, %s690_s21  ;;  %633 = vmatpush3.bf16.msra.mxu0 %v678_v5 }
  0x23   : > { %384 = vrot.lane.b32.xlu1 %v678_v5, %s691_s22  ;;  %634 = vmatprep.subr.bf16.mxu0 %v688_v0 }
  0x26   : > { %273 = vrot.lane.b32.xlu0 %v679_v6, %s690_s21  ;;  %635 = vmatpush3.bf16.msra.mxu0 %v679_v6 }
  0x27   : > { %386 = vrot.lane.b32.xlu1 %v679_v6, %s691_s22  ;;  %640 = vmatprep.subr.bf16.mxu0 %v688_v0 }
  0x29   : > { %637 = vmatmul.mubr.msk.bf16.vlgmr.msra.gmra.mrb[0].mxu0 %vm281_vm1, %v230_v7 }
  0x2a   : > { %652 = vmatprep.mubr.msk.bf16.mxu0 %vm689_vm0, %v688_v0 }
  0x84   : > { %v264_v8 = vpop.permute.xlu0 %263 }
  0x85   : > { %609 = vmatpush3.bf16.msra.mxu1 %v264_v8  ;;  %v266_v9 = vpop.permute.xlu1 %265 }
  0x86   : > { %610 = vmatprep.subr.bf16.mxu1 %v688_v0 }
  0x88   : > { %v377_v10 = vpop.permute.xlu0 %376 }
  0x89   : > { %611 = vmatpush3.bf16.msra.mxu1 %v266_v9  ;;  %641 = vmatpush3.bf16.msra.mxu0 %v377_v10  ;;  %v379_v11 = vpop.permute.xlu1 %378 }
  0x8a   : > { %642 = vmatprep.subr.bf16.mxu0 %v688_v0  ;;  %612 = vmatprep.subr.bf16.mxu1 %v688_v0 }
  0x8c   : > { %v268_v12 = vpop.permute.xlu0 %267 }
  0x8d   : > { %643 = vmatpush3.bf16.msra.mxu0 %v379_v11  ;;  %613 = vmatpush3.bf16.msra.mxu1 %v268_v12  ;;  %v381_v13 = vpop.permute.xlu1 %380 }
  0x8e   : > { %644 = vmatprep.subr.bf16.mxu0 %v688_v0  ;;  %614 = vmatprep.subr.bf16.mxu1 %v688_v0 }
  0x90   : > { %v270_v14 = vpop.permute.xlu0 %269 }
  0x91   : > { %645 = vmatpush3.bf16.msra.mxu0 %v381_v13  ;;  %615 = vmatpush3.bf16.msra.mxu1 %v270_v14  ;;  %v383_v15 = vpop.permute.xlu1 %382 }
  0x92   : > { %646 = vmatprep.subr.bf16.mxu0 %v688_v0  ;;  %616 = vmatprep.subr.bf16.mxu1 %v688_v0 }
  0x94   : > { %v272_v16 = vpop.permute.xlu0 %271 }
  0x95   : > { %647 = vmatpush3.bf16.msra.mxu0 %v383_v15  ;;  %617 = vmatpush3.bf16.msra.mxu1 %v272_v16  ;;  %v385_v17 = vpop.permute.xlu1 %384 }
  0x96   : > { %648 = vmatprep.subr.bf16.mxu0 %v688_v0  ;;  %618 = vmatprep.subr.bf16.mxu1 %v688_v0 }
  0x98   : > { %v274_v18 = vpop.permute.xlu0 %273 }
  0x99   : > { %649 = vmatpush3.bf16.msra.mxu0 %v385_v17  ;;  %619 = vmatpush3.bf16.msra.mxu1 %v274_v18  ;;  %v387_v20 = vpop.permute.xlu1 %386 }
  0x9a   : > { %650 = vmatprep.subr.bf16.mxu0 %v688_v0 }
  0x9c   : > { %621 = vmatmul.mubr.msk.bf16.vlgmr.msra.gmra.mrb[0].mxu1 %vm281_vm1, %v574_v19 }
  0x9d   : > { %651 = vmatpush3.bf16.msra.mxu0 %v387_v20 }
  0xa0   : > { %653 = vmatmul.mubr.msk.bf16.vlgmr.msra.gmra.mrb[0].mxu0 %vm281_vm1, %v583_v21 }
 0x16f   : > { %v319_v22 = vpop.f32.mrb[0].mxu1 }
 0x170   : > { %v622_v23 = vpop.f32.mrb[1].mxu1 }
 0x171   : > { %v322_v24 = vpop.f32.mrb[2].mxu1 }
 0x172   : > { %v623_v25 = vpop.f32.mrb[3].mxu1 }
 0x173   : > { %v431_v26 = vpop.f32.mrb[0].mxu0 }
 0x174   : > { %v656_v27 = vadd.f32 %v431_v26, %v319_v22  ;;  %v654_v28 = vpop.f32.mrb[1].mxu0 }
 0x175   : > { %v434_v29 = vpop.f32.mrb[2].mxu0 }
 0x176   : > { %v655_v30 = vpop.f32.mrb[3].mxu0  ;;  %v440_v31 = vsel %vm438_vm2, %v656_v27, 0.0  ;;  %439 = vst.msk [vmem:[%s208_s6] sm:$0xff] %vm438_vm2, %v656_v27  ;;  %v445_v32 = vmul.f32 %v656_v27, %v656_v27 }
 0x177   : > { %441 = vadd.xlane.f32.xlu0 %v440_v31 }
 0x178   : > { %v446_v33 = vsel %vm438_vm2, %v445_v32, 0.0 }
 0x179   : > { %447 = vadd.xlane.f32.xlu1 %v446_v33 }
 0x204   : > { %v442_v34 = vpop.xlane.xlu0 %441 }
 0x205   : > { %444 = vst.msk [vmem:[%s212_s9] sm:$0xff] %vm443_vm3, %v442_v34 }
 0x206   : > { %v448_v35 = vpop.xlane.xlu1 %447 }
 0x207   : > { %449 = vst.msk [vmem:[%s216_s12] sm:$0xff] %vm443_vm3, %v448_v35 }
 0x208 PF: > { %s15_s15 = sadd.s32 1, %s686_s15  }
 0x209   : > { %p12_p4 = scmp.ge.s32.totalorder %s15_s15, 4  }
 0x20b   :  { %14 = sbr.rel (!%p12_p4) target bundleno = 1 (0x1), region = 84 }

// kernel: forward.27
= control target key start
LH: loop header
LB: loop body
LE: loop exit
PB: predicated region body
PF: predicated region fallthrough
CT: control target
= control target key end

     0   :  { %s467_s15 = smov 0   ;;  %s493_s0 = inlined_call_operand.vmem [shape: bf16[2,16,64], index: 0, kind: input, shape index: {}]   ;;  %s494_s1 = inlined_call_operand.vmem [shape: bf16[1,2,16], index: 1, kind: input, shape index: {}]   ;;  %s495_s2 = inlined_call_operand.vmem [shape: f32[2,2,64], index: 2, kind: output, shape index: {0}]   ;;  %s496_s3 = inlined_call_operand.vmem [shape: f32[2,2,1], index: 3, kind: output, shape index: {1}]   ;;  %s497_s4 = inlined_call_operand.vmem [shape: f32[2,2,1], index: 4, kind: output, shape index: {2}]  }
   0x1 LB: > { %s398_s16 = sadd.s32 4294967295, %s438_s15   ;;  %p402_p0 = scmp.ge.s32.totalorder %s438_s15, 1  ;;  %s438_s15 = sphi %s467_s15, %s15_s15  }
   0x2   : > { %p167_p1 = scmp.lt.s32.totalorder %s438_s15, 3 }
   0x4   : > { %p168_p2 = pnand %p402_p0, %p167_p1 }
   0x5   : > { %p200_p3 = scmp.lt.s32.totalorder (!%p168_p2), %s398_s16, 1  ;;  %v440_v0 = vmov (!%p168_p2), 0.0   ;;  %vm441_vm0 = vmmov (!%p168_p2), 0   ;;  %v220_v2 = vld [vmem:[%s494_s1] sm:$0x1] (!%p168_p2)  ;;  %vm227_vm1 = vcmask (!%p168_p2), 130048  }
   0x6   : > { %171 = sbr.rel (%p168_p2) target bundleno = 380 (0x17c), region = 28  ;;  %415 = vmatprep.subr.bf16.mxu0 (!%p168_p2), %v440_v0  ;;  %417 = vmatprep.mubr.msk.bf16.mxu0 (!%p168_p2), %vm441_vm0, %v440_v0  ;;  %vm271_vm2 = vcmask (!%p168_p2), 517120   ;;  %vm276_vm3 = vcmask (!%p168_p2), 1024  }
   0xd   : > { %s499_s16 = smov (!%p200_p3, %s398_s16), 1 }
   0xe   : > { %s412_s17 = sshll.u32 %s499_s16, 3  ;;  %s405_s23 = sshll.u32 %s499_s16, 1 }
   0xf   : > { %s204_s20 = scalar_lea.vmem %s493_s0, %s412_s17  ;;  %s208_s26 = scalar_lea.vmem %s495_s2, %s405_s23 }
  0x10   : > { %v431_v1 = vld [vmem:[%s204_s20] sm:$0xff]   ;;  %s212_s29 = scalar_lea.vmem %s496_s3, %s405_s23  ;;  %s216_s6 = scalar_lea.vmem %s497_s4, %s405_s23 }
  0x11   : > { %416 = vmatpush3.bf16.msra.mxu0 %v431_v1 }
  0x14   : > { %418 = vmatmul.mubr.msk.bf16.vlgmr.msra.gmra.mrb[0].mxu0 %vm227_vm1, %v220_v2 }
  0xe7   : > { %v265_v3 = vpop.f32.mrb[0].mxu0 }
  0xe8   : > { %v419_v4 = vpop.f32.mrb[1].mxu0  ;;  %v273_v5 = vsel %vm271_vm2, %v265_v3, 0.0  ;;  %272 = vst.msk [vmem:[%s208_s26] sm:$0x3] %vm271_vm2, %v265_v3  ;;  %v278_v6 = vmul.f32 %v265_v3, %v265_v3 }
  0xe9   : > { %274 = vadd.xlane.f32.xlu0 %v273_v5  ;;  %v268_v7 = vpop.f32.mrb[2].mxu0 }
  0xea   : > { %v420_v8 = vpop.f32.mrb[3].mxu0  ;;  %v279_v9 = vsel %vm271_vm2, %v278_v6, 0.0 }
  0xed   : > { %280 = vadd.xlane.f32.xlu0 %v279_v9 }
 0x176   : > { %v275_v10 = vpop.xlane.xlu0 %274 }
 0x177   : > { %277 = vst.msk [vmem:[%s212_s29] sm:$0x3] %vm276_vm3, %v275_v10 }
 0x17a   : > { %v281_v11 = vpop.xlane.xlu0 %280 }
 0x17b   : > { %282 = vst.msk [vmem:[%s216_s6] sm:$0x3] %vm276_vm3, %v281_v11 }
 0x17c PF: > { %s15_s15 = sadd.s32 1, %s438_s15  }
 0x17d   : > { %p12_p4 = scmp.ge.s32.totalorder %s15_s15, 4  }
 0x17f   :  { %14 = sbr.rel (!%p12_p4) target bundleno = 1 (0x1), region = 82 }

// kernel: forward.26
= control target key start
LH: loop header
LB: loop body
LE: loop exit
PB: predicated region body
PF: predicated region fallthrough
CT: control target
= control target key end

     0   :  { %s642_s15 = smov 0   ;;  %s684_s0 = inlined_call_operand.vmem [shape: bf16[2,48,80], index: 0, kind: input, shape index: {}]   ;;  %s685_s1 = inlined_call_operand.vmem [shape: bf16[3,2,48], index: 1, kind: input, shape index: {}]   ;;  %s686_s2 = inlined_call_operand.vmem [shape: f32[2,2,64], index: 2, kind: output, shape index: {0}]   ;;  %s687_s3 = inlined_call_operand.vmem [shape: f32[2,2,1], index: 3, kind: output, shape index: {1}]   ;;  %s688_s4 = inlined_call_operand.vmem [shape: f32[2,2,1], index: 4, kind: output, shape index: {2}]  }
   0x1 LB: > { %s523_s16 = sadd.s32 4294967295, %s611_s15   ;;  %p527_p0 = scmp.ge.s32.totalorder %s611_s15, 1  ;;  %s611_s15 = sphi %s642_s15, %s15_s15  }
   0x2   : > { %p167_p1 = scmp.lt.s32.totalorder %s611_s15, 3 }
   0x4   : > { %p168_p2 = pnand %p527_p0, %p167_p1 }
   0x5   : > { %p200_p3 = scmp.lt.s32.totalorder (!%p168_p2), %s523_s16, 1  ;;  %v613_v0 = vmov (!%p168_p2), 0.0   ;;  %vm614_vm0 = vmmov (!%p168_p2), 0   ;;  %s615_s21 = smov (!%p168_p2), 120   ;;  %v224_v4 = vld [vmem:[%s685_s1] sm:$0x1] (!%p168_p2) }
   0x6   : > { %171 = sbr.rel (%p168_p2) target bundleno = 508 (0x1fc), region = 28  ;;  %564 = vmatprep.subr.bf16.mxu0 (!%p168_p2), %v613_v0  ;;  %554 = vmatprep.subr.bf16.mxu1 (!%p168_p2), %v613_v0  ;;  %s616_s22 = smov (!%p168_p2), 112   ;;  %vm251_vm1 = vcmask (!%p168_p2), 392192   ;;  %v532_v10 = vld [vmem:[%s685_s1 + $0x1] sm:$0x1] (!%p168_p2)  ;;  %vm396_vm2 = vcmask (!%p168_p2), 517120  }
   0x7   : > { %570 = vmatprep.mubr.msk.bf16.mxu0 (!%p168_p2), %vm614_vm0, %v613_v0  ;;  %560 = vmatprep.mubr.msk.bf16.mxu1 (!%p168_p2), %vm614_vm0, %v613_v0  ;;  %v538_v12 = vld [vmem:[%s685_s1 + $0x2] sm:$0x1] (!%p168_p2)  ;;  %vm401_vm3 = vcmask (!%p168_p2), 1024  }
   0xd   : > { %s690_s16 = smov (!%p200_p3, %s523_s16), 1 }
   0xe   : > { %s589_s17 = smul.u32 24, %s690_s16  ;;  %s529_s29 = sshll.u32 %s690_s16, 1 }
   0xf   : > { %s208_s6 = scalar_lea.vmem %s686_s2, %s529_s29  ;;  %s212_s9 = scalar_lea.vmem %s687_s3, %s529_s29 }
  0x10   : > { %s204_s20 = scalar_lea.vmem %s684_s0, %s589_s17  ;;  %s216_s12 = scalar_lea.vmem %s688_s4, %s529_s29 }
  0x11   : > { %v602_v1 = vld [vmem:[%s204_s20] sm:$0xff]   ;;  %v603_v2 = vld [vmem:[%s204_s20 + $0x8] sm:$0xff]   ;;  %v604_v3 = vld [vmem:[%s204_s20 + $0x10] sm:$0xff]  }
  0x12   : > { %242 = vrot.lane.b32.xlu0 %v602_v1, %s615_s21  ;;  %565 = vmatpush3.bf16.msra.mxu0 %v602_v1 }
  0x13   : > { %244 = vrot.lane.b32.xlu1 %v603_v2, %s615_s21  ;;  %566 = vmatprep.subr.bf16.mxu0 %v613_v0 }
  0x16   : > { %343 = vrot.lane.b32.xlu0 %v602_v1, %s616_s22  ;;  %567 = vmatpush3.bf16.msra.mxu0 %v603_v2 }
  0x17   : > { %345 = vrot.lane.b32.xlu1 %v603_v2, %s616_s22  ;;  %568 = vmatprep.subr.bf16.mxu0 %v613_v0 }
  0x1a   : > { %246 = vrot.lane.b32.xlu0 %v604_v3, %s615_s21  ;;  %569 = vmatpush3.bf16.msra.mxu0 %v604_v3 }
  0x1b   : > { %347 = vrot.lane.b32.xlu1 %v604_v3, %s616_s22  ;;  %574 = vmatprep.subr.bf16.mxu0 %v613_v0 }
  0x1d   : > { %571 = vmatmul.mubr.msk.bf16.vlgmr.msra.gmra.mrb[0].mxu0 %vm251_vm1, %v224_v4 }
  0x1e   : > { %580 = vmatprep.mubr.msk.bf16.mxu0 %vm614_vm0, %v613_v0 }
  0x84   : > { %v243_v5 = vpop.permute.xlu0 %242 }
  0x85   : > { %555 = vmatpush3.bf16.msra.mxu1 %v243_v5  ;;  %v245_v6 = vpop.permute.xlu1 %244 }
  0x86   : > { %556 = vmatprep.subr.bf16.mxu1 %v613_v0 }
  0x88   : > { %v344_v7 = vpop.permute.xlu0 %343 }
  0x89   : > { %557 = vmatpush3.bf16.msra.mxu1 %v245_v6  ;;  %575 = vmatpush3.bf16.msra.mxu0 %v344_v7  ;;  %v346_v8 = vpop.permute.xlu1 %345 }
  0x8a   : > { %576 = vmatprep.subr.bf16.mxu0 %v613_v0  ;;  %558 = vmatprep.subr.bf16.mxu1 %v613_v0 }
  0x8c   : > { %v247_v9 = vpop.permute.xlu0 %246 }
  0x8d   : > { %577 = vmatpush3.bf16.msra.mxu0 %v346_v8  ;;  %559 = vmatpush3.bf16.msra.mxu1 %v247_v9  ;;  %v348_v11 = vpop.permute.xlu1 %347 }
  0x8e   : > { %578 = vmatprep.subr.bf16.mxu0 %v613_v0 }
  0x90   : > { %561 = vmatmul.mubr.msk.bf16.vlgmr.msra.gmra.mrb[0].mxu1 %vm251_vm1, %v532_v10 }
  0x91   : > { %579 = vmatpush3.bf16.msra.mxu0 %v348_v11 }
  0x94   : > { %581 = vmatmul.mubr.msk.bf16.vlgmr.msra.gmra.mrb[0].mxu0 %vm251_vm1, %v538_v12 }
 0x163   : > { %v289_v13 = vpop.f32.mrb[0].mxu1 }
 0x164   : > { %v562_v14 = vpop.f32.mrb[1].mxu1 }
 0x165   : > { %v292_v15 = vpop.f32.mrb[2].mxu1 }
 0x166   : > { %v563_v16 = vpop.f32.mrb[3].mxu1 }
 0x167   : > { %v389_v17 = vpop.f32.mrb[0].mxu0 }
 0x168   : > { %v584_v18 = vadd.f32 %v389_v17, %v289_v13  ;;  %v582_v19 = vpop.f32.mrb[1].mxu0 }
 0x169   : > { %v392_v20 = vpop.f32.mrb[2].mxu0 }
 0x16a   : > { %v583_v21 = vpop.f32.mrb[3].mxu0  ;;  %v398_v22 = vsel %vm396_vm2, %v584_v18, 0.0  ;;  %397 = vst.msk [vmem:[%s208_s6] sm:$0x3] %vm396_vm2, %v584_v18  ;;  %v403_v23 = vmul.f32 %v584_v18, %v584_v18 }
 0x16b   : > { %399 = vadd.xlane.f32.xlu0 %v398_v22 }
 0x16c   : > { %v404_v24 = vsel %vm396_vm2, %v403_v23, 0.0 }
 0x16d   : > { %405 = vadd.xlane.f32.xlu1 %v404_v24 }
 0x1f8   : > { %v400_v25 = vpop.xlane.xlu0 %399 }
 0x1f9   : > { %402 = vst.msk [vmem:[%s212_s9] sm:$0x3] %vm401_vm3, %v400_v25 }
 0x1fa   : > { %v406_v26 = vpop.xlane.xlu1 %405 }
 0x1fb   : > { %407 = vst.msk [vmem:[%s216_s12] sm:$0x3] %vm401_vm3, %v406_v26 }
 0x1fc PF: > { %s15_s15 = sadd.s32 1, %s611_s15  }
 0x1fd   : > { %p12_p4 = scmp.ge.s32.totalorder %s15_s15, 4  }
 0x1ff   :  { %14 = sbr.rel (!%p12_p4) target bundleno = 1 (0x1), region = 84 }

// kernel: forward.28
= control target key start
LH: loop header
LB: loop body
LE: loop exit
PB: predicated region body
PF: predicated region fallthrough
CT: control target
= control target key end

     0   :  { %s526_s21 = smov 0   ;;  %s528_s22 = smov 0   ;;  %s574_s0 = inlined_call_operand.vmem [shape: f32[2,2,64], index: 0, kind: input, shape index: {}]   ;;  %s575_s1 = inlined_call_operand.vmem [shape: f32[2,2,64], index: 1, kind: input, shape index: {}]   ;;  %s576_s2 = inlined_call_operand.vmem [shape: f32[2,1], index: 2, kind: input, shape index: {}]   ;;  %s577_s3 = inlined_call_operand.vmem [shape: f32[2,1], index: 3, kind: input, shape index: {}]   ;;  %s578_s4 = inlined_call_operand.vmem [shape: f32[2,1], index: 4, kind: input, shape index: {}]   ;;  %s579_s5 = inlined_call_operand.vmem [shape: f32[2,1], index: 5, kind: input, shape index: {}]   ;;  %s580_s6 = inlined_call_operand.vmem [shape: f32[2,2,64], index: 6, kind: output, shape index: {}]  }
   0x1   :  { %s530_s23 = smov 0  }
   0x2 LB: > { %s28_s24 = sadd.s32 1, %s484_s22  ;;  %p433_p0 = scmp.ge.s32.totalorder %s488_s23, 1  ;;  %s488_s23 = sphi %s530_s23, %s16_s23   ;;  %s484_s22 = sphi %s528_s22, %s582_s22   ;;  %s480_s21 = sphi %s526_s21, %s581_s21  }
   0x3   : > { %p30_p1 = scmp.ge.s32.totalorder %s28_s24, 2  ;;  %p244_p2 = scmp.lt.s32.totalorder %s488_s23, 3 }
   0x5   : > { %s584_s24 = smov (%p30_p1, %s28_s24), 0  ;;  %p245_p3 = pnand %p433_p0, %p244_p2 }
   0x6   : > { %v307_v0 = vld [vmem:[%s576_s2] sm:$0x3] (!%p245_p3)  ;;  %v490_v2 = vmov (!%p245_p3), 0   ;;  %p285_p4 = scmp.lt.s32.totalorder (!%p245_p3), %s480_s21, 1  ;;  %vm338_vm0 = vcmask (!%p245_p3), 517120  }
   0x7   : > { %248 = sbr.rel (%p245_p3) target bundleno = 149 (0x95), region = 44  ;;  %v323_v1 = vld [vmem:[%s578_s4] sm:$0x3] (!%p245_p3)  ;;  %464 = vset.pattern.permute.xlu0 (!%p245_p3), %v490_v2  ;;  %465 = vset.pattern.permute.xlu1 (!%p245_p3), %v490_v2 }
   0x8   : > { %310 = vperm.xlu0 (!%p245_p3), %464, %v307_v0   ;;  %326 = vperm.xlu1 (!%p245_p3), %465, %v323_v1   ;;  %v314_v3 = vld [vmem:[%s577_s3] sm:$0x3] (!%p245_p3) }
   0x9   : > { %v331_v4 = vld [vmem:[%s579_s5] sm:$0x3] (!%p245_p3) }
   0xc   : > { %317 = vperm.xlu0 (!%p245_p3), %464, %v314_v3   ;;  %334 = vperm.xlu1 (!%p245_p3), %465, %v331_v4  }
   0xe   : > { %s586_s21 = smov (!%p285_p4, %s480_s21), 1 }
   0xf   : > { %s434_s9 = sshll.u32 %s586_s21, 1 }
  0x10   : > { %s291_s12 = scalar_lea.vmem %s574_s0, %s434_s9  ;;  %s298_s15 = scalar_lea.vmem %s575_s1, %s434_s9 }
  0x11   : > { %v306_v6 = vld [vmem:[%s291_s12] sm:$0x3]  ;;  %s305_s18 = scalar_lea.vmem %s580_s6, %s434_s9 }
  0x12   : > { %v322_v7 = vld [vmem:[%s298_s15] sm:$0x3] }
  0x87   : > { %v311_v5 = vpop.permute.xlu0 %310  ;;  %v327_v9 = vpop.permute.xlu1 %326 }
  0x88   : > { %v313_v8 = vmul.f32 %v311_v5, %v306_v6  ;;  %v329_v11 = vmul.f32 %v327_v9, %v322_v7 }
  0x8b   : > { %v318_v10 = vpop.permute.xlu0 %317  ;;  %v335_v15 = vpop.permute.xlu1 %334 }
  0x8c   : > { %v320_v12 = vadd.f32 %v318_v10, %v313_v8 }
  0x8e   : > { %v321_v13 = vmax.f32 %v320_v12, 0.0 }
  0x90   : > { %v330_v14 = vadd.f32 %v329_v11, %v321_v13 }
  0x92   : > { %v337_v16 = vadd.f32 %v335_v15, %v330_v14 }
  0x94   : > { %339 = vst.msk [vmem:[%s305_s18] sm:$0x3] %vm338_vm0, %v337_v16 }
  0x95 PF: > { %s16_s23 = sadd.s32 1, %s488_s23   ;;  %s581_s21 = smov %s484_s22 }
  0x96   : > { %p13_p5 = scmp.ge.s32.totalorder %s16_s23, 4   ;;  %s582_s22 = smov %s584_s24 }
  0x98   :  { %15 = sbr.rel (!%p13_p5) target bundleno = 2 (0x2), region = 77 }

// kernel: forward.29
= control target key start
LH: loop header
LB: loop body
LE: loop exit
PB: predicated region body
PF: predicated region fallthrough
CT: control target
= control target key end

     0   :  { %s514_s12 = smov 0   ;;  %s550_s0 = inlined_call_operand.vmem [shape: bf16[2,9,288], index: 0, kind: input, shape index: {}]   ;;  %s551_s1 = inlined_call_operand.vmem [shape: bf16[3,2,9], index: 1, kind: input, shape index: {}]   ;;  %s552_s2 = inlined_call_operand.vmem [shape: f32[2,1], index: 2, kind: input, shape index: {}]   ;;  %s553_s3 = inlined_call_operand.vmem [shape: f32[2,2,256], index: 3, kind: output, shape index: {}]  }
   0x1 LB: > { %s444_s13 = sadd.s32 4294967295, %s488_s12   ;;  %p448_p0 = scmp.ge.s32.totalorder %s488_s12, 1  ;;  %s488_s12 = sphi %s514_s12, %s13_s12  }
   0x2   : > { %p137_p1 = scmp.lt.s32.totalorder %s488_s12, 3 }
   0x4   : > { %p138_p2 = pnand %p448_p0, %p137_p1 }
   0x5   : > { %p161_p3 = scmp.lt.s32.totalorder (!%p138_p2), %s444_s13, 1  ;;  %vm205_vm0 = vcmask (!%p138_p2), 1043456   ;;  %vm206_vm1 = vcmask (!%p138_p2), 1044480   ;;  %v490_v0 = vmov (!%p138_p2), 65535   ;;  %v491_v3 = vmov (!%p138_p2), 0   ;;  %s492_s18 = smov (!%p138_p2), 112  }
   0x6   : > { %141 = sbr.rel (%p138_p2) target bundleno = 372 (0x174), region = 32  ;;  %v207_v1 = vsel (!%p138_p2), %vm205_vm0, 4294967295, %v490_v0  ;;  %247 = vmatprep.mubr.bf16.mxu0 (!%p138_p2), %v491_v3  ;;  %297 = vmatprep.mubr.bf16.mxu1 (!%p138_p2), %v491_v3  ;;  %vm201_vm2 = vcmask (!%p138_p2), 72704   ;;  %v176_v9 = vld [vmem:[%s551_s1] sm:$0x1] (!%p138_p2)  ;;  %s493_s21 = smov (!%p138_p2), 96  }
   0x7   : > { %v208_v5 = vsel (!%p138_p2), %vm206_vm1, %v207_v1, 0  ;;  %477 = vset.pattern.permute.xlu0 (!%p138_p2), %v491_v3  ;;  %v369_v10 = vld [vmem:[%s552_s2] sm:$0x3] (!%p138_p2)  ;;  %vm198_vm3 = vcmask (!%p138_p2), 916480   ;;  %vm314_vm4 = vcmask (!%p138_p2), 785408  }
   0x8   : > { %v452_v22 = vld [vmem:[%s551_s1 + $0x1] sm:$0x1] (!%p138_p2)  ;;  %v458_v26 = vld [vmem:[%s551_s1 + $0x2] sm:$0x1] (!%p138_p2) }
   0xd   : > { %s555_s13 = smov (!%p161_p3, %s444_s13), 1 }
   0xe   : > { %s464_s14 = smul.u32 24, %s555_s13  ;;  %s463_s28 = sshll.u32 %s555_s13, 2 }
   0xf   : > { %s170_s4 = scalar_lea.vmem %s553_s3, %s463_s28 }
  0x10   : > { %s165_s17 = scalar_lea.vmem %s550_s0, %s464_s14 }
  0x11   : > { %v478_v2 = vld [vmem:[%s165_s17 + $0x4] ss:$12 sps:$4 sm:$0x1f]   ;;  %v480_v4 = vld [vmem:[%s165_s17] ss:$12 sps:$4 sm:$0x1f]  }
  0x12   : > { %194 = vrot.lane.b32.xlu0 %v478_v2, %s492_s18  ;;  %v481_v6 = vld [vmem:[%s165_s17 + $0x8] ss:$12 sps:$4 sm:$0x1f]   ;;  %v263_v7 = vand.u32 %v478_v2, %v208_v5  ;;  %192 = vrot.lane.b32.xlu1 %v480_v4, %s492_s18  ;;  %v260_v8 = vand.u32 %v480_v4, %v208_v5 }
  0x14   : > { %265 = vmatprep.subr.bf16.mxu1 %v263_v7 }
  0x15   : > { %266 = vmatpush1.bf16.msra.mxu1 %v260_v8 }
  0x16   : > { %196 = vrot.lane.b32.xlu0 %v481_v6, %s492_s18  ;;  %310 = vrot.lane.b32.xlu1 %v478_v2, %s493_s21 }
  0x18   : > { %457 = vmatmul.mubr.msk.bf16.vlgmr.msra.gmra.mrb[0].mxu1 %vm201_vm2, %v176_v9 }
  0x1a   : > { %312 = vrot.lane.b32.xlu0 %v481_v6, %s493_s21  ;;  %308 = vrot.lane.b32.xlu1 %v480_v4, %s493_s21 }
  0x1e   : > { %372 = vperm.xlu0 %477, %v369_v10  }
  0x84   : > { %v195_v11 = vpop.permute.xlu0 %194  ;;  %v193_v12 = vpop.permute.xlu1 %192 }
  0x85   : > { %v199_v13 = vsel %vm198_vm3, %v193_v12, %v195_v11 }
  0x86   : > { %v210_v18 = vand.u32 %v208_v5, %v199_v13 }
  0x88   : > { %v197_v14 = vpop.permute.xlu0 %196  ;;  %v311_v15 = vpop.permute.xlu1 %310 }
  0x89   : > { %v200_v16 = vsel %vm198_vm3, %v195_v11, %v197_v14 }
  0x8a   : > { %v213_v17 = vand.u32 %v208_v5, %v200_v16 }
  0x8c   : > { %215 = vmatprep.subr.bf16.mxu0 %v213_v17  ;;  %v313_v19 = vpop.permute.xlu0 %312  ;;  %v309_v21 = vpop.permute.xlu1 %308 }
  0x8d   : > { %v316_v20 = vsel %vm314_vm4, %v311_v15, %v313_v19  ;;  %216 = vmatpush1.bf16.msra.mxu0 %v210_v18  ;;  %v315_v24 = vsel %vm314_vm4, %v309_v21, %v311_v15 }
  0x8e   : > { %v324_v23 = vand.u32 %v316_v20, %v208_v5  ;;  %v321_v25 = vand.u32 %v315_v24, %v208_v5 }
  0x90   : > { %456 = vmatmul.mubr.msk.bf16.vlgmr.msra.gmra.mrb[0].mxu0 %vm201_vm2, %v452_v22  ;;  %326 = vmatprep.subr.bf16.mxu0 %v324_v23 }
  0x91   : > { %327 = vmatpush1.bf16.msra.mxu0 %v321_v25  ;;  %358 = vmatprep.mubr.bf16.mxu0 %v491_v3 }
  0x98   : > { %459 = vmatmul.mubr.msk.bf16.vlgmr.msra.gmra.mrb[4].mxu0 %vm201_vm2, %v458_v26 }
  0x9d   : > { %v373_v38 = vpop.permute.xlu0 %372 }
  0xeb   : > { %v299_v27 = vpop.f32.mrb[0].mxu1 }
  0xec   : > { %v301_v28 = vpop.f32.mrb[1].mxu1 }
  0xed   : > { %v303_v29 = vpop.f32.mrb[2].mxu1 }
  0xee   : > { %v304_v30 = vpop.f32.mrb[3].mxu1 }
 0x163   : > { %v249_v31 = vpop.f32.mrb[0].mxu0 }
 0x164   : > { %v300_v32 = vadd.f32 %v299_v27, %v249_v31  ;;  %v251_v33 = vpop.f32.mrb[1].mxu0 }
 0x165   : > { %v302_v34 = vadd.f32 %v301_v28, %v251_v33  ;;  %v253_v35 = vpop.f32.mrb[2].mxu0 }
 0x166   : > { %v254_v36 = vpop.f32.mrb[3].mxu0 }
 0x16b   : > { %v360_v37 = vpop.f32.mrb[4].mxu0 }
 0x16c   : > { %v367_v39 = vadd.f32 %v360_v37, %v300_v32  ;;  %v362_v40 = vpop.f32.mrb[5].mxu0 }
 0x16d   : > { %v368_v41 = vadd.f32 %v362_v40, %v302_v34  ;;  %v364_v42 = vpop.f32.mrb[6].mxu0 }
 0x16e   : > { %v375_v43 = vadd.f32 %v373_v38, %v367_v39  ;;  %v365_v44 = vpop.f32.mrb[7].mxu0 }
 0x16f   : > { %v376_v45 = vadd.f32 %v373_v38, %v368_v41 }
 0x171   : > { %v379_v46 = vcombine.low %v375_v43, %v376_v45 }
 0x173   : > { %460 = vst.sshfl [vmem:[%s170_s4] sm:$0x33 pattern:$0x76325410] %v379_v46 }
 0x174 PF: > { %s13_s12 = sadd.s32 1, %s488_s12  }
 0x175   : > { %p10_p4 = scmp.ge.s32.totalorder %s13_s12, 4  }
 0x177   :  { %12 = sbr.rel (!%p10_p4) target bundleno = 1 (0x1), region = 64 }

</bundles_post_ra>
